<compile_context>
chip_gen: v7x
topology: tpu7x:2x2x1
jax: 0.10.0
libtpu: 0.0.40
codegen_flags: <defaults>
</compile_context>

<pallas_src>
import functools

import jax
import jax.numpy as jnp
from jax.experimental import pallas as pl
from jax.experimental.pallas import tpu as pltpu

HIDDEN = 256


def _gnn_mlp_kernel(a_ref, w1_ref, b1_ref, w2_ref, b2_ref,
                    w3_ref, b3_ref, w4_ref, b4_ref, o_ref, *, act_dtype):
    """One row-tile of the 4-layer MLP.

    a_ref  : (TM, k)     aggregated edge attributes for TM nodes (f32)
    w1/2/3 : bf16 weights (biases f32)
    w4_ref : (1, HIDDEN) final-layer weight as a row vector (f32)
    o_ref  : (1, TM)     lane-dense sigmoid outputs for the same TM nodes (f32)
    """
    mm = jnp.bfloat16
    a = a_ref[...].astype(mm)                                                   # (TM, k)
    acc = jnp.dot(a, w1_ref[...], preferred_element_type=jnp.float32) + b1_ref[...]
    h = jnp.tanh(acc.astype(act_dtype))
    acc = jnp.dot(h.astype(mm), w2_ref[...],
                  preferred_element_type=jnp.float32) + b2_ref[...]
    h = jnp.tanh(acc.astype(act_dtype))
    acc = jnp.dot(h.astype(mm), w3_ref[...],
                  preferred_element_type=jnp.float32) + b3_ref[...]
    h = jnp.tanh(acc.astype(act_dtype))                                         # (TM, HIDDEN)
    # Final Linear(HIDDEN, 1): contract the (1, HIDDEN) w4 row against h's hidden
    # axis so the result lands directly as a lane-dense (1, TM) row — no h.T, no
    # masked (TM, 1) store, negligible MXU cost (1/256 of one hidden layer).
    logit = jax.lax.dot_general(
        w4_ref[...].astype(h.dtype), h,
        dimension_numbers=(((1,), (1,)), ((), ())),
        preferred_element_type=jnp.float32)                                     # (1, TM)
    o_ref[...] = jax.nn.sigmoid(logit + b4_ref[...])


def _act_dtype_for_device():
    """bf16 tanh only where the EUP/VPU support bf16 (v6e / v7x); f32 elsewhere."""
    try:
        kind = jax.devices()[0].device_kind.lower()
    except Exception:
        return jnp.float32
    if "v6" in kind or "v7" in kind:
        return jnp.bfloat16
    return jnp.float32


def init_params(key, k, hidden=HIDDEN, dtype=jnp.float32):
    """Deterministic init mimicking torch.nn.Linear (U(-1/sqrt(fan_in), +))."""
    def linear(key, fan_in, fan_out):
        kw, kb = jax.random.split(key)
        bound = 1.0 / jnp.sqrt(fan_in)
        w = jax.random.uniform(kw, (fan_in, fan_out), dtype, -bound, bound)
        b = jax.random.uniform(kb, (1, fan_out), dtype, -bound, bound)
        return w, b

    k1, k2, k3, k4 = jax.random.split(key, 4)
    w1, b1 = linear(k1, k, hidden)
    w2, b2 = linear(k2, hidden, hidden)
    w3, b3 = linear(k3, hidden, hidden)
    w4, b4 = linear(k4, hidden, 1)
    return (w1, b1, w2, b2, w3, b3, w4, b4)


@functools.partial(jax.jit, static_argnames=("k", "tm"))
def gnn_forward(x, edge_index, edge_attr, params, *, k, tm=1024):
    """Equivalent of GNN(k).forward(data).

    x / edge_index are accepted for API parity but (as in the PyTorch module) do
    not participate in the math: message() returns edge_attr only, and aggregate()
    just reshapes the per-edge messages into (N, k) rows.
    """
    del x, edge_index  # unused by the math, matching PyTorch semantics
    w1, b1, w2, b2, w3, b3, w4, b4 = params

    a = edge_attr.reshape(-1, k).astype(jnp.float32)   # input_aggr: (N, k)
    n = a.shape[0]

    # bf16 weights for the MXU-heavy layers (cast once, wrapper-side).
    w1 = w1.astype(jnp.bfloat16)
    w2 = w2.astype(jnp.bfloat16)
    w3 = w3.astype(jnp.bfloat16)
    w4_row = w4.reshape(1, HIDDEN).astype(jnp.float32)   # row layout for the lane-dense final dot
    b4 = b4.reshape(1, 1).astype(jnp.float32)

    # Row tile: large (MXU fill + per-grid-step overhead amortization), multiple of
    # 128 (lane-aligned (1, tm) output block), capped at the padded problem size,
    # and clamped so the "parallel" grid axis has >= 2 steps whenever n > 128
    # (v7x shards that axis across its 2 TensorCores).
    tm = min(tm, pl.cdiv(n, 128) * 128)
    if n > 128:
        tm = min(tm, pl.cdiv(pl.cdiv(n, 2), 128) * 128)
    tm = max(128, tm)
    n_blocks = pl.cdiv(n, tm)

    act_dtype = _act_dtype_for_device()

    flops = 2 * n * (k * HIDDEN + 2 * HIDDEN * HIDDEN + HIDDEN)
    transcendentals = n * (3 * HIDDEN + 1)
    bytes_accessed = (4 * (n * k + n)                       # input rows + output
                      + 2 * (k * HIDDEN + 2 * HIDDEN * HIDDEN)  # bf16 W1..W3
                      + 4 * (4 * HIDDEN + 1))               # f32 biases + w4 + b4

    out = pl.pallas_call(
        functools.partial(_gnn_mlp_kernel, act_dtype=act_dtype),
        out_shape=jax.ShapeDtypeStruct((1, n_blocks * tm), jnp.float32),
        grid_spec=pltpu.PrefetchScalarGridSpec(
            num_scalar_prefetch=0,
            grid=(n_blocks,),
            in_specs=[
                pl.BlockSpec((tm, k), lambda i: (i, 0)),           # rows of input_aggr
                pl.BlockSpec((k, HIDDEN), lambda i: (0, 0)),       # W1 (resident, bf16)
                pl.BlockSpec((1, HIDDEN), lambda i: (0, 0)),       # b1
                pl.BlockSpec((HIDDEN, HIDDEN), lambda i: (0, 0)),  # W2 (bf16)
                pl.BlockSpec((1, HIDDEN), lambda i: (0, 0)),       # b2
                pl.BlockSpec((HIDDEN, HIDDEN), lambda i: (0, 0)),  # W3 (bf16)
                pl.BlockSpec((1, HIDDEN), lambda i: (0, 0)),       # b3
                pl.BlockSpec((1, HIDDEN), lambda i: (0, 0)),       # W4 as a row vector
                pl.BlockSpec((1, 1), lambda i: (0, 0)),            # b4
            ],
            out_specs=pl.BlockSpec((1, tm), lambda i: (0, i)),     # lane-dense row
        ),
        compiler_params=pltpu.CompilerParams(
            dimension_semantics=("parallel",)),
        cost_estimate=pl.CostEstimate(
            flops=flops,
            transcendentals=transcendentals,
            bytes_accessed=bytes_accessed),
    )(a, w1, b1, w2, b2, w3, b3, w4_row, b4)

    # torch.squeeze(out, 1): flat (N,) scores; drop the padded tail columns.
    return out[0, :n]


def _reference(edge_attr, params, k):
    """Pure-JAX f32 reference matching the PyTorch module exactly."""
    w1, b1, w2, b2, w3, b3, w4, b4 = params
    a = edge_attr.reshape(-1, k).astype(jnp.float32)
    h = jnp.tanh(a @ w1 + b1)
    h = jnp.tanh(h @ w2 + b2)
    h = jnp.tanh(h @ w3 + b3)
    return jax.nn.sigmoid(h @ w4 + b4)[:, 0]


if __name__ == "__main__":
    key = jax.random.PRNGKey(0)
    k_nbrs = 8          # k nearest neighbors (MLP input width)
    n_nodes = 1000      # not a multiple of the row tile -> exercises ragged tail + 2 grid steps
    feat = 8            # node-feature dim (unused in forward math, as in PyTorch)

    kx, kidx, kattr, kparams = jax.random.split(key, 4)

    # Synthetic "data" object fields.
    x = jax.random.normal(kx, (n_nodes, feat), jnp.float32)
    src = jnp.repeat(jnp.arange(n_nodes, dtype=jnp.int32), k_nbrs)
    dst = jax.random.randint(kidx, (n_nodes * k_nbrs,), 0, n_nodes, jnp.int32)
    edge_index = jnp.stack([src, dst], axis=0)                      # (2, N*k)
    edge_attr = jax.random.uniform(kattr, (n_nodes * k_nbrs,),
                                   jnp.float32)                     # distances, (N*k,)

    params = init_params(kparams, k_nbrs)

    out = gnn_forward(x, edge_index, edge_attr, params, k=k_nbrs)
    out = jax.block_until_ready(out)

    ref = _reference(edge_attr, params, k_nbrs)
    assert out.shape == (n_nodes,)
    assert bool(jnp.all(jnp.isfinite(out)))
    # Tolerance relaxed vs. the f32 reference because the MXU layers run in bf16.
    assert jnp.allclose(out, ref, atol=2e-2, rtol=2e-2)

    print("KERNEL_OK")
</pallas_src>

<mosaic_0001>
module attributes {stable_mosaic.version = 11 : i64} {
  func.func @_gnn_mlp_kernel(%arg0: i32, %arg1: memref<512x8xf32, #tpu.memory_space<vmem>>, %arg2: memref<8x256xbf16, #tpu.memory_space<vmem>>, %arg3: memref<1x256xf32, #tpu.memory_space<vmem>>, %arg4: memref<256x256xbf16, #tpu.memory_space<vmem>>, %arg5: memref<1x256xf32, #tpu.memory_space<vmem>>, %arg6: memref<256x256xbf16, #tpu.memory_space<vmem>>, %arg7: memref<1x256xf32, #tpu.memory_space<vmem>>, %arg8: memref<1x256xf32, #tpu.memory_space<vmem>>, %arg9: memref<1x1xf32, #tpu.memory_space<vmem>>, %arg10: memref<1x512xf32, #tpu.memory_space<vmem>>) attributes {dimension_semantics = [#tpu.dimension_semantics<parallel>], iteration_bounds = array<i64: 2>, scalar_prefetch = 0 : i64, scratch_operands = 0 : i64, tpu.core_type = #tpu.core_type<tc>, window_params = [{transform_indices = @transform_0, window_bounds = array<i64: 512, 8>}, {pipeline_mode = #tpu.pipeline_mode<synchronous>, transform_indices = @transform_1, window_bounds = array<i64: 8, 256>}, {pipeline_mode = #tpu.pipeline_mode<synchronous>, transform_indices = @transform_2, window_bounds = array<i64: 1, 256>}, {pipeline_mode = #tpu.pipeline_mode<synchronous>, transform_indices = @transform_3, window_bounds = array<i64: 256, 256>}, {pipeline_mode = #tpu.pipeline_mode<synchronous>, transform_indices = @transform_4, window_bounds = array<i64: 1, 256>}, {pipeline_mode = #tpu.pipeline_mode<synchronous>, transform_indices = @transform_5, window_bounds = array<i64: 256, 256>}, {pipeline_mode = #tpu.pipeline_mode<synchronous>, transform_indices = @transform_6, window_bounds = array<i64: 1, 256>}, {pipeline_mode = #tpu.pipeline_mode<synchronous>, transform_indices = @transform_7, window_bounds = array<i64: 1, 256>}, {pipeline_mode = #tpu.pipeline_mode<synchronous>, transform_indices = @transform_8, window_bounds = array<i64: 1, 1>}, {transform_indices = @transform_9, window_bounds = array<i64: 1, 512>}]} {
    %c0 = arith.constant 0 : index
    %c0_0 = arith.constant 0 : index
    %0 = vector.load %arg1[%c0, %c0_0] : memref<512x8xf32, #tpu.memory_space<vmem>>, vector<512x8xf32>
    %1 = arith.truncf %0 : vector<512x8xf32> to vector<512x8xbf16>
    %c0_1 = arith.constant 0 : index
    %c0_2 = arith.constant 0 : index
    %2 = vector.load %arg2[%c0_1, %c0_2] : memref<8x256xbf16, #tpu.memory_space<vmem>>, vector<8x256xbf16>
    %cst = arith.constant dense<0.000000e+00> : vector<512x256xf32>
    %3 = tpu.matmul %1, %2, %cst {dimension_numbers = #tpu.dot_dimension_numbers<[1], [0], [0], [1], [0, 0, 1, 1], [], []>} : vector<512x8xbf16>, vector<8x256xbf16>, vector<512x256xf32> -> vector<512x256xf32>
    %c0_3 = arith.constant 0 : index
    %c0_4 = arith.constant 0 : index
    %4 = vector.load %arg3[%c0_3, %c0_4] : memref<1x256xf32, #tpu.memory_space<vmem>>, vector<1x256xf32>
    %5 = vector.broadcast %4 : vector<1x256xf32> to vector<512x256xf32>
    %6 = arith.addf %3, %5 : vector<512x256xf32>
    %7 = math.tanh %6 : vector<512x256xf32>
    %8 = arith.truncf %7 : vector<512x256xf32> to vector<512x256xbf16>
    %c0_5 = arith.constant 0 : index
    %c0_6 = arith.constant 0 : index
    %9 = vector.load %arg4[%c0_5, %c0_6] : memref<256x256xbf16, #tpu.memory_space<vmem>>, vector<256x256xbf16>
    %cst_7 = arith.constant dense<0.000000e+00> : vector<512x256xf32>
    %10 = tpu.matmul %8, %9, %cst_7 {dimension_numbers = #tpu.dot_dimension_numbers<[1], [0], [0], [1], [0, 0, 1, 1], [], []>} : vector<512x256xbf16>, vector<256x256xbf16>, vector<512x256xf32> -> vector<512x256xf32>
    %c0_8 = arith.constant 0 : index
    %c0_9 = arith.constant 0 : index
    %11 = vector.load %arg5[%c0_8, %c0_9] : memref<1x256xf32, #tpu.memory_space<vmem>>, vector<1x256xf32>
    %12 = vector.broadcast %11 : vector<1x256xf32> to vector<512x256xf32>
    %13 = arith.addf %10, %12 : vector<512x256xf32>
    %14 = math.tanh %13 : vector<512x256xf32>
    %15 = arith.truncf %14 : vector<512x256xf32> to vector<512x256xbf16>
    %c0_10 = arith.constant 0 : index
    %c0_11 = arith.constant 0 : index
    %16 = vector.load %arg6[%c0_10, %c0_11] : memref<256x256xbf16, #tpu.memory_space<vmem>>, vector<256x256xbf16>
    %cst_12 = arith.constant dense<0.000000e+00> : vector<512x256xf32>
    %17 = tpu.matmul %15, %16, %cst_12 {dimension_numbers = #tpu.dot_dimension_numbers<[1], [0], [0], [1], [0, 0, 1, 1], [], []>} : vector<512x256xbf16>, vector<256x256xbf16>, vector<512x256xf32> -> vector<512x256xf32>
    %c0_13 = arith.constant 0 : index
    %c0_14 = arith.constant 0 : index
    %18 = vector.load %arg7[%c0_13, %c0_14] : memref<1x256xf32, #tpu.memory_space<vmem>>, vector<1x256xf32>
    %19 = vector.broadcast %18 : vector<1x256xf32> to vector<512x256xf32>
    %20 = arith.addf %17, %19 : vector<512x256xf32>
    %21 = math.tanh %20 : vector<512x256xf32>
    %c0_15 = arith.constant 0 : index
    %c0_16 = arith.constant 0 : index
    %22 = vector.load %arg8[%c0_15, %c0_16] : memref<1x256xf32, #tpu.memory_space<vmem>>, vector<1x256xf32>
    %cst_17 = arith.constant dense<0.000000e+00> : vector<1x512xf32>
    %23 = tpu.matmul %22, %21, %cst_17 {dimension_numbers = #tpu.dot_dimension_numbers<[1], [1], [0], [0], [0, 0, 1, 0], [], []>} : vector<1x256xf32>, vector<512x256xf32>, vector<1x512xf32> -> vector<1x512xf32>
    %c0_18 = arith.constant 0 : index
    %c0_19 = arith.constant 0 : index
    %24 = vector.load %arg9[%c0_18, %c0_19] : memref<1x1xf32, #tpu.memory_space<vmem>>, vector<1x1xf32>
    %25 = vector.broadcast %24 : vector<1x1xf32> to vector<1x512xf32>
    %26 = arith.addf %23, %25 : vector<1x512xf32>
    %27 = arith.negf %26 : vector<1x512xf32>
    %28 = math.exp %27 : vector<1x512xf32>
    %cst_20 = arith.constant 1.000000e+00 : f32
    %29 = vector.broadcast %cst_20 : f32 to vector<1x512xf32>
    %30 = arith.addf %29, %28 : vector<1x512xf32>
    %31 = arith.divf %29, %30 : vector<1x512xf32>
    %c0_21 = arith.constant 0 : index
    %c0_22 = arith.constant 0 : index
    %32 = vector.load %arg10[%c0_21, %c0_22] : memref<1x512xf32, #tpu.memory_space<vmem>>, vector<1x512xf32>
    tpu.vector_store %arg10[%c0_21, %c0_22], %31 {strides = array<i32>} : memref<1x512xf32, #tpu.memory_space<vmem>>, vector<1x512xf32>,
    return
  }
  func.func @transform_0(%arg0: i32) -> (i32, i32) {
    %c0_i32 = arith.constant 0 : i32
    %c0_i32_0 = arith.constant 0 : i32
    return %arg0, %c0_i32 : i32, i32
  }
  func.func @transform_1(%arg0: i32) -> (i32, i32) {
    %c0_i32 = arith.constant 0 : i32
    %c0_i32_0 = arith.constant 0 : i32
    %c0_i32_1 = arith.constant 0 : i32
    return %c0_i32, %c0_i32_0 : i32, i32
  }
  func.func @transform_2(%arg0: i32) -> (i32, i32) {
    %c0_i32 = arith.constant 0 : i32
    %c0_i32_0 = arith.constant 0 : i32
    %c0_i32_1 = arith.constant 0 : i32
    return %c0_i32, %c0_i32_0 : i32, i32
  }
  func.func @transform_3(%arg0: i32) -> (i32, i32) {
    %c0_i32 = arith.constant 0 : i32
    %c0_i32_0 = arith.constant 0 : i32
    %c0_i32_1 = arith.constant 0 : i32
    return %c0_i32, %c0_i32_0 : i32, i32
  }
  func.func @transform_4(%arg0: i32) -> (i32, i32) {
    %c0_i32 = arith.constant 0 : i32
    %c0_i32_0 = arith.constant 0 : i32
    %c0_i32_1 = arith.constant 0 : i32
    return %c0_i32, %c0_i32_0 : i32, i32
  }
  func.func @transform_5(%arg0: i32) -> (i32, i32) {
    %c0_i32 = arith.constant 0 : i32
    %c0_i32_0 = arith.constant 0 : i32
    %c0_i32_1 = arith.constant 0 : i32
    return %c0_i32, %c0_i32_0 : i32, i32
  }
  func.func @transform_6(%arg0: i32) -> (i32, i32) {
    %c0_i32 = arith.constant 0 : i32
    %c0_i32_0 = arith.constant 0 : i32
    %c0_i32_1 = arith.constant 0 : i32
    return %c0_i32, %c0_i32_0 : i32, i32
  }
  func.func @transform_7(%arg0: i32) -> (i32, i32) {
    %c0_i32 = arith.constant 0 : i32
    %c0_i32_0 = arith.constant 0 : i32
    %c0_i32_1 = arith.constant 0 : i32
    return %c0_i32, %c0_i32_0 : i32, i32
  }
  func.func @transform_8(%arg0: i32) -> (i32, i32) {
    %c0_i32 = arith.constant 0 : i32
    %c0_i32_0 = arith.constant 0 : i32
    %c0_i32_1 = arith.constant 0 : i32
    return %c0_i32, %c0_i32_0 : i32, i32
  }
  func.func @transform_9(%arg0: i32) -> (i32, i32) {
    %c0_i32 = arith.constant 0 : i32
    %c0_i32_0 = arith.constant 0 : i32
    return %c0_i32, %arg0 : i32, i32
  }
}

</mosaic_0001>

<bundles_post_ra>
// kernel: gnn_forward.1
= control target key start
LH: loop header
LB: loop body
LE: loop exit
PB: predicated region body
PF: predicated region fallthrough
CT: control target
= control target key end

     0   :  { %s5003_s0 = inlined_call_operand.vmem [shape: f32[1000,8], index: 0, kind: input, shape index: {}]   ;;  %s5004_s1 = inlined_call_operand.vmem [shape: bf16[8,256], index: 1, kind: input, shape index: {}]   ;;  %s5005_s2 = inlined_call_operand.vmem [shape: f32[1,256], index: 2, kind: input, shape index: {}]   ;;  %s5006_s3 = inlined_call_operand.vmem [shape: bf16[256,256], index: 3, kind: input, shape index: {}]   ;;  %s5007_s4 = inlined_call_operand.vmem [shape: f32[1,256], index: 4, kind: input, shape index: {}]   ;;  %s5008_s5 = inlined_call_operand.vmem [shape: bf16[256,256], index: 5, kind: input, shape index: {}]   ;;  %s5009_s6 = inlined_call_operand.vmem [shape: f32[1,256], index: 6, kind: input, shape index: {}]   ;;  %s5010_s7 = inlined_call_operand.vmem [shape: f32[1,256], index: 7, kind: input, shape index: {}]   ;;  %s5011_s8 = inlined_call_operand.<no memory space> [shape: f32[1,1], index: 8, kind: input, shape index: {}]   ;;  %s5012_s9 = inlined_call_operand.hbm [shape: f32[1,1024], index: 9, kind: output, shape index: {}]  }
   0x1   :  { %v14_v0 = vstv %s5011_s8 }
   0x2   :  { %15 = vst [vmem:[#allocation2] sm:$0x1] %v14_v0 }
   0x3   :  { %16 = vsyncpa [#allocation4], 0 }
   0x4   :  { %18 = vsyncpa [#allocation4 + $0x1], 0  ;;  %s4138_s11 = smov 0   ;;  %s4140_s12 = smov 0  }
   0x5   :  { %s4142_s13 = smov 0   ;;  %s4144_s14 = smov 0  }
   0x6 LB: > { %s2849_s8 = sadd.s32 4294967295, %s4080_s14   ;;  %s2850_s15 = sadd.s32 4294967294, %s4080_s14   ;;  %s4080_s14 = sphi %s4144_s14, %s5018_s14   ;;  %s4076_s13 = sphi %s4142_s13, %s5017_s13   ;;  %s4072_s12 = sphi %s4140_s12, %s5016_s12   ;;  %s4068_s11 = sphi %s4138_s11, %s5015_s11  }
   0x7   : > { %s4161_s16 = sadd.s32 1, %s4080_s14   ;;  %s225_s17 = sadd.s32 1, %s4076_s13 }
   0x8   : > { %s222_s18 = ssub.s32 %s4080_s14, %s4161_s16  ;;  %p235_p0 = scmp.ne.s32.totalorder %s4076_s13, %s4072_s12 }
   0x9   : > { %p223_p1 = scmp.eq.s32.totalorder %s222_s18, 0  ;;  %p236_p2 = scmp.eq.s32.totalorder %s2849_s8, 1 }
   0xa   : > { %p241_p3 = scmp.ne.s32.totalorder %s4072_s12, %s4068_s11  ;;  %p242_p4 = scmp.eq.s32.totalorder %s2850_s15, 1 }
   0xb   : > { %s4171_s19 = scalar_select %p223_p1, %s4076_s13, %s225_s17  }
   0xc   : > { %p4173_p5 = por %p236_p2, %p235_p0  ;;  %p4177_p6 = por %p242_p4, %p241_p3 }
   0xd   : > { %p2853_p7 = scmp.ge.s32.totalorder %s4080_s14, 1  ;;  %p301_p8 = scmp.lt.s32.totalorder %s4080_s14, 3 }
   0xf   : > { %p302_p9 = pnand %p2853_p7, %p301_p8 }
  0x10   : > { %v453_v1 = vld [vmem:[%s5004_s1] sm:$0xff] (!%p302_p9)  ;;  %vm568_vm0 = vcmask (!%p302_p9), 1043456   ;;  %s4186_s24 = sshll.u32 (!%p302_p9), %s2849_s8, 6  ;;  %v4082_v4 = vmov (!%p302_p9), 0   ;;  %vm471_vm1 = vcmask (!%p302_p9), 64512   ;;  %s338_s28 = sand.u32 (!%p302_p9), 1, %s4072_s12  }
  0x11   : > { %305 = sbr.rel (%p302_p9) target bundleno = 1250 (0x4e2), region = 56  ;;  %v2858_v2 = vcombine.high (!%p302_p9), %v453_v1, %v453_v1  ;;  %v2857_v3 = vcombine.low (!%p302_p9), %v453_v1, %v453_v1  ;;  %607 = vmatprep.mubr.bf16.mxu0 (!%p302_p9), %v4082_v4  ;;  %p346_p10 = scmp.lt.s32.totalorder (!%p302_p9), %s4186_s24, 124  ;;  %3135 = vset.pattern.permute.xlu0 (!%p302_p9), %v4082_v4  ;;  %v3138_v23 = vld [vmem:[%s5006_s3 + $0x4] ss:$8 sps:$4 sm:$0xff] (!%p302_p9)   ;;  %v3140_v25 = vld [vmem:[%s5006_s3] ss:$8 sps:$4 sm:$0xff] (!%p302_p9)  }
  0x12   : > { %1324 = vmatprep.subr.bf16.mxu1 (!%p302_p9), %v3138_v23  ;;  %v3141_v26 = vld [vmem:[%s5006_s3 + $0x14] ss:$8 sps:$4 sm:$0xff] (!%p302_p9)   ;;  %v3143_v27 = vld [vmem:[%s5006_s3 + $0x10] ss:$8 sps:$4 sm:$0xff] (!%p302_p9)   ;;  %v3144_v30 = vld [vmem:[%s5006_s3 + $0x24] ss:$8 sps:$4 sm:$0xff] (!%p302_p9)   ;;  %s4961_s18 = scalar_lea.hbm (!%p302_p9), %s5012_s9, %s4186_s24 }
  0x13   : > { %2859 = vmatprep.subr.msk.bf16.mxu0 (!%p302_p9), %vm568_vm0, %v2858_v2  ;;  %v570_v5 = vsel (!%p302_p9), %vm568_vm0, %v2857_v3, 0  ;;  %1325 = vmatpush1.bf16.msra.mxu1 (!%p302_p9), %v3140_v25  ;;  %v3146_v32 = vld [vmem:[%s5006_s3 + $0x20] ss:$8 sps:$4 sm:$0xff] (!%p302_p9)   ;;  %v3147_v33 = vld [vmem:[%s5006_s3 + $0x34] ss:$8 sps:$4 sm:$0xff] (!%p302_p9)   ;;  %s2854_s30 = sshll.u32 (!%p302_p9), %s338_s28, 2 }
  0x14   : > { %576 = vmatpush1.bf16.msra.mxu0 (!%p302_p9), %v570_v5  ;;  %1326 = vmatprep.subr.bf16.mxu1 (!%p302_p9), %v3141_v26  ;;  %v3149_v34 = vld [vmem:[%s5006_s3 + $0x30] ss:$8 sps:$4 sm:$0xff] (!%p302_p9)   ;;  %v3150_v37 = vld [vmem:[%s5006_s3 + $0x44] ss:$8 sps:$4 sm:$0xff] (!%p302_p9)   ;;  %v3152_v39 = vld [vmem:[%s5006_s3 + $0x40] ss:$8 sps:$4 sm:$0xff] (!%p302_p9)  }
  0x15   : > { %v3153_v40 = vld [vmem:[%s5006_s3 + $0x54] ss:$8 sps:$4 sm:$0xff] (!%p302_p9)   ;;  %v3155_v41 = vld [vmem:[%s5006_s3 + $0x50] ss:$8 sps:$4 sm:$0xff] (!%p302_p9)   ;;  %v3156_v44 = vld [vmem:[%s5006_s3 + $0x64] ss:$8 sps:$4 sm:$0xff] (!%p302_p9)  }
  0x16   : > { %v3158_v46 = vld [vmem:[%s5006_s3 + $0x60] ss:$8 sps:$4 sm:$0xff] (!%p302_p9)   ;;  %v3159_v47 = vld [vmem:[%s5006_s3 + $0x74] ss:$8 sps:$4 sm:$0xff] (!%p302_p9)   ;;  %v3161_v48 = vld [vmem:[%s5006_s3 + $0x70] ss:$8 sps:$4 sm:$0xff] (!%p302_p9)  }
  0x17   : > { %1327 = vmatpush1.bf16.msra.mxu1 (!%p302_p9), %v3143_v27  ;;  %v3162_v51 = vld [vmem:[%s5006_s3 + $0x84] ss:$8 sps:$4 sm:$0xff] (!%p302_p9)   ;;  %v3164_v53 = vld [vmem:[%s5006_s3 + $0x80] ss:$8 sps:$4 sm:$0xff] (!%p302_p9)   ;;  %v3165_v54 = vld [vmem:[%s5006_s3 + $0x94] ss:$8 sps:$4 sm:$0xff] (!%p302_p9)  }
  0x18   : > { %s347_s25 = scalar_select %p346_p10, %s4186_s24, 124  ;;  %1328 = vmatprep.subr.bf16.mxu1 %v3144_v30  ;;  %v3167_v55 = vld [vmem:[%s5006_s3 + $0x90] ss:$8 sps:$4 sm:$0xff]   ;;  %v3168_v58 = vld [vmem:[%s5006_s3 + $0xa4] ss:$8 sps:$4 sm:$0xff]  }
  0x19   : > { %v3170_v60 = vld [vmem:[%s5006_s3 + $0xa0] ss:$8 sps:$4 sm:$0xff]   ;;  %v3171_v63 = vld [vmem:[%s5006_s3 + $0xb4] ss:$8 sps:$4 sm:$0xff]   ;;  %v3173_v0 = vld [vmem:[%s5006_s3 + $0xb0] ss:$8 sps:$4 sm:$0xff]  }
  0x1a   : > { %s2856_s26 = sshll.u32 %s347_s25, 3  ;;  %v3174_v2 = vld [vmem:[%s5006_s3 + $0xc4] ss:$8 sps:$4 sm:$0xff]   ;;  %v3176_v3 = vld [vmem:[%s5006_s3 + $0xc0] ss:$8 sps:$4 sm:$0xff]   ;;  %s340_s10 = scalar_lea.vmem [#allocation3], %s2854_s30 }
  0x1b   : > { %s4195_s29 = scalar_lea.vmem %s5003_s0, %s2856_s26  ;;  %1329 = vmatpush1.bf16.msra.mxu1 %v3146_v32  ;;  %s2791_s8 = sshll.u32 %s340_s10, 4  ;;  %s4963_s8 = int_to_ptr.vmem [resolvable:$true] %s2791_s8 }
  0x1c   : > { %v357_v6 = vld [vmem:[%s4195_s29] sm:$0xff]  ;;  %v358_v7 = vld [vmem:[%s4195_s29 + $0x8] sm:$0xff]  ;;  %v359_v9 = vld [vmem:[%s4195_s29 + $0x10] sm:$0xff]  ;;  %1330 = vmatprep.subr.bf16.mxu1 %v3147_v33  ;;  %s4018_s22 = scalar_lea.vmem %s4963_s8, 64  ;;  %s4084_s23 = smov [#allocation3]  }
  0x1d   : > { %v421_v8 = vpack.c.bf16 %v358_v7, %v357_v6  ;;  %v360_v10 = vld [vmem:[%s4195_s29 + $0x18] sm:$0xff]  ;;  %v361_v12 = vld [vmem:[%s4195_s29 + $0x20] sm:$0xff]  ;;  %v362_v13 = vld [vmem:[%s4195_s29 + $0x28] sm:$0xff]  ;;  %p4019_p11 = scmp.ne.s32.totalorder %s4963_s8, %s4018_s22  ;;  %s4022_s25 = sshll.u32 %s4084_s23, 4  ;;  %s4023_s25 = int_to_ptr.vmem [resolvable:$false] %s4022_s25 }
  0x1e   : > { %v422_v11 = vpack.c.bf16 %v360_v10, %v359_v9  ;;  %v423_v14 = vpack.c.bf16 %v362_v13, %v361_v12  ;;  %v363_v15 = vld [vmem:[%s4195_s29 + $0x30] sm:$0xff]  ;;  %v364_v16 = vld [vmem:[%s4195_s29 + $0x38] sm:$0xff]  ;;  %v365_v18 = vld [vmem:[%s4195_s29 + $0x40] sm:$0xff]  ;;  %s4024_s26 = scalar_lea.vmem %s4023_s25, 128  ;;  %p4025_p0 = scmp.lt.s32.totalorder %s4963_s8, %s4023_s25 }
  0x1f   : > { %2860 = vmatmul.mubr.msk.bf16.vlgmr.msra.gmra.mrb[0].mxu0 %vm471_vm1, %v421_v8  ;;  %v424_v17 = vpack.c.bf16 %v364_v16, %v363_v15  ;;  %v366_v19 = vld [vmem:[%s4195_s29 + $0x48] sm:$0xff]  ;;  %v367_v21 = vld [vmem:[%s4195_s29 + $0x50] sm:$0xff]  ;;  %v368_v22 = vld [vmem:[%s4195_s29 + $0x58] sm:$0xff]  ;;  %1331 = vmatpush1.bf16.msra.mxu1 %v3149_v34  ;;  %p4020_p12 = pnand %p4019_p11, %p4173_p5  ;;  %p4026_p1 = scmp.lt.s32.totalorder %s4024_s26, %s4018_s22 }
  0x20   : > { %617 = vmatprep.mubr.bf16.mxu0 %v4082_v4  ;;  %v425_v20 = vpack.c.bf16 %v366_v19, %v365_v18  ;;  %v426_v24 = vpack.c.bf16 %v368_v22, %v367_v21  ;;  %v369_v28 = vld [vmem:[%s4195_s29 + $0x60] sm:$0xff]  ;;  %v370_v29 = vld [vmem:[%s4195_s29 + $0x68] sm:$0xff]  ;;  %v371_v35 = vld [vmem:[%s4195_s29 + $0x70] sm:$0xff]  ;;  %1332 = vmatprep.subr.bf16.mxu1 %v3150_v37 }
  0x21   : > { %v427_v31 = vpack.c.bf16 %v370_v29, %v369_v28  ;;  %v372_v36 = vld [vmem:[%s4195_s29 + $0x78] sm:$0xff]  ;;  %v373_v42 = vld [vmem:[%s4195_s29 + $0x80] sm:$0xff]  ;;  %v374_v43 = vld [vmem:[%s4195_s29 + $0x88] sm:$0xff]  ;;  %p4021_p13 = pneg %p4020_p12  ;;  %p4027_p2 = por %p4026_p1, %p4025_p0 }
  0x22   : > { %v428_v38 = vpack.c.bf16 %v372_v36, %v371_v35  ;;  %v429_v45 = vpack.c.bf16 %v374_v43, %v373_v42  ;;  %v375_v49 = vld [vmem:[%s4195_s29 + $0x90] sm:$0xff]  ;;  %v376_v50 = vld [vmem:[%s4195_s29 + $0x98] sm:$0xff]  ;;  %v377_v56 = vld [vmem:[%s4195_s29 + $0xa0] sm:$0xff] }
  0x23   : > { %1333 = vmatpush1.bf16.msra.mxu1 %v3152_v39  ;;  %v430_v52 = vpack.c.bf16 %v376_v50, %v375_v49  ;;  %v378_v57 = vld [vmem:[%s4195_s29 + $0xa8] sm:$0xff]  ;;  %v379_v61 = vld [vmem:[%s4195_s29 + $0xb0] sm:$0xff]  ;;  %v380_v62 = vld [vmem:[%s4195_s29 + $0xb8] sm:$0xff]  ;;  %p4028_p3 = pnand %p4027_p2, %p4021_p13 }
  0x24   : > { %1334 = vmatprep.subr.bf16.mxu1 %v3153_v40  ;;  %v431_v59 = vpack.c.bf16 %v378_v57, %v377_v56  ;;  %v432_v1 = vpack.c.bf16 %v380_v62, %v379_v61  ;;  %v381_v5 = vld [vmem:[%s4195_s29 + $0xc0] sm:$0xff]  ;;  %v382_v6 = vld [vmem:[%s4195_s29 + $0xc8] sm:$0xff]  ;;  %v3177_v7 = vld [vmem:[%s5006_s3 + $0xd4] ss:$8 sps:$4 sm:$0xff]  }
  0x25   : > { %v3179_v8 = vld [vmem:[%s5006_s3 + $0xd0] ss:$8 sps:$4 sm:$0xff]   ;;  %v433_v9 = vpack.c.bf16 %v382_v6, %v381_v5  ;;  %v3180_v10 = vld [vmem:[%s5006_s3 + $0xe4] ss:$8 sps:$4 sm:$0xff]   ;;  %v3186_v62 = vld [vmem:[%s5008_s5] ss:$8 sps:$4 sm:$0xff]  }
  0x26   : > { %v383_v12 = vld [vmem:[%s4195_s29 + $0xd0] sm:$0xff]  ;;  %v384_v13 = vld [vmem:[%s4195_s29 + $0xd8] sm:$0xff]  ;;  %v386_v18 = vld [vmem:[%s4195_s29 + $0xe8] sm:$0xff] }
  0x27   : > { %2861 = vmatmul.mubr.msk.bf16.gmra.mrb[4].mxu0 %vm471_vm1, %v422_v11  ;;  %1335 = vmatpush1.bf16.msra.mxu1 %v3155_v41  ;;  %v3182_v11 = vld [vmem:[%s5006_s3 + $0xe0] ss:$8 sps:$4 sm:$0xff]   ;;  %v3185_v15 = vld [vmem:[%s5006_s3 + $0xf0] ss:$8 sps:$4 sm:$0xff]   ;;  %v434_v16 = vpack.c.bf16 %v384_v13, %v383_v12 }
  0x28   : > { %627 = vmatprep.mubr.bf16.mxu0 %v4082_v4  ;;  %1336 = vmatprep.subr.bf16.mxu1 %v3156_v44  ;;  %v388_v21 = vld [vmem:[%s4195_s29 + $0xf8] sm:$0xff]  ;;  %v389_v23 = vld [vmem:[%s4195_s29 + $0x100] sm:$0xff]  ;;  %v391_v26 = vld [vmem:[%s4195_s29 + $0x110] sm:$0xff] }
  0x29   : > { %v392_v27 = vld [vmem:[%s4195_s29 + $0x118] sm:$0xff]  ;;  %v393_v29 = vld [vmem:[%s4195_s29 + $0x120] sm:$0xff]  ;;  %v394_v30 = vld [vmem:[%s4195_s29 + $0x128] sm:$0xff] }
  0x2a   : > { %v438_v28 = vpack.c.bf16 %v392_v27, %v391_v26  ;;  %v395_v32 = vld [vmem:[%s4195_s29 + $0x130] sm:$0xff]  ;;  %v396_v33 = vld [vmem:[%s4195_s29 + $0x138] sm:$0xff]  ;;  %v397_v35 = vld [vmem:[%s4195_s29 + $0x140] sm:$0xff] }
  0x2b   : > { %1337 = vmatpush1.bf16.msra.mxu1 %v3158_v46  ;;  %v440_v34 = vpack.c.bf16 %v396_v33, %v395_v32  ;;  %v398_v36 = vld [vmem:[%s4195_s29 + $0x148] sm:$0xff]  ;;  %v400_v39 = vld [vmem:[%s4195_s29 + $0x158] sm:$0xff]  ;;  %v401_v41 = vld [vmem:[%s4195_s29 + $0x160] sm:$0xff] }
  0x2c   : > { %1338 = vmatprep.subr.bf16.mxu1 %v3159_v47  ;;  %v441_v37 = vpack.c.bf16 %v398_v36, %v397_v35  ;;  %v402_v42 = vld [vmem:[%s4195_s29 + $0x168] sm:$0xff]  ;;  %v403_v44 = vld [vmem:[%s4195_s29 + $0x170] sm:$0xff]  ;;  %v405_v47 = vld [vmem:[%s4195_s29 + $0x180] sm:$0xff] }
  0x2d   : > { %v443_v43 = vpack.c.bf16 %v402_v42, %v401_v41  ;;  %v407_v50 = vld [vmem:[%s4195_s29 + $0x190] sm:$0xff]  ;;  %v410_v56 = vld [vmem:[%s4195_s29 + $0x1a8] sm:$0xff]  ;;  %v413_v13 = vld [vmem:[%s4195_s29 + $0x1c0] sm:$0xff] }
  0x2e   : > { %v3191_v26 = vld [vmem:[%s5008_s5 + $0x14] ss:$8 sps:$4 sm:$0xff]  }
  0x2f   : > { %2862 = vmatmul.mubr.msk.bf16.gmra.mrb[8].mxu0 %vm471_vm1, %v423_v14  ;;  %1339 = vmatpush1.bf16.msra.mxu1 %v3161_v48  ;;  %v3183_v14 = vld [vmem:[%s5006_s3 + $0xf4] ss:$8 sps:$4 sm:$0xff]   ;;  %v406_v48 = vld [vmem:[%s4195_s29 + $0x188] sm:$0xff] }
  0x30   : > { %637 = vmatprep.mubr.bf16.mxu0 %v4082_v4  ;;  %1340 = vmatprep.subr.bf16.mxu1 %v3162_v51  ;;  %v445_v49 = vpack.c.bf16 %v406_v48, %v405_v47  ;;  %v408_v51 = vld [vmem:[%s4195_s29 + $0x198] sm:$0xff] }
  0x33   : > { %1341 = vmatpush1.bf16.msra.mxu1 %v3164_v53  ;;  %v456_v53 = vlaneseq }
  0x34   : > { %1342 = vmatprep.subr.bf16.mxu1 %v3165_v54 }
  0x35   : > { %v4397_v54 = vshrl.u32 %v456_v53, 7  ;;  %vm2773_vm2 = vcmp.lt.s32.totalorder %v456_v53, 512 }
  0x37   : > { %2863 = vmatmul.mubr.msk.bf16.gmra.mrb[12].mxu0 %vm471_vm1, %v424_v17  ;;  %1343 = vmatpush1.bf16.msra.mxu1 %v3167_v55  ;;  %v385_v17 = vld [vmem:[%s4195_s29 + $0xe0] sm:$0xff] }
  0x38   : > { %647 = vmatprep.mubr.bf16.mxu0 %v4082_v4  ;;  %1344 = vmatprep.subr.bf16.mxu1 %v3168_v58  ;;  %v435_v19 = vpack.c.bf16 %v386_v18, %v385_v17  ;;  %v409_v55 = vld [vmem:[%s4195_s29 + $0x1a0] sm:$0xff]  ;;  %v4403_v58 = vsub.s32 0, %v4397_v54 }
  0x39   : > { %v447_v57 = vpack.c.bf16 %v410_v56, %v409_v55 }
  0x3b   : > { %1345 = vmatpush1.bf16.msra.mxu1 %v3170_v60  ;;  %v4409_v60 = vsub.s32 1, %v4397_v54 }
  0x3c   : > { %1346 = vmatprep.subr.bf16.mxu1 %v3171_v63  ;;  %v3188_v63 = vld [vmem:[%s5008_s5 + $0x4] ss:$8 sps:$4 sm:$0xff]  }
  0x3d   : > { %2073 = vmatprep.subr.bf16.mxu0 %v3188_v63 }
  0x3e   : > { %2074 = vmatpush1.bf16.msra.mxu0 %v3186_v62 }
  0x3f   : > { %2864 = vmatmul.mubr.msk.bf16.gmra.mrb[16].mxu0 %vm471_vm1, %v425_v20  ;;  %1347 = vmatpush1.bf16.msra.mxu1 %v3173_v0  ;;  %v387_v20 = vld [vmem:[%s4195_s29 + $0xf0] sm:$0xff] }
  0x40   : > { %657 = vmatprep.mubr.bf16.mxu0 %v4082_v4  ;;  %1348 = vmatprep.subr.bf16.mxu1 %v3174_v2  ;;  %v436_v22 = vpack.c.bf16 %v388_v21, %v387_v20  ;;  %v412_v2 = vld [vmem:[%s4195_s29 + $0x1b8] sm:$0xff] }
  0x41   : > { %2075 = vmatprep.subr.bf16.mxu0 %v3191_v26 }
  0x43   : > { %1349 = vmatpush1.bf16.msra.mxu1 %v3176_v3 }
  0x44   : > { %1350 = vmatprep.subr.bf16.mxu1 %v3177_v7 }
  0x47   : > { %2865 = vmatmul.mubr.msk.bf16.gmra.mrb[20].mxu0 %vm471_vm1, %v426_v24  ;;  %1351 = vmatpush1.bf16.msra.mxu1 %v3179_v8  ;;  %v390_v24 = vld [vmem:[%s4195_s29 + $0x108] sm:$0xff] }
  0x48   : > { %667 = vmatprep.mubr.bf16.mxu0 %v4082_v4  ;;  %1352 = vmatprep.subr.bf16.mxu1 %v3180_v10  ;;  %v437_v25 = vpack.c.bf16 %v390_v24, %v389_v23 }
  0x4b   : > { %1353 = vmatpush1.bf16.msra.mxu1 %v3182_v11 }
  0x4c   : > { %1354 = vmatprep.subr.bf16.mxu1 %v3183_v14  ;;  %v414_v14 = vld [vmem:[%s4195_s29 + $0x1c8] sm:$0xff] }
  0x4d   : > { %v449_v18 = vpack.c.bf16 %v414_v14, %v413_v13 }
  0x4f   : > { %2866 = vmatmul.mubr.msk.bf16.gmra.mrb[24].mxu0 %vm471_vm1, %v427_v31  ;;  %1355 = vmatpush1.bf16.msra.mxu1 %v3185_v15  ;;  %v439_v31 = vpack.c.bf16 %v394_v30, %v393_v29  ;;  %v416_v29 = vld [vmem:[%s4195_s29 + $0x1d8] sm:$0xff] }
  0x50   : > { %677 = vmatprep.mubr.bf16.mxu0 %v4082_v4 }
  0x57   : > { %2867 = vmatmul.mubr.msk.bf16.gmra.mrb[28].mxu0 %vm471_vm1, %v428_v38  ;;  %v399_v38 = vld [vmem:[%s4195_s29 + $0x150] sm:$0xff] }
  0x58   : > { %687 = vmatprep.mubr.bf16.mxu0 %v4082_v4  ;;  %v442_v40 = vpack.c.bf16 %v400_v39, %v399_v38 }
  0x5f   : > { %2868 = vmatmul.mubr.msk.bf16.gmra.mrb[32].mxu0 %vm471_vm1, %v429_v45  ;;  %v404_v45 = vld [vmem:[%s4195_s29 + $0x178] sm:$0xff] }
  0x60   : > { %697 = vmatprep.mubr.bf16.mxu0 %v4082_v4  ;;  %v444_v46 = vpack.c.bf16 %v404_v45, %v403_v44  ;;  %v417_v45 = vld [vmem:[%s4195_s29 + $0x1e0] sm:$0xff] }
  0x67   : > { %2869 = vmatmul.mubr.msk.bf16.gmra.mrb[36].mxu0 %vm471_vm1, %v430_v52  ;;  %v446_v52 = vpack.c.bf16 %v408_v51, %v407_v50 }
  0x68   : > { %707 = vmatprep.mubr.bf16.mxu0 %v4082_v4 }
  0x6f   : > { %2870 = vmatmul.mubr.msk.bf16.gmra.mrb[40].mxu0 %vm471_vm1, %v431_v59  ;;  %v454_v59 = vld [vmem:[%s5005_s2] sm:$0x3] }
  0x70   : > { %717 = vmatprep.mubr.bf16.mxu0 %v4082_v4  ;;  %v4413_v61 = vrot.slane %v454_v59, %v4403_v58  ;;  %v4422_v0 = vrot.slane %v454_v59, %v4409_v60 }
  0x77   : > { %2871 = vmatmul.mubr.msk.bf16.gmra.mrb[44].mxu0 %vm471_vm1, %v432_v1  ;;  %v411_v1 = vld [vmem:[%s4195_s29 + $0x1b0] sm:$0xff] }
  0x78   : > { %727 = vmatprep.mubr.bf16.mxu0 %v4082_v4  ;;  %v448_v7 = vpack.c.bf16 %v412_v2, %v411_v1 }
  0x7f   : > { %2872 = vmatmul.mubr.msk.bf16.gmra.mrb[48].mxu0 %vm471_vm1, %v433_v9 }
  0x80   : > { %737 = vmatprep.mubr.bf16.mxu0 %v4082_v4 }
  0x87   : > { %2873 = vmatmul.mubr.msk.bf16.gmra.mrb[52].mxu0 %vm471_vm1, %v434_v16 }
  0x88   : > { %747 = vmatprep.mubr.bf16.mxu0 %v4082_v4 }
  0x8f   : > { %2874 = vmatmul.mubr.msk.bf16.gmra.mrb[56].mxu0 %vm471_vm1, %v435_v19 }
  0x90   : > { %757 = vmatprep.mubr.bf16.mxu0 %v4082_v4 }
  0x97   : > { %2875 = vmatmul.mubr.msk.bf16.gmra.mrb[60].mxu0 %vm471_vm1, %v436_v22 }
  0x98   : > { %767 = vmatprep.mubr.bf16.mxu0 %v4082_v4 }
  0x9f   : > { %2876 = vmatmul.mubr.msk.bf16.gmra.mrb[64].mxu0 %vm471_vm1, %v437_v25  ;;  %v3189_v25 = vld [vmem:[%s5008_s5 + $0x10] ss:$8 sps:$4 sm:$0xff]  }
  0xa0   : > { %777 = vmatprep.mubr.bf16.mxu0 %v4082_v4  ;;  %2076 = vmatpush1.bf16.msra.mxu0 %v3189_v25 }
  0xa7   : > { %2877 = vmatmul.mubr.msk.bf16.gmra.mrb[68].mxu0 %vm471_vm1, %v438_v28  ;;  %v415_v28 = vld [vmem:[%s4195_s29 + $0x1d0] sm:$0xff] }
  0xa8   : > { %787 = vmatprep.mubr.bf16.mxu0 %v4082_v4 }
  0xaf   : > { %2878 = vmatmul.mubr.msk.bf16.gmra.mrb[72].mxu0 %vm471_vm1, %v439_v31 }
  0xb0   : > { %797 = vmatprep.mubr.bf16.mxu0 %v4082_v4 }
  0xb7   : > { %2879 = vmatmul.mubr.msk.bf16.gmra.mrb[76].mxu0 %vm471_vm1, %v440_v34 }
  0xb8   : > { %807 = vmatprep.mubr.bf16.mxu0 %v4082_v4 }
  0xbf   : > { %2880 = vmatmul.mubr.msk.bf16.gmra.mrb[80].mxu0 %vm471_vm1, %v441_v37  ;;  %v450_v37 = vpack.c.bf16 %v416_v29, %v415_v28 }
  0xc0   : > { %817 = vmatprep.mubr.bf16.mxu0 %v4082_v4 }
  0xc7   : > { %2881 = vmatmul.mubr.msk.bf16.gmra.mrb[84].mxu0 %vm471_vm1, %v442_v40 }
  0xc8   : > { %827 = vmatprep.mubr.bf16.mxu0 %v4082_v4 }
  0xcf   : > { %2882 = vmatmul.mubr.msk.bf16.gmra.mrb[88].mxu0 %vm471_vm1, %v443_v43 }
  0xd0   : > { %837 = vmatprep.mubr.bf16.mxu0 %v4082_v4 }
  0xd7   : > { %2883 = vmatmul.mubr.msk.bf16.gmra.mrb[92].mxu0 %vm471_vm1, %v444_v46  ;;  %v418_v46 = vld [vmem:[%s4195_s29 + $0x1e8] sm:$0xff] }
  0xd8   : > { %847 = vmatprep.mubr.bf16.mxu0 %v4082_v4  ;;  %v451_v56 = vpack.c.bf16 %v418_v46, %v417_v45 }
  0xdf   : > { %2884 = vmatmul.mubr.msk.bf16.gmra.mrb[96].mxu0 %vm471_vm1, %v445_v49 }
  0xe0   : > { %857 = vmatprep.mubr.bf16.mxu0 %v4082_v4 }
  0xe7   : > { %2885 = vmatmul.mubr.msk.bf16.gmra.mrb[100].mxu0 %vm471_vm1, %v446_v52 }
  0xe8   : > { %867 = vmatprep.mubr.bf16.mxu0 %v4082_v4 }
  0xef   : > { %2886 = vmatmul.mubr.msk.bf16.gmra.mrb[104].mxu0 %vm471_vm1, %v447_v57 }
  0xf0   : > { %877 = vmatprep.mubr.bf16.mxu0 %v4082_v4 }
  0xf2   : > { %v609_v3 = vpop.f32.mrb[0].mxu0 }
  0xf3   : > { %v610_v5 = vadd.f32 %v609_v3, %v4413_v61  ;;  %v611_v6 = vpop.f32.mrb[1].mxu0  ;;  %v3192_v3 = vld [vmem:[%s5008_s5 + $0x20] ss:$8 sps:$4 sm:$0xff]  }
  0xf4   : > { %v612_v8 = vadd.f32 %v611_v6, %v4422_v0  ;;  %v613_v9 = vpop.f32.mrb[2].mxu0 }
  0xf5   : > { %3234 = vtanh.f32 %v610_v5  ;;  %v614_v10 = vadd.f32 %v613_v9, %v4413_v61  ;;  %v615_v11 = vpop.f32.mrb[3].mxu0  ;;  %v3194_v5 = vld [vmem:[%s5008_s5 + $0x24] ss:$8 sps:$4 sm:$0xff]  }
  0xf6   : > { %3236 = vtanh.f32 %v612_v8  ;;  %v616_v12 = vadd.f32 %v615_v11, %v4422_v0  ;;  %v420_v8 = vld [vmem:[%s4195_s29 + $0x1f8] sm:$0xff]  ;;  %2077 = vmatprep.subr.bf16.mxu0 %v3194_v5 }
  0xf7   : > { %3238 = vtanh.f32 %v614_v10  ;;  %2887 = vmatmul.mubr.msk.bf16.gmra.mrb[108].mxu0 %vm471_vm1, %v448_v7  ;;  %v419_v7 = vld [vmem:[%s4195_s29 + $0x1f0] sm:$0xff]  ;;  %s2777_s29 = scalar_lea.sflag [#allocation4], %s338_s28 }
  0xf8   : > { %3240 = vtanh.f32 %v616_v12  ;;  %887 = vmatprep.mubr.bf16.mxu0 %v4082_v4  ;;  %2078 = vmatpush1.bf16.msra.mxu0 %v3192_v3 }
  0xfa   : > { %v619_v15 = vpop.f32.mrb[4].mxu0 }
  0xfb   : > { %v620_v16 = vadd.f32 %v619_v15, %v4413_v61  ;;  %v621_v17 = vpop.f32.mrb[5].mxu0 }
  0xfc   : > { %v622_v19 = vadd.f32 %v621_v17, %v4422_v0  ;;  %v623_v20 = vpop.f32.mrb[6].mxu0 }
  0xfd   : > { %3242 = vtanh.f32 %v620_v16  ;;  %v624_v21 = vadd.f32 %v623_v20, %v4413_v61  ;;  %v625_v22 = vpop.f32.mrb[7].mxu0  ;;  %v452_v16 = vpack.c.bf16 %v420_v8, %v419_v7 }
  0xfe   : > { %3244 = vtanh.f32 %v622_v19  ;;  %v626_v23 = vadd.f32 %v625_v22, %v4422_v0 }
  0xff   : > { %v3235_v24 = vpop.eup %3234  ;;  %3246 = vtanh.f32 %v624_v21  ;;  %2888 = vmatmul.mubr.msk.bf16.gmra.mrb[112].mxu0 %vm471_vm1, %v449_v18 }
 0x100   : > { %v3237_v27 = vpop.eup %3236  ;;  %3248 = vtanh.f32 %v626_v23  ;;  %897 = vmatprep.mubr.bf16.mxu0 %v4082_v4 }
 0x101   : > { %v3239_v30 = vpop.eup %3238 }
 0x102   : > { %v3241_v31 = vpop.eup %3240  ;;  %v629_v32 = vpop.f32.mrb[8].mxu0  ;;  %v1056_v33 = vpack.c.bf16 %v3239_v30, %v3235_v24 }
 0x103   : > { %v630_v34 = vadd.f32 %v629_v32, %v4413_v61  ;;  %v631_v35 = vpop.f32.mrb[9].mxu0  ;;  %v1057_v36 = vpack.c.bf16 %v3241_v31, %v3237_v27 }
 0x104   : > { %v632_v38 = vadd.f32 %v631_v35, %v4422_v0  ;;  %v633_v39 = vpop.f32.mrb[10].mxu0 }
 0x105   : > { %3250 = vtanh.f32 %v630_v34  ;;  %v634_v40 = vadd.f32 %v633_v39, %v4413_v61  ;;  %v635_v41 = vpop.f32.mrb[11].mxu0  ;;  %1356 = vmatprep.mubr.bf16.mxu1 %v1057_v36  ;;  %v3195_v36 = vld [vmem:[%s5008_s5 + $0x30] ss:$8 sps:$4 sm:$0xff]  }
 0x106   : > { %3252 = vtanh.f32 %v632_v38  ;;  %v636_v42 = vadd.f32 %v635_v41, %v4422_v0  ;;  %1357 = vmatmul.mubr.bf16.vlgmr.msra.gmra.mrb[0].mxu1 %v1056_v33 }
 0x107   : > { %v3243_v43 = vpop.eup %3242  ;;  %3254 = vtanh.f32 %v634_v40  ;;  %2889 = vmatmul.mubr.msk.bf16.gmra.mrb[116].mxu0 %vm471_vm1, %v450_v37  ;;  %v3197_v37 = vld [vmem:[%s5008_s5 + $0x34] ss:$8 sps:$4 sm:$0xff]  }
 0x108   : > { %v3245_v44 = vpop.eup %3244  ;;  %3256 = vtanh.f32 %v636_v42  ;;  %907 = vmatprep.mubr.bf16.mxu0 %v4082_v4  ;;  %2079 = vmatprep.subr.bf16.mxu0 %v3197_v37 }
 0x109   : > { %v3247_v47 = vpop.eup %3246  ;;  %2080 = vmatpush1.bf16.msra.mxu0 %v3195_v36 }
 0x10a   : > { %v3249_v48 = vpop.eup %3248  ;;  %v639_v49 = vpop.f32.mrb[12].mxu0  ;;  %v1058_v50 = vpack.c.bf16 %v3247_v47, %v3243_v43 }
 0x10b   : > { %v640_v51 = vadd.f32 %v639_v49, %v4413_v61  ;;  %v641_v52 = vpop.f32.mrb[13].mxu0  ;;  %v1059_v55 = vpack.c.bf16 %v3249_v48, %v3245_v44 }
 0x10c   : > { %v642_v57 = vadd.f32 %v641_v52, %v4422_v0  ;;  %v643_v59 = vpop.f32.mrb[14].mxu0 }
 0x10d   : > { %3258 = vtanh.f32 %v640_v51  ;;  %v644_v62 = vadd.f32 %v643_v59, %v4413_v61  ;;  %v645_v63 = vpop.f32.mrb[15].mxu0  ;;  %1366 = vmatprep.mubr.bf16.mxu1 %v1059_v55 }
 0x10e   : > { %3260 = vtanh.f32 %v642_v57  ;;  %v646_v1 = vadd.f32 %v645_v63, %v4422_v0  ;;  %1367 = vmatmul.mubr.bf16.gmra.mrb[4].mxu1 %v1058_v50 }
 0x10f   : > { %v3251_v2 = vpop.eup %3250  ;;  %3262 = vtanh.f32 %v644_v62  ;;  %2890 = vmatmul.mubr.msk.bf16.gmra.mrb[120].mxu0 %vm471_vm1, %v451_v56 }
 0x110   : > { %v3253_v6 = vpop.eup %3252  ;;  %3264 = vtanh.f32 %v646_v1  ;;  %917 = vmatprep.mubr.bf16.mxu0 %v4082_v4 }
 0x111   : > { %v3255_v9 = vpop.eup %3254 }
 0x112   : > { %v3257_v10 = vpop.eup %3256  ;;  %v649_v11 = vpop.f32.mrb[16].mxu0  ;;  %v1060_v12 = vpack.c.bf16 %v3255_v9, %v3251_v2  ;;  %v3198_v9 = vld [vmem:[%s5008_s5 + $0x40] ss:$8 sps:$4 sm:$0xff]  }
 0x113   : > { %v650_v13 = vadd.f32 %v649_v11, %v4413_v61  ;;  %v651_v14 = vpop.f32.mrb[17].mxu0  ;;  %v1061_v15 = vpack.c.bf16 %v3257_v10, %v3253_v6  ;;  %v3200_v10 = vld [vmem:[%s5008_s5 + $0x44] ss:$8 sps:$4 sm:$0xff]  }
 0x114   : > { %v652_v17 = vadd.f32 %v651_v14, %v4422_v0  ;;  %v653_v18 = vpop.f32.mrb[18].mxu0  ;;  %2081 = vmatprep.subr.bf16.mxu0 %v3200_v10 }
 0x115   : > { %3266 = vtanh.f32 %v650_v13  ;;  %v654_v19 = vadd.f32 %v653_v18, %v4413_v61  ;;  %v655_v4 = vpop.f32.mrb[19].mxu0  ;;  %1376 = vmatprep.mubr.bf16.mxu1 %v1061_v15  ;;  %2082 = vmatpush1.bf16.msra.mxu0 %v3198_v9  ;;  %v3212_v9 = vld [vmem:[%s5008_s5 + $0x84] ss:$8 sps:$4 sm:$0xff]  }
 0x116   : > { %3268 = vtanh.f32 %v652_v17  ;;  %v656_v20 = vadd.f32 %v655_v4, %v4422_v0  ;;  %1377 = vmatmul.mubr.bf16.gmra.mrb[8].mxu1 %v1060_v12 }
 0x117   : > { %v3259_v21 = vpop.eup %3258  ;;  %3270 = vtanh.f32 %v654_v19  ;;  %2891 = vmatmul.mubr.msk.bf16.gmra.mrb[124].mxu0 %vm471_vm1, %v452_v16 }
 0x118   : > { %v3261_v22 = vpop.eup %3260  ;;  %3272 = vtanh.f32 %v656_v20 }
 0x119   : > { %v3263_v23 = vpop.eup %3262 }
 0x11a   : > { %v3265_v24 = vpop.eup %3264  ;;  %v659_v25 = vpop.f32.mrb[20].mxu0  ;;  %v1062_v26 = vpack.c.bf16 %v3263_v23, %v3259_v21 }
 0x11b   : > { %v660_v27 = vadd.f32 %v659_v25, %v4413_v61  ;;  %v661_v28 = vpop.f32.mrb[21].mxu0  ;;  %v1063_v29 = vpack.c.bf16 %v3265_v24, %v3261_v22 }
 0x11c   : > { %v662_v30 = vadd.f32 %v661_v28, %v4422_v0  ;;  %v663_v31 = vpop.f32.mrb[22].mxu0 }
 0x11d   : > { %3274 = vtanh.f32 %v660_v27  ;;  %v664_v32 = vadd.f32 %v663_v31, %v4413_v61  ;;  %v665_v33 = vpop.f32.mrb[23].mxu0  ;;  %1386 = vmatprep.mubr.bf16.mxu1 %v1063_v29 }
 0x11e   : > { %3276 = vtanh.f32 %v662_v30  ;;  %v666_v34 = vadd.f32 %v665_v33, %v4422_v0  ;;  %1387 = vmatmul.mubr.bf16.gmra.mrb[12].mxu1 %v1062_v26 }
 0x11f   : > { %v3267_v35 = vpop.eup %3266  ;;  %3278 = vtanh.f32 %v664_v32 }
 0x120   : > { %v3269_v38 = vpop.eup %3268  ;;  %3280 = vtanh.f32 %v666_v34 }
 0x121   : > { %v3271_v39 = vpop.eup %3270 }
 0x122   : > { %v3273_v40 = vpop.eup %3272  ;;  %v669_v41 = vpop.f32.mrb[24].mxu0  ;;  %v1064_v42 = vpack.c.bf16 %v3271_v39, %v3267_v35  ;;  %v3203_v39 = vld [vmem:[%s5008_s5 + $0x54] ss:$8 sps:$4 sm:$0xff]  }
 0x123   : > { %v670_v43 = vadd.f32 %v669_v41, %v4413_v61  ;;  %v671_v44 = vpop.f32.mrb[25].mxu0  ;;  %v1065_v45 = vpack.c.bf16 %v3273_v40, %v3269_v38  ;;  %v3201_v38 = vld [vmem:[%s5008_s5 + $0x50] ss:$8 sps:$4 sm:$0xff]   ;;  %2083 = vmatprep.subr.bf16.mxu0 %v3203_v39 }
 0x124   : > { %v672_v46 = vadd.f32 %v671_v44, %v4422_v0  ;;  %v673_v47 = vpop.f32.mrb[26].mxu0  ;;  %2084 = vmatpush1.bf16.msra.mxu0 %v3201_v38 }
 0x125   : > { %3282 = vtanh.f32 %v670_v43  ;;  %v674_v48 = vadd.f32 %v673_v47, %v4413_v61  ;;  %v675_v49 = vpop.f32.mrb[27].mxu0  ;;  %1396 = vmatprep.mubr.bf16.mxu1 %v1065_v45 }
 0x126   : > { %3284 = vtanh.f32 %v672_v46  ;;  %v676_v50 = vadd.f32 %v675_v49, %v4422_v0  ;;  %1397 = vmatmul.mubr.bf16.gmra.mrb[16].mxu1 %v1064_v42 }
 0x127   : > { %v3275_v51 = vpop.eup %3274  ;;  %3286 = vtanh.f32 %v674_v48  ;;  %v3206_v48 = vld [vmem:[%s5008_s5 + $0x64] ss:$8 sps:$4 sm:$0xff]  }
 0x128   : > { %v3277_v52 = vpop.eup %3276  ;;  %3288 = vtanh.f32 %v676_v50  ;;  %2085 = vmatprep.subr.bf16.mxu0 %v3206_v48 }
 0x129   : > { %v3279_v55 = vpop.eup %3278 }
 0x12a   : > { %v3281_v56 = vpop.eup %3280  ;;  %v679_v57 = vpop.f32.mrb[28].mxu0  ;;  %v1066_v59 = vpack.c.bf16 %v3279_v55, %v3275_v51  ;;  %v3204_v51 = vld [vmem:[%s5008_s5 + $0x60] ss:$8 sps:$4 sm:$0xff]  }
 0x12b   : > { %v680_v62 = vadd.f32 %v679_v57, %v4413_v61  ;;  %v681_v63 = vpop.f32.mrb[29].mxu0  ;;  %v1067_v1 = vpack.c.bf16 %v3281_v56, %v3277_v52  ;;  %2086 = vmatpush1.bf16.msra.mxu0 %v3204_v51  ;;  %v3222_v51 = vld [vmem:[%s5008_s5 + $0xc0] ss:$8 sps:$4 sm:$0xff]  }
 0x12c   : > { %v682_v2 = vadd.f32 %v681_v63, %v4422_v0  ;;  %v683_v3 = vpop.f32.mrb[30].mxu0  ;;  %v3207_v63 = vld [vmem:[%s5008_s5 + $0x70] ss:$8 sps:$4 sm:$0xff]  }
 0x12d   : > { %3290 = vtanh.f32 %v680_v62  ;;  %v684_v5 = vadd.f32 %v683_v3, %v4413_v61  ;;  %v685_v6 = vpop.f32.mrb[31].mxu0  ;;  %1406 = vmatprep.mubr.bf16.mxu1 %v1067_v1 }
 0x12e   : > { %3292 = vtanh.f32 %v682_v2  ;;  %v686_v7 = vadd.f32 %v685_v6, %v4422_v0  ;;  %1407 = vmatmul.mubr.bf16.gmra.mrb[20].mxu1 %v1066_v59  ;;  %v3209_v59 = vld [vmem:[%s5008_s5 + $0x74] ss:$8 sps:$4 sm:$0xff]  }
 0x12f   : > { %v3283_v8 = vpop.eup %3282  ;;  %3294 = vtanh.f32 %v684_v5  ;;  %2087 = vmatprep.subr.bf16.mxu0 %v3209_v59 }
 0x130   : > { %v3285_v11 = vpop.eup %3284  ;;  %3296 = vtanh.f32 %v686_v7  ;;  %2088 = vmatpush1.bf16.msra.mxu0 %v3207_v63 }
 0x131   : > { %v3287_v12 = vpop.eup %3286  ;;  %2089 = vmatprep.subr.bf16.mxu0 %v3212_v9 }
 0x132   : > { %v3289_v13 = vpop.eup %3288  ;;  %v689_v14 = vpop.f32.mrb[32].mxu0  ;;  %v1068_v15 = vpack.c.bf16 %v3287_v12, %v3283_v8  ;;  %v3210_v12 = vld [vmem:[%s5008_s5 + $0x80] ss:$8 sps:$4 sm:$0xff]  }
 0x133   : > { %v690_v16 = vadd.f32 %v689_v14, %v4413_v61  ;;  %v691_v17 = vpop.f32.mrb[33].mxu0  ;;  %v1069_v18 = vpack.c.bf16 %v3289_v13, %v3285_v11 }
 0x134   : > { %v692_v19 = vadd.f32 %v691_v17, %v4422_v0  ;;  %v693_v4 = vpop.f32.mrb[34].mxu0  ;;  %2090 = vmatpush1.bf16.msra.mxu0 %v3210_v12  ;;  %v3215_v17 = vld [vmem:[%s5008_s5 + $0x94] ss:$8 sps:$4 sm:$0xff]   ;;  %v3228_v12 = vld [vmem:[%s5008_s5 + $0xe0] ss:$8 sps:$4 sm:$0xff]  }
 0x135   : > { %3298 = vtanh.f32 %v690_v16  ;;  %v694_v20 = vadd.f32 %v693_v4, %v4413_v61  ;;  %v695_v21 = vpop.f32.mrb[35].mxu0  ;;  %1416 = vmatprep.mubr.bf16.mxu1 %v1069_v18  ;;  %2091 = vmatprep.subr.bf16.mxu0 %v3215_v17 }
 0x136   : > { %3300 = vtanh.f32 %v692_v19  ;;  %v696_v22 = vadd.f32 %v695_v21, %v4422_v0  ;;  %1417 = vmatmul.mubr.bf16.gmra.mrb[24].mxu1 %v1068_v15  ;;  %v3213_v19 = vld [vmem:[%s5008_s5 + $0x90] ss:$8 sps:$4 sm:$0xff]  }
 0x137   : > { %v3291_v23 = vpop.eup %3290  ;;  %3302 = vtanh.f32 %v694_v20 }
 0x138   : > { %v3293_v24 = vpop.eup %3292  ;;  %3304 = vtanh.f32 %v696_v22  ;;  %2092 = vmatpush1.bf16.msra.mxu0 %v3213_v19 }
 0x139   : > { %v3295_v25 = vpop.eup %3294 }
 0x13a   : > { %v3297_v26 = vpop.eup %3296  ;;  %v699_v27 = vpop.f32.mrb[36].mxu0  ;;  %v1070_v28 = vpack.c.bf16 %v3295_v25, %v3291_v23 }
 0x13b   : > { %v700_v29 = vadd.f32 %v699_v27, %v4413_v61  ;;  %v701_v30 = vpop.f32.mrb[37].mxu0  ;;  %v1071_v31 = vpack.c.bf16 %v3297_v26, %v3293_v24  ;;  %v3218_v26 = vld [vmem:[%s5008_s5 + $0xa4] ss:$8 sps:$4 sm:$0xff]  }
 0x13c   : > { %v702_v32 = vadd.f32 %v701_v30, %v4422_v0  ;;  %v703_v33 = vpop.f32.mrb[38].mxu0  ;;  %2093 = vmatprep.subr.bf16.mxu0 %v3218_v26 }
 0x13d   : > { %3306 = vtanh.f32 %v700_v29  ;;  %v704_v34 = vadd.f32 %v703_v33, %v4413_v61  ;;  %v705_v35 = vpop.f32.mrb[39].mxu0  ;;  %1426 = vmatprep.mubr.bf16.mxu1 %v1071_v31  ;;  %v3216_v29 = vld [vmem:[%s5008_s5 + $0xa0] ss:$8 sps:$4 sm:$0xff]  }
 0x13e   : > { %3308 = vtanh.f32 %v702_v32  ;;  %v706_v36 = vadd.f32 %v705_v35, %v4422_v0  ;;  %1427 = vmatmul.mubr.bf16.gmra.mrb[28].mxu1 %v1070_v28  ;;  %2094 = vmatpush1.bf16.msra.mxu0 %v3216_v29 }
 0x13f   : > { %v3299_v37 = vpop.eup %3298  ;;  %3310 = vtanh.f32 %v704_v34  ;;  %v3221_v34 = vld [vmem:[%s5008_s5 + $0xb4] ss:$8 sps:$4 sm:$0xff]  }
 0x140   : > { %v3301_v40 = vpop.eup %3300  ;;  %3312 = vtanh.f32 %v706_v36  ;;  %v3219_v36 = vld [vmem:[%s5008_s5 + $0xb0] ss:$8 sps:$4 sm:$0xff]   ;;  %2095 = vmatprep.subr.bf16.mxu0 %v3221_v34 }
 0x141   : > { %v3303_v41 = vpop.eup %3302 }
 0x142   : > { %v3305_v42 = vpop.eup %3304  ;;  %v709_v43 = vpop.f32.mrb[40].mxu0  ;;  %v1072_v44 = vpack.c.bf16 %v3303_v41, %v3299_v37  ;;  %2096 = vmatpush1.bf16.msra.mxu0 %v3219_v36 }
 0x143   : > { %v710_v45 = vadd.f32 %v709_v43, %v4413_v61  ;;  %v711_v46 = vpop.f32.mrb[41].mxu0  ;;  %v1073_v47 = vpack.c.bf16 %v3305_v42, %v3301_v40 }
 0x144   : > { %v712_v49 = vadd.f32 %v711_v46, %v4422_v0  ;;  %v713_v50 = vpop.f32.mrb[42].mxu0 }
 0x145   : > { %3314 = vtanh.f32 %v710_v45  ;;  %v714_v52 = vadd.f32 %v713_v50, %v4413_v61  ;;  %v715_v55 = vpop.f32.mrb[43].mxu0  ;;  %1436 = vmatprep.mubr.bf16.mxu1 %v1073_v47 }
 0x146   : > { %3316 = vtanh.f32 %v712_v49  ;;  %v716_v56 = vadd.f32 %v715_v55, %v4422_v0  ;;  %1437 = vmatmul.mubr.bf16.gmra.mrb[32].mxu1 %v1072_v44  ;;  %v3224_v49 = vld [vmem:[%s5008_s5 + $0xc4] ss:$8 sps:$4 sm:$0xff]  }
 0x147   : > { %v3307_v57 = vpop.eup %3306  ;;  %3318 = vtanh.f32 %v714_v52  ;;  %2097 = vmatprep.subr.bf16.mxu0 %v3224_v49 }
 0x148   : > { %v3309_v62 = vpop.eup %3308  ;;  %3320 = vtanh.f32 %v716_v56  ;;  %2098 = vmatpush1.bf16.msra.mxu0 %v3222_v51 }
 0x149   : > { %v3311_v1 = vpop.eup %3310 }
 0x14a   : > { %v3313_v2 = vpop.eup %3312  ;;  %v719_v3 = vpop.f32.mrb[44].mxu0  ;;  %v1074_v5 = vpack.c.bf16 %v3311_v1, %v3307_v57 }
 0x14b   : > { %v720_v6 = vadd.f32 %v719_v3, %v4413_v61  ;;  %v721_v7 = vpop.f32.mrb[45].mxu0  ;;  %v1075_v8 = vpack.c.bf16 %v3313_v2, %v3309_v62  ;;  %v3227_v62 = vld [vmem:[%s5008_s5 + $0xd4] ss:$8 sps:$4 sm:$0xff]   ;;  %v3225_v3 = vld [vmem:[%s5008_s5 + $0xd0] ss:$8 sps:$4 sm:$0xff]  }
 0x14c   : > { %v722_v10 = vadd.f32 %v721_v7, %v4422_v0  ;;  %v723_v11 = vpop.f32.mrb[46].mxu0  ;;  %2099 = vmatprep.subr.bf16.mxu0 %v3227_v62 }
 0x14d   : > { %3322 = vtanh.f32 %v720_v6  ;;  %v724_v13 = vadd.f32 %v723_v11, %v4413_v61  ;;  %v725_v14 = vpop.f32.mrb[47].mxu0  ;;  %1446 = vmatprep.mubr.bf16.mxu1 %v1075_v8  ;;  %2100 = vmatpush1.bf16.msra.mxu0 %v3225_v3 }
 0x14e   : > { %3324 = vtanh.f32 %v722_v10  ;;  %v726_v15 = vadd.f32 %v725_v14, %v4422_v0  ;;  %1447 = vmatmul.mubr.bf16.gmra.mrb[36].mxu1 %v1074_v5  ;;  %v3230_v10 = vld [vmem:[%s5008_s5 + $0xe4] ss:$8 sps:$4 sm:$0xff]  }
 0x14f   : > { %v3315_v16 = vpop.eup %3314  ;;  %3326 = vtanh.f32 %v724_v13  ;;  %2101 = vmatprep.subr.bf16.mxu0 %v3230_v10 }
 0x150   : > { %v3317_v18 = vpop.eup %3316  ;;  %3328 = vtanh.f32 %v726_v15 }
 0x151   : > { %v3319_v4 = vpop.eup %3318  ;;  %2102 = vmatpush1.bf16.msra.mxu0 %v3228_v12 }
 0x152   : > { %v3321_v20 = vpop.eup %3320  ;;  %v729_v21 = vpop.f32.mrb[48].mxu0  ;;  %v1076_v22 = vpack.c.bf16 %v3319_v4, %v3315_v16 }
 0x153   : > { %v730_v23 = vadd.f32 %v729_v21, %v4413_v61  ;;  %v731_v24 = vpop.f32.mrb[49].mxu0  ;;  %v1077_v25 = vpack.c.bf16 %v3321_v20, %v3317_v18  ;;  %v3233_v18 = vld [vmem:[%s5008_s5 + $0xf4] ss:$8 sps:$4 sm:$0xff]   ;;  %v3231_v21 = vld [vmem:[%s5008_s5 + $0xf0] ss:$8 sps:$4 sm:$0xff]  }
 0x154   : > { %v732_v27 = vadd.f32 %v731_v24, %v4422_v0  ;;  %v733_v28 = vpop.f32.mrb[50].mxu0  ;;  %2103 = vmatprep.subr.bf16.mxu0 %v3233_v18 }
 0x155   : > { %3330 = vtanh.f32 %v730_v23  ;;  %v734_v30 = vadd.f32 %v733_v28, %v4413_v61  ;;  %v735_v31 = vpop.f32.mrb[51].mxu0  ;;  %1456 = vmatprep.mubr.bf16.mxu1 %v1077_v25  ;;  %2104 = vmatpush1.bf16.msra.mxu0 %v3231_v21 }
 0x156   : > { %3332 = vtanh.f32 %v732_v27  ;;  %v736_v32 = vadd.f32 %v735_v31, %v4422_v0  ;;  %1457 = vmatmul.mubr.bf16.gmra.mrb[40].mxu1 %v1076_v22 }
 0x157   : > { %v3323_v33 = vpop.eup %3322  ;;  %3334 = vtanh.f32 %v734_v30 }
 0x158   : > { %v3325_v35 = vpop.eup %3324  ;;  %3336 = vtanh.f32 %v736_v32 }
 0x159   : > { %v3327_v37 = vpop.eup %3326 }
 0x15a   : > { %v3329_v38 = vpop.eup %3328  ;;  %v739_v39 = vpop.f32.mrb[52].mxu0  ;;  %v1078_v40 = vpack.c.bf16 %v3327_v37, %v3323_v33 }
 0x15b   : > { %v740_v41 = vadd.f32 %v739_v39, %v4413_v61  ;;  %v741_v42 = vpop.f32.mrb[53].mxu0  ;;  %v1079_v43 = vpack.c.bf16 %v3329_v38, %v3325_v35 }
 0x15c   : > { %v742_v44 = vadd.f32 %v741_v42, %v4422_v0  ;;  %v743_v45 = vpop.f32.mrb[54].mxu0 }
 0x15d   : > { %3338 = vtanh.f32 %v740_v41  ;;  %v744_v46 = vadd.f32 %v743_v45, %v4413_v61  ;;  %v745_v47 = vpop.f32.mrb[55].mxu0  ;;  %1466 = vmatprep.mubr.bf16.mxu1 %v1079_v43 }
 0x15e   : > { %3340 = vtanh.f32 %v742_v44  ;;  %v746_v48 = vadd.f32 %v745_v47, %v4422_v0  ;;  %1467 = vmatmul.mubr.bf16.gmra.mrb[44].mxu1 %v1078_v40 }
 0x15f   : > { %v3331_v50 = vpop.eup %3330  ;;  %3342 = vtanh.f32 %v744_v46 }
 0x160   : > { %v3333_v52 = vpop.eup %3332  ;;  %3344 = vtanh.f32 %v746_v48 }
 0x161   : > { %v3335_v55 = vpop.eup %3334 }
 0x162   : > { %v3337_v56 = vpop.eup %3336  ;;  %v749_v57 = vpop.f32.mrb[56].mxu0  ;;  %v1080_v59 = vpack.c.bf16 %v3335_v55, %v3331_v50 }
 0x163   : > { %v750_v63 = vadd.f32 %v749_v57, %v4413_v61  ;;  %v751_v1 = vpop.f32.mrb[57].mxu0  ;;  %v1081_v2 = vpack.c.bf16 %v3337_v56, %v3333_v52 }
 0x164   : > { %v752_v5 = vadd.f32 %v751_v1, %v4422_v0  ;;  %v753_v6 = vpop.f32.mrb[58].mxu0 }
 0x165   : > { %3346 = vtanh.f32 %v750_v63  ;;  %v754_v7 = vadd.f32 %v753_v6, %v4413_v61  ;;  %v755_v8 = vpop.f32.mrb[59].mxu0  ;;  %1476 = vmatprep.mubr.bf16.mxu1 %v1081_v2 }
 0x166   : > { %3348 = vtanh.f32 %v752_v5  ;;  %v756_v9 = vadd.f32 %v755_v8, %v4422_v0  ;;  %1477 = vmatmul.mubr.bf16.gmra.mrb[48].mxu1 %v1080_v59 }
 0x167   : > { %v3339_v11 = vpop.eup %3338  ;;  %3350 = vtanh.f32 %v754_v7 }
 0x168   : > { %v3341_v13 = vpop.eup %3340  ;;  %3352 = vtanh.f32 %v756_v9 }
 0x169   : > { %v3343_v14 = vpop.eup %3342 }
 0x16a   : > { %v3345_v15 = vpop.eup %3344  ;;  %v759_v16 = vpop.f32.mrb[60].mxu0  ;;  %v1082_v17 = vpack.c.bf16 %v3343_v14, %v3339_v11 }
 0x16b   : > { %v760_v19 = vadd.f32 %v759_v16, %v4413_v61  ;;  %v761_v4 = vpop.f32.mrb[61].mxu0  ;;  %v1083_v20 = vpack.c.bf16 %v3345_v15, %v3341_v13 }
 0x16c   : > { %v762_v22 = vadd.f32 %v761_v4, %v4422_v0  ;;  %v763_v23 = vpop.f32.mrb[62].mxu0 }
 0x16d   : > { %3354 = vtanh.f32 %v760_v19  ;;  %v764_v24 = vadd.f32 %v763_v23, %v4413_v61  ;;  %v765_v25 = vpop.f32.mrb[63].mxu0  ;;  %1486 = vmatprep.mubr.bf16.mxu1 %v1083_v20 }
 0x16e   : > { %3356 = vtanh.f32 %v762_v22  ;;  %v766_v26 = vadd.f32 %v765_v25, %v4422_v0  ;;  %1487 = vmatmul.mubr.bf16.gmra.mrb[52].mxu1 %v1082_v17 }
 0x16f   : > { %v3347_v27 = vpop.eup %3346  ;;  %3358 = vtanh.f32 %v764_v24 }
 0x170   : > { %v3349_v28 = vpop.eup %3348  ;;  %3360 = vtanh.f32 %v766_v26 }
 0x171   : > { %v3351_v29 = vpop.eup %3350 }
 0x172   : > { %v3353_v30 = vpop.eup %3352  ;;  %v769_v31 = vpop.f32.mrb[64].mxu0  ;;  %v1084_v32 = vpack.c.bf16 %v3351_v29, %v3347_v27 }
 0x173   : > { %v770_v33 = vadd.f32 %v769_v31, %v4413_v61  ;;  %v771_v34 = vpop.f32.mrb[65].mxu0  ;;  %v1085_v35 = vpack.c.bf16 %v3353_v30, %v3349_v28 }
 0x174   : > { %v772_v36 = vadd.f32 %v771_v34, %v4422_v0  ;;  %v773_v37 = vpop.f32.mrb[66].mxu0 }
 0x175   : > { %3362 = vtanh.f32 %v770_v33  ;;  %v774_v38 = vadd.f32 %v773_v37, %v4413_v61  ;;  %v775_v39 = vpop.f32.mrb[67].mxu0  ;;  %1496 = vmatprep.mubr.bf16.mxu1 %v1085_v35 }
 0x176   : > { %3364 = vtanh.f32 %v772_v36  ;;  %v776_v40 = vadd.f32 %v775_v39, %v4422_v0  ;;  %1497 = vmatmul.mubr.bf16.gmra.mrb[56].mxu1 %v1084_v32 }
 0x177   : > { %v3355_v41 = vpop.eup %3354  ;;  %3366 = vtanh.f32 %v774_v38 }
 0x178   : > { %v3357_v42 = vpop.eup %3356  ;;  %3368 = vtanh.f32 %v776_v40 }
 0x179   : > { %v3359_v43 = vpop.eup %3358 }
 0x17a   : > { %v3361_v44 = vpop.eup %3360  ;;  %v779_v45 = vpop.f32.mrb[68].mxu0  ;;  %v1086_v46 = vpack.c.bf16 %v3359_v43, %v3355_v41 }
 0x17b   : > { %v780_v47 = vadd.f32 %v779_v45, %v4413_v61  ;;  %v781_v48 = vpop.f32.mrb[69].mxu0  ;;  %v1087_v49 = vpack.c.bf16 %v3361_v44, %v3357_v42 }
 0x17c   : > { %v782_v50 = vadd.f32 %v781_v48, %v4422_v0  ;;  %v783_v51 = vpop.f32.mrb[70].mxu0 }
 0x17d   : > { %3370 = vtanh.f32 %v780_v47  ;;  %v784_v52 = vadd.f32 %v783_v51, %v4413_v61  ;;  %v785_v55 = vpop.f32.mrb[71].mxu0  ;;  %1506 = vmatprep.mubr.bf16.mxu1 %v1087_v49 }
 0x17e   : > { %3372 = vtanh.f32 %v782_v50  ;;  %v786_v56 = vadd.f32 %v785_v55, %v4422_v0  ;;  %1507 = vmatmul.mubr.bf16.gmra.mrb[60].mxu1 %v1086_v46 }
 0x17f   : > { %v3363_v57 = vpop.eup %3362  ;;  %3374 = vtanh.f32 %v784_v52 }
 0x180   : > { %v3365_v59 = vpop.eup %3364  ;;  %3376 = vtanh.f32 %v786_v56 }
 0x181   : > { %v3367_v62 = vpop.eup %3366 }
 0x182   : > { %v3369_v63 = vpop.eup %3368  ;;  %v789_v1 = vpop.f32.mrb[72].mxu0  ;;  %v1088_v2 = vpack.c.bf16 %v3367_v62, %v3363_v57 }
 0x183   : > { %v790_v3 = vadd.f32 %v789_v1, %v4413_v61  ;;  %v791_v5 = vpop.f32.mrb[73].mxu0  ;;  %v1089_v6 = vpack.c.bf16 %v3369_v63, %v3365_v59 }
 0x184   : > { %v792_v7 = vadd.f32 %v791_v5, %v4422_v0  ;;  %v793_v8 = vpop.f32.mrb[74].mxu0 }
 0x185   : > { %3378 = vtanh.f32 %v790_v3  ;;  %v794_v9 = vadd.f32 %v793_v8, %v4413_v61  ;;  %v795_v10 = vpop.f32.mrb[75].mxu0  ;;  %1516 = vmatprep.mubr.bf16.mxu1 %v1089_v6 }
 0x186   : > { %3380 = vtanh.f32 %v792_v7  ;;  %v796_v11 = vadd.f32 %v795_v10, %v4422_v0  ;;  %1517 = vmatmul.mubr.bf16.gmra.mrb[64].mxu1 %v1088_v2 }
 0x187   : > { %v3371_v12 = vpop.eup %3370  ;;  %3382 = vtanh.f32 %v794_v9 }
 0x188   : > { %v3373_v13 = vpop.eup %3372  ;;  %3384 = vtanh.f32 %v796_v11 }
 0x189   : > { %v3375_v14 = vpop.eup %3374 }
 0x18a   : > { %v3377_v15 = vpop.eup %3376  ;;  %v799_v16 = vpop.f32.mrb[76].mxu0  ;;  %v1090_v17 = vpack.c.bf16 %v3375_v14, %v3371_v12 }
 0x18b   : > { %v800_v18 = vadd.f32 %v799_v16, %v4413_v61  ;;  %v801_v19 = vpop.f32.mrb[77].mxu0  ;;  %v1091_v4 = vpack.c.bf16 %v3377_v15, %v3373_v13 }
 0x18c   : > { %v802_v20 = vadd.f32 %v801_v19, %v4422_v0  ;;  %v803_v21 = vpop.f32.mrb[78].mxu0 }
 0x18d   : > { %3386 = vtanh.f32 %v800_v18  ;;  %v804_v22 = vadd.f32 %v803_v21, %v4413_v61  ;;  %v805_v23 = vpop.f32.mrb[79].mxu0  ;;  %1526 = vmatprep.mubr.bf16.mxu1 %v1091_v4 }
 0x18e   : > { %3388 = vtanh.f32 %v802_v20  ;;  %v806_v24 = vadd.f32 %v805_v23, %v4422_v0  ;;  %1527 = vmatmul.mubr.bf16.gmra.mrb[68].mxu1 %v1090_v17 }
 0x18f   : > { %v3379_v25 = vpop.eup %3378  ;;  %3390 = vtanh.f32 %v804_v22 }
 0x190   : > { %v3381_v26 = vpop.eup %3380  ;;  %3392 = vtanh.f32 %v806_v24 }
 0x191   : > { %v3383_v27 = vpop.eup %3382 }
 0x192   : > { %v3385_v28 = vpop.eup %3384  ;;  %v809_v29 = vpop.f32.mrb[80].mxu0  ;;  %v1092_v30 = vpack.c.bf16 %v3383_v27, %v3379_v25 }
 0x193   : > { %v810_v31 = vadd.f32 %v809_v29, %v4413_v61  ;;  %v811_v32 = vpop.f32.mrb[81].mxu0  ;;  %v1093_v33 = vpack.c.bf16 %v3385_v28, %v3381_v26 }
 0x194   : > { %v812_v34 = vadd.f32 %v811_v32, %v4422_v0  ;;  %v813_v35 = vpop.f32.mrb[82].mxu0 }
 0x195   : > { %3394 = vtanh.f32 %v810_v31  ;;  %v814_v36 = vadd.f32 %v813_v35, %v4413_v61  ;;  %v815_v37 = vpop.f32.mrb[83].mxu0  ;;  %1536 = vmatprep.mubr.bf16.mxu1 %v1093_v33 }
 0x196   : > { %3396 = vtanh.f32 %v812_v34  ;;  %v816_v38 = vadd.f32 %v815_v37, %v4422_v0  ;;  %1537 = vmatmul.mubr.bf16.gmra.mrb[72].mxu1 %v1092_v30 }
 0x197   : > { %v3387_v39 = vpop.eup %3386  ;;  %3398 = vtanh.f32 %v814_v36 }
 0x198   : > { %v3389_v40 = vpop.eup %3388  ;;  %3400 = vtanh.f32 %v816_v38 }
 0x199   : > { %v3391_v41 = vpop.eup %3390 }
 0x19a   : > { %v3393_v42 = vpop.eup %3392  ;;  %v819_v43 = vpop.f32.mrb[84].mxu0  ;;  %v1094_v44 = vpack.c.bf16 %v3391_v41, %v3387_v39 }
 0x19b   : > { %v820_v45 = vadd.f32 %v819_v43, %v4413_v61  ;;  %v821_v46 = vpop.f32.mrb[85].mxu0  ;;  %v1095_v47 = vpack.c.bf16 %v3393_v42, %v3389_v40 }
 0x19c   : > { %v822_v48 = vadd.f32 %v821_v46, %v4422_v0  ;;  %v823_v49 = vpop.f32.mrb[86].mxu0 }
 0x19d   : > { %3402 = vtanh.f32 %v820_v45  ;;  %v824_v50 = vadd.f32 %v823_v49, %v4413_v61  ;;  %v825_v51 = vpop.f32.mrb[87].mxu0  ;;  %1546 = vmatprep.mubr.bf16.mxu1 %v1095_v47 }
 0x19e   : > { %3404 = vtanh.f32 %v822_v48  ;;  %v826_v52 = vadd.f32 %v825_v51, %v4422_v0  ;;  %1547 = vmatmul.mubr.bf16.gmra.mrb[76].mxu1 %v1094_v44 }
 0x19f   : > { %v3395_v55 = vpop.eup %3394  ;;  %3406 = vtanh.f32 %v824_v50 }
 0x1a0   : > { %v3397_v56 = vpop.eup %3396  ;;  %3408 = vtanh.f32 %v826_v52 }
 0x1a1   : > { %v3399_v57 = vpop.eup %3398 }
 0x1a2   : > { %v3401_v59 = vpop.eup %3400  ;;  %v829_v62 = vpop.f32.mrb[88].mxu0  ;;  %v1096_v63 = vpack.c.bf16 %v3399_v57, %v3395_v55 }
 0x1a3   : > { %v830_v1 = vadd.f32 %v829_v62, %v4413_v61  ;;  %v831_v2 = vpop.f32.mrb[89].mxu0  ;;  %v1097_v3 = vpack.c.bf16 %v3401_v59, %v3397_v56 }
 0x1a4   : > { %v832_v5 = vadd.f32 %v831_v2, %v4422_v0  ;;  %v833_v6 = vpop.f32.mrb[90].mxu0 }
 0x1a5   : > { %3410 = vtanh.f32 %v830_v1  ;;  %v834_v7 = vadd.f32 %v833_v6, %v4413_v61  ;;  %v835_v8 = vpop.f32.mrb[91].mxu0  ;;  %1556 = vmatprep.mubr.bf16.mxu1 %v1097_v3 }
 0x1a6   : > { %3412 = vtanh.f32 %v832_v5  ;;  %v836_v9 = vadd.f32 %v835_v8, %v4422_v0  ;;  %1557 = vmatmul.mubr.bf16.gmra.mrb[80].mxu1 %v1096_v63 }
 0x1a7   : > { %v3403_v10 = vpop.eup %3402  ;;  %3414 = vtanh.f32 %v834_v7 }
 0x1a8   : > { %v3405_v11 = vpop.eup %3404  ;;  %3416 = vtanh.f32 %v836_v9 }
 0x1a9   : > { %v3407_v12 = vpop.eup %3406 }
 0x1aa   : > { %v3409_v13 = vpop.eup %3408  ;;  %v839_v14 = vpop.f32.mrb[92].mxu0  ;;  %v1098_v15 = vpack.c.bf16 %v3407_v12, %v3403_v10 }
 0x1ab   : > { %v840_v16 = vadd.f32 %v839_v14, %v4413_v61  ;;  %v841_v17 = vpop.f32.mrb[93].mxu0  ;;  %v1099_v18 = vpack.c.bf16 %v3409_v13, %v3405_v11 }
 0x1ac   : > { %v842_v19 = vadd.f32 %v841_v17, %v4422_v0  ;;  %v843_v4 = vpop.f32.mrb[94].mxu0 }
 0x1ad   : > { %3418 = vtanh.f32 %v840_v16  ;;  %v844_v20 = vadd.f32 %v843_v4, %v4413_v61  ;;  %v845_v21 = vpop.f32.mrb[95].mxu0  ;;  %1566 = vmatprep.mubr.bf16.mxu1 %v1099_v18 }
 0x1ae   : > { %3420 = vtanh.f32 %v842_v19  ;;  %v846_v22 = vadd.f32 %v845_v21, %v4422_v0  ;;  %1567 = vmatmul.mubr.bf16.gmra.mrb[84].mxu1 %v1098_v15 }
 0x1af   : > { %v3411_v23 = vpop.eup %3410  ;;  %3422 = vtanh.f32 %v844_v20 }
 0x1b0   : > { %v3413_v24 = vpop.eup %3412  ;;  %3424 = vtanh.f32 %v846_v22 }
 0x1b1   : > { %v3415_v25 = vpop.eup %3414 }
 0x1b2   : > { %v3417_v26 = vpop.eup %3416  ;;  %v849_v27 = vpop.f32.mrb[96].mxu0  ;;  %v1100_v28 = vpack.c.bf16 %v3415_v25, %v3411_v23 }
 0x1b3   : > { %v850_v29 = vadd.f32 %v849_v27, %v4413_v61  ;;  %v851_v30 = vpop.f32.mrb[97].mxu0  ;;  %v1101_v31 = vpack.c.bf16 %v3417_v26, %v3413_v24 }
 0x1b4   : > { %v852_v32 = vadd.f32 %v851_v30, %v4422_v0  ;;  %v853_v33 = vpop.f32.mrb[98].mxu0  ;;  %v1152_v30 = vld [vmem:[%s5007_s4] sm:$0x3] }
 0x1b5   : > { %3426 = vtanh.f32 %v850_v29  ;;  %v854_v34 = vadd.f32 %v853_v33, %v4413_v61  ;;  %v855_v35 = vpop.f32.mrb[99].mxu0  ;;  %1576 = vmatprep.mubr.bf16.mxu1 %v1101_v31 }
 0x1b6   : > { %3428 = vtanh.f32 %v852_v32  ;;  %v856_v36 = vadd.f32 %v855_v35, %v4422_v0  ;;  %1577 = vmatmul.mubr.bf16.gmra.mrb[88].mxu1 %v1100_v28 }
 0x1b7   : > { %v3419_v37 = vpop.eup %3418  ;;  %3430 = vtanh.f32 %v854_v34 }
 0x1b8   : > { %v3421_v38 = vpop.eup %3420  ;;  %3432 = vtanh.f32 %v856_v36  ;;  %v4654_v36 = vrot.slane %v1152_v30, %v4403_v58 }
 0x1b9   : > { %v3423_v39 = vpop.eup %3422 }
 0x1ba   : > { %v3425_v40 = vpop.eup %3424  ;;  %v859_v41 = vpop.f32.mrb[100].mxu0  ;;  %v1102_v42 = vpack.c.bf16 %v3423_v39, %v3419_v37 }
 0x1bb   : > { %v860_v43 = vadd.f32 %v859_v41, %v4413_v61  ;;  %v861_v44 = vpop.f32.mrb[101].mxu0  ;;  %v1103_v45 = vpack.c.bf16 %v3425_v40, %v3421_v38  ;;  %v4657_v38 = vrot.slane %v1152_v30, %v4409_v60 }
 0x1bc   : > { %v862_v46 = vadd.f32 %v861_v44, %v4422_v0  ;;  %v863_v47 = vpop.f32.mrb[102].mxu0 }
 0x1bd   : > { %3434 = vtanh.f32 %v860_v43  ;;  %v864_v48 = vadd.f32 %v863_v47, %v4413_v61  ;;  %v865_v49 = vpop.f32.mrb[103].mxu0  ;;  %1586 = vmatprep.mubr.bf16.mxu1 %v1103_v45 }
 0x1be   : > { %3436 = vtanh.f32 %v862_v46  ;;  %v866_v50 = vadd.f32 %v865_v49, %v4422_v0  ;;  %1587 = vmatmul.mubr.bf16.gmra.mrb[92].mxu1 %v1102_v42 }
 0x1bf   : > { %v3427_v51 = vpop.eup %3426  ;;  %3438 = vtanh.f32 %v864_v48 }
 0x1c0   : > { %v3429_v52 = vpop.eup %3428  ;;  %3440 = vtanh.f32 %v866_v50 }
 0x1c1   : > { %v3431_v55 = vpop.eup %3430 }
 0x1c2   : > { %v3433_v56 = vpop.eup %3432  ;;  %v869_v57 = vpop.f32.mrb[104].mxu0  ;;  %v1104_v59 = vpack.c.bf16 %v3431_v55, %v3427_v51 }
 0x1c3   : > { %v870_v62 = vadd.f32 %v869_v57, %v4413_v61  ;;  %v871_v63 = vpop.f32.mrb[105].mxu0  ;;  %v1105_v1 = vpack.c.bf16 %v3433_v56, %v3429_v52 }
 0x1c4   : > { %v872_v2 = vadd.f32 %v871_v63, %v4422_v0  ;;  %v873_v3 = vpop.f32.mrb[106].mxu0 }
 0x1c5   : > { %3442 = vtanh.f32 %v870_v62  ;;  %v874_v5 = vadd.f32 %v873_v3, %v4413_v61  ;;  %v875_v6 = vpop.f32.mrb[107].mxu0  ;;  %1596 = vmatprep.mubr.bf16.mxu1 %v1105_v1 }
 0x1c6   : > { %3444 = vtanh.f32 %v872_v2  ;;  %v876_v7 = vadd.f32 %v875_v6, %v4422_v0  ;;  %1597 = vmatmul.mubr.bf16.gmra.mrb[96].mxu1 %v1104_v59 }
 0x1c7   : > { %v3435_v8 = vpop.eup %3434  ;;  %3446 = vtanh.f32 %v874_v5 }
 0x1c8   : > { %v3437_v9 = vpop.eup %3436  ;;  %3448 = vtanh.f32 %v876_v7 }
 0x1c9   : > { %v3439_v10 = vpop.eup %3438 }
 0x1ca   : > { %v3441_v11 = vpop.eup %3440  ;;  %v879_v12 = vpop.f32.mrb[108].mxu0  ;;  %v1106_v13 = vpack.c.bf16 %v3439_v10, %v3435_v8 }
 0x1cb   : > { %v880_v14 = vadd.f32 %v879_v12, %v4413_v61  ;;  %v881_v15 = vpop.f32.mrb[109].mxu0  ;;  %v1107_v16 = vpack.c.bf16 %v3441_v11, %v3437_v9 }
 0x1cc   : > { %v882_v17 = vadd.f32 %v881_v15, %v4422_v0  ;;  %v883_v18 = vpop.f32.mrb[110].mxu0 }
 0x1cd   : > { %3450 = vtanh.f32 %v880_v14  ;;  %v884_v19 = vadd.f32 %v883_v18, %v4413_v61  ;;  %v885_v4 = vpop.f32.mrb[111].mxu0  ;;  %1606 = vmatprep.mubr.bf16.mxu1 %v1107_v16 }
 0x1ce   : > { %3452 = vtanh.f32 %v882_v17  ;;  %v886_v20 = vadd.f32 %v885_v4, %v4422_v0  ;;  %1607 = vmatmul.mubr.bf16.gmra.mrb[100].mxu1 %v1106_v13 }
 0x1cf   : > { %v3443_v21 = vpop.eup %3442  ;;  %3454 = vtanh.f32 %v884_v19 }
 0x1d0   : > { %v3445_v22 = vpop.eup %3444  ;;  %3456 = vtanh.f32 %v886_v20 }
 0x1d1   : > { %v3447_v23 = vpop.eup %3446 }
 0x1d2   : > { %v3449_v24 = vpop.eup %3448  ;;  %v889_v25 = vpop.f32.mrb[112].mxu0  ;;  %v1108_v26 = vpack.c.bf16 %v3447_v23, %v3443_v21 }
 0x1d3   : > { %v890_v27 = vadd.f32 %v889_v25, %v4413_v61  ;;  %v891_v28 = vpop.f32.mrb[113].mxu0  ;;  %v1109_v29 = vpack.c.bf16 %v3449_v24, %v3445_v22 }
 0x1d4   : > { %v892_v31 = vadd.f32 %v891_v28, %v4422_v0  ;;  %v893_v32 = vpop.f32.mrb[114].mxu0 }
 0x1d5   : > { %3458 = vtanh.f32 %v890_v27  ;;  %v894_v33 = vadd.f32 %v893_v32, %v4413_v61  ;;  %v895_v34 = vpop.f32.mrb[115].mxu0  ;;  %1616 = vmatprep.mubr.bf16.mxu1 %v1109_v29 }
 0x1d6   : > { %3460 = vtanh.f32 %v892_v31  ;;  %v896_v35 = vadd.f32 %v895_v34, %v4422_v0  ;;  %1617 = vmatmul.mubr.bf16.gmra.mrb[104].mxu1 %v1108_v26 }
 0x1d7   : > { %v3451_v37 = vpop.eup %3450  ;;  %3462 = vtanh.f32 %v894_v33 }
 0x1d8   : > { %v3453_v39 = vpop.eup %3452  ;;  %3464 = vtanh.f32 %v896_v35 }
 0x1d9   : > { %v3455_v40 = vpop.eup %3454  ;;  %v1358_v41 = vpop.f32.mrb[0].mxu1 }
 0x1da   : > { %v3457_v42 = vpop.eup %3456  ;;  %v1359_v43 = vadd.f32 %v1358_v41, %v4654_v36  ;;  %v899_v44 = vpop.f32.mrb[116].mxu0  ;;  %v1110_v46 = vpack.c.bf16 %v3455_v40, %v3451_v37 }
 0x1db   : > { %v1360_v45 = vpop.f32.mrb[1].mxu1  ;;  %v900_v47 = vadd.f32 %v899_v44, %v4413_v61  ;;  %v901_v49 = vpop.f32.mrb[117].mxu0  ;;  %v1111_v51 = vpack.c.bf16 %v3457_v42, %v3453_v39 }
 0x1dc   : > { %v1361_v48 = vadd.f32 %v1360_v45, %v4657_v38  ;;  %v1362_v50 = vpop.f32.mrb[2].mxu1  ;;  %3466 = vtanh.f32 %v1359_v43  ;;  %v902_v52 = vadd.f32 %v901_v49, %v4422_v0  ;;  %v903_v56 = vpop.f32.mrb[118].mxu0 }
 0x1dd   : > { %v1363_v55 = vadd.f32 %v1362_v50, %v4654_v36  ;;  %v1364_v57 = vpop.f32.mrb[3].mxu1  ;;  %3468 = vtanh.f32 %v900_v47  ;;  %v904_v59 = vadd.f32 %v903_v56, %v4413_v61  ;;  %v905_v62 = vpop.f32.mrb[119].mxu0  ;;  %1626 = vmatprep.mubr.bf16.mxu1 %v1111_v51 }
 0x1de   : > { %3470 = vtanh.f32 %v1361_v48  ;;  %v1365_v63 = vadd.f32 %v1364_v57, %v4657_v38  ;;  %1627 = vmatmul.mubr.bf16.gmra.mrb[108].mxu1 %v1110_v46  ;;  %v906_v2 = vadd.f32 %v905_v62, %v4422_v0 }
 0x1df   : > { %v3459_v1 = vpop.eup %3458  ;;  %3472 = vtanh.f32 %v902_v52 }
 0x1e0   : > { %v3461_v3 = vpop.eup %3460  ;;  %3474 = vtanh.f32 %v1363_v55 }
 0x1e1   : > { %v3463_v5 = vpop.eup %3462  ;;  %3476 = vtanh.f32 %v904_v59  ;;  %v1368_v6 = vpop.f32.mrb[4].mxu1 }
 0x1e2   : > { %v3465_v7 = vpop.eup %3464  ;;  %3478 = vtanh.f32 %v1365_v63  ;;  %v1369_v8 = vadd.f32 %v1368_v6, %v4654_v36  ;;  %v909_v9 = vpop.f32.mrb[120].mxu0  ;;  %v1112_v11 = vpack.c.bf16 %v3463_v5, %v3459_v1 }
 0x1e3   : > { %v1370_v10 = vpop.f32.mrb[5].mxu1  ;;  %3480 = vtanh.f32 %v906_v2  ;;  %v910_v12 = vadd.f32 %v909_v9, %v4413_v61  ;;  %v911_v14 = vpop.f32.mrb[121].mxu0  ;;  %v1113_v16 = vpack.c.bf16 %v3465_v7, %v3461_v3 }
 0x1e4   : > { %v1371_v13 = vadd.f32 %v1370_v10, %v4657_v38  ;;  %v1372_v15 = vpop.f32.mrb[6].mxu1  ;;  %3482 = vtanh.f32 %v1369_v8  ;;  %v912_v17 = vadd.f32 %v911_v14, %v4422_v0  ;;  %v913_v19 = vpop.f32.mrb[122].mxu0 }
 0x1e5   : > { %v1373_v18 = vadd.f32 %v1372_v15, %v4654_v36  ;;  %v1374_v4 = vpop.f32.mrb[7].mxu1  ;;  %3484 = vtanh.f32 %v910_v12  ;;  %v914_v20 = vadd.f32 %v913_v19, %v4413_v61  ;;  %v915_v21 = vpop.f32.mrb[123].mxu0  ;;  %1636 = vmatprep.mubr.bf16.mxu1 %v1113_v16 }
 0x1e6   : > { %v3467_v22 = vpop.eup %3466  ;;  %3486 = vtanh.f32 %v1371_v13  ;;  %v1375_v23 = vadd.f32 %v1374_v4, %v4657_v38  ;;  %1637 = vmatmul.mubr.bf16.gmra.mrb[112].mxu1 %v1112_v11  ;;  %v916_v25 = vadd.f32 %v915_v21, %v4422_v0 }
 0x1e7   : > { %v3469_v24 = vpop.eup %3468  ;;  %3488 = vtanh.f32 %v912_v17 }
 0x1e8   : > { %v3471_v26 = vpop.eup %3470  ;;  %3490 = vtanh.f32 %v1373_v18 }
 0x1e9   : > { %v3473_v27 = vpop.eup %3472  ;;  %3492 = vtanh.f32 %v914_v20  ;;  %v1378_v28 = vpop.f32.mrb[8].mxu1 }
 0x1ea   : > { %v3475_v29 = vpop.eup %3474  ;;  %3494 = vtanh.f32 %v1375_v23  ;;  %v1379_v30 = vadd.f32 %v1378_v28, %v4654_v36  ;;  %v919_v31 = vpop.f32.mrb[124].mxu0 }
 0x1eb   : > { %v1380_v32 = vpop.f32.mrb[9].mxu1  ;;  %v3477_v33 = vpop.eup %3476  ;;  %3496 = vtanh.f32 %v916_v25  ;;  %v920_v34 = vadd.f32 %v919_v31, %v4413_v61  ;;  %v1805_v40 = vpack.c.bf16 %v3475_v29, %v3467_v22 }
 0x1ec   : > { %v1381_v35 = vadd.f32 %v1380_v32, %v4657_v38  ;;  %v921_v37 = vpop.f32.mrb[125].mxu0  ;;  %v1382_v39 = vpop.f32.mrb[10].mxu1  ;;  %3498 = vtanh.f32 %v1379_v30  ;;  %v1114_v46 = vpack.c.bf16 %v3477_v33, %v3469_v24 }
 0x1ed   : > { %v3479_v41 = vpop.eup %3478  ;;  %v922_v42 = vadd.f32 %v921_v37, %v4422_v0  ;;  %v1383_v43 = vadd.f32 %v1382_v39, %v4654_v36  ;;  %v923_v44 = vpop.f32.mrb[126].mxu0  ;;  %3500 = vtanh.f32 %v920_v34 }
 0x1ee   : > { %v1384_v45 = vpop.f32.mrb[11].mxu1  ;;  %v3481_v47 = vpop.eup %3480  ;;  %v924_v48 = vadd.f32 %v923_v44, %v4413_v61  ;;  %v1806_v49 = vpack.c.bf16 %v3479_v41, %v3471_v26  ;;  %3502 = vtanh.f32 %v1381_v35 }
 0x1ef   : > { %v925_v50 = vpop.f32.mrb[127].mxu0  ;;  %v3483_v51 = vpop.eup %3482  ;;  %v1385_v52 = vadd.f32 %v1384_v45, %v4657_v38  ;;  %v1115_v55 = vpack.c.bf16 %v3481_v47, %v3473_v27  ;;  %3504 = vtanh.f32 %v922_v42 }
 0x1f0   : > { %v3485_v56 = vpop.eup %3484  ;;  %2105 = vmatprep.mubr.bf16.mxu0 %v1806_v49  ;;  %v926_v57 = vadd.f32 %v925_v50, %v4422_v0  ;;  %3506 = vtanh.f32 %v1383_v43 }
 0x1f1   : > { %v3487_v59 = vpop.eup %3486  ;;  %1646 = vmatprep.mubr.bf16.mxu1 %v1115_v55  ;;  %2106 = vmatmul.mubr.bf16.vlgmr.msra.gmra.mrb[128].mxu0 %v1805_v40  ;;  %3508 = vtanh.f32 %v924_v48  ;;  %v1388_v61 = vpop.f32.mrb[12].mxu1 }
 0x1f2   : > { %v3489_v62 = vpop.eup %3488  ;;  %1647 = vmatmul.mubr.bf16.gmra.mrb[116].mxu1 %v1114_v46  ;;  %3510 = vtanh.f32 %v1385_v52  ;;  %v1389_v1 = vadd.f32 %v1388_v61, %v4654_v36  ;;  %v1390_v2 = vpop.f32.mrb[13].mxu1 }
 0x1f3   : > { %v3491_v63 = vpop.eup %3490  ;;  %3512 = vtanh.f32 %v926_v57  ;;  %v1391_v5 = vadd.f32 %v1390_v2, %v4657_v38  ;;  %v1392_v6 = vpop.f32.mrb[14].mxu1 }
 0x1f4   : > { %v3493_v3 = vpop.eup %3492  ;;  %v1807_v7 = vpack.c.bf16 %v3491_v63, %v3483_v51  ;;  %3514 = vtanh.f32 %v1389_v1  ;;  %v1393_v8 = vadd.f32 %v1392_v6, %v4654_v36  ;;  %v1394_v9 = vpop.f32.mrb[15].mxu1 }
 0x1f5   : > { %v3495_v0 = vpop.eup %3494  ;;  %v1116_v10 = vpack.c.bf16 %v3493_v3, %v3485_v56  ;;  %3516 = vtanh.f32 %v1391_v5  ;;  %v1395_v12 = vadd.f32 %v1394_v9, %v4657_v38 }
 0x1f6   : > { %v3497_v11 = vpop.eup %3496  ;;  %v1808_v13 = vpack.c.bf16 %v3495_v0, %v3487_v59  ;;  %3518 = vtanh.f32 %v1393_v8 }
 0x1f7   : > { %v3499_v14 = vpop.eup %3498  ;;  %v1117_v15 = vpack.c.bf16 %v3497_v11, %v3489_v62  ;;  %3520 = vtanh.f32 %v1395_v12 }
 0x1f8   : > { %v3501_v16 = vpop.eup %3500  ;;  %2115 = vmatprep.mubr.bf16.mxu0 %v1808_v13 }
 0x1f9   : > { %v3503_v17 = vpop.eup %3502  ;;  %1656 = vmatprep.mubr.bf16.mxu1 %v1117_v15  ;;  %2116 = vmatmul.mubr.bf16.gmra.mrb[132].mxu0 %v1807_v7  ;;  %v1398_v19 = vpop.f32.mrb[16].mxu1 }
 0x1fa   : > { %v3505_v18 = vpop.eup %3504  ;;  %1657 = vmatmul.mubr.bf16.gmra.mrb[120].mxu1 %v1116_v10  ;;  %v1399_v20 = vadd.f32 %v1398_v19, %v4654_v36  ;;  %v1400_v21 = vpop.f32.mrb[17].mxu1 }
 0x1fb   : > { %v3507_v4 = vpop.eup %3506  ;;  %v1401_v23 = vadd.f32 %v1400_v21, %v4657_v38  ;;  %v1402_v24 = vpop.f32.mrb[18].mxu1 }
 0x1fc   : > { %v3509_v22 = vpop.eup %3508  ;;  %v1809_v25 = vpack.c.bf16 %v3507_v4, %v3499_v14  ;;  %3522 = vtanh.f32 %v1399_v20  ;;  %v1403_v27 = vadd.f32 %v1402_v24, %v4654_v36  ;;  %v1404_v28 = vpop.f32.mrb[19].mxu1 }
 0x1fd   : > { %v3511_v26 = vpop.eup %3510  ;;  %v1118_v29 = vpack.c.bf16 %v3509_v22, %v3501_v16  ;;  %3524 = vtanh.f32 %v1401_v23  ;;  %v1405_v31 = vadd.f32 %v1404_v28, %v4657_v38 }
 0x1fe   : > { %v3513_v30 = vpop.eup %3512  ;;  %v1810_v32 = vpack.c.bf16 %v3511_v26, %v3503_v17  ;;  %3526 = vtanh.f32 %v1403_v27 }
 0x1ff   : > { %v3515_v33 = vpop.eup %3514  ;;  %v1119_v34 = vpack.c.bf16 %v3513_v30, %v3505_v18  ;;  %3528 = vtanh.f32 %v1405_v31 }
 0x200   : > { %v3517_v35 = vpop.eup %3516  ;;  %2125 = vmatprep.mubr.bf16.mxu0 %v1810_v32 }
 0x201   : > { %v3519_v37 = vpop.eup %3518  ;;  %1666 = vmatprep.mubr.bf16.mxu1 %v1119_v34  ;;  %2126 = vmatmul.mubr.bf16.gmra.mrb[136].mxu0 %v1809_v25  ;;  %v1408_v40 = vpop.f32.mrb[20].mxu1 }
 0x202   : > { %v3521_v39 = vpop.eup %3520  ;;  %1667 = vmatmul.mubr.bf16.gmra.mrb[124].mxu1 %v1118_v29  ;;  %v1811_v41 = vpack.c.bf16 %v3519_v37, %v3515_v33  ;;  %v1409_v42 = vadd.f32 %v1408_v40, %v4654_v36  ;;  %v1410_v43 = vpop.f32.mrb[21].mxu1 }
 0x203   : > { %v1812_v44 = vpack.c.bf16 %v3521_v39, %v3517_v35  ;;  %v1411_v45 = vadd.f32 %v1410_v43, %v4657_v38  ;;  %v1412_v46 = vpop.f32.mrb[22].mxu1 }
 0x204   : > { %3530 = vtanh.f32 %v1409_v42  ;;  %v1413_v47 = vadd.f32 %v1412_v46, %v4654_v36  ;;  %v1414_v48 = vpop.f32.mrb[23].mxu1 }
 0x205   : > { %2135 = vmatprep.mubr.bf16.mxu0 %v1812_v44  ;;  %3532 = vtanh.f32 %v1411_v45  ;;  %v1415_v49 = vadd.f32 %v1414_v48, %v4657_v38 }
 0x206   : > { %v3523_v50 = vpop.eup %3522  ;;  %3534 = vtanh.f32 %v1413_v47 }
 0x207   : > { %v3525_v51 = vpop.eup %3524  ;;  %3536 = vtanh.f32 %v1415_v49 }
 0x208   : > { %v3527_v52 = vpop.eup %3526 }
 0x209   : > { %2136 = vmatmul.mubr.bf16.gmra.mrb[140].mxu0 %v1811_v41  ;;  %v3529_v55 = vpop.eup %3528  ;;  %v1418_v56 = vpop.f32.mrb[24].mxu1  ;;  %v1813_v57 = vpack.c.bf16 %v3527_v52, %v3523_v50 }
 0x20a   : > { %v1419_v59 = vadd.f32 %v1418_v56, %v4654_v36  ;;  %v1420_v62 = vpop.f32.mrb[25].mxu1  ;;  %v1814_v61 = vpack.c.bf16 %v3529_v55, %v3525_v51 }
 0x20b   : > { %v1421_v63 = vadd.f32 %v1420_v62, %v4657_v38  ;;  %v1422_v1 = vpop.f32.mrb[26].mxu1 }
 0x20c   : > { %3538 = vtanh.f32 %v1419_v59  ;;  %v1423_v2 = vadd.f32 %v1422_v1, %v4654_v36  ;;  %v1424_v3 = vpop.f32.mrb[27].mxu1  ;;  %2145 = vmatprep.mubr.bf16.mxu0 %v1814_v61 }
 0x20d   : > { %3540 = vtanh.f32 %v1421_v63  ;;  %v1425_v5 = vadd.f32 %v1424_v3, %v4657_v38 }
 0x20e   : > { %v3531_v6 = vpop.eup %3530  ;;  %3542 = vtanh.f32 %v1423_v2 }
 0x20f   : > { %v3533_v7 = vpop.eup %3532  ;;  %3544 = vtanh.f32 %v1425_v5 }
 0x210   : > { %v3535_v0 = vpop.eup %3534 }
 0x211   : > { %2146 = vmatmul.mubr.bf16.gmra.mrb[144].mxu0 %v1813_v57  ;;  %v3537_v8 = vpop.eup %3536  ;;  %v1428_v9 = vpop.f32.mrb[28].mxu1  ;;  %v1815_v10 = vpack.c.bf16 %v3535_v0, %v3531_v6 }
 0x212   : > { %v1429_v11 = vadd.f32 %v1428_v9, %v4654_v36  ;;  %v1430_v12 = vpop.f32.mrb[29].mxu1  ;;  %v1816_v13 = vpack.c.bf16 %v3537_v8, %v3533_v7 }
 0x213   : > { %v1431_v14 = vadd.f32 %v1430_v12, %v4657_v38  ;;  %v1432_v15 = vpop.f32.mrb[30].mxu1 }
 0x214   : > { %3546 = vtanh.f32 %v1429_v11  ;;  %v1433_v16 = vadd.f32 %v1432_v15, %v4654_v36  ;;  %v1434_v17 = vpop.f32.mrb[31].mxu1  ;;  %2155 = vmatprep.mubr.bf16.mxu0 %v1816_v13 }
 0x215   : > { %3548 = vtanh.f32 %v1431_v14  ;;  %v1435_v18 = vadd.f32 %v1434_v17, %v4657_v38 }
 0x216   : > { %v3539_v19 = vpop.eup %3538  ;;  %3550 = vtanh.f32 %v1433_v16 }
 0x217   : > { %v3541_v4 = vpop.eup %3540  ;;  %3552 = vtanh.f32 %v1435_v18 }
 0x218   : > { %v3543_v20 = vpop.eup %3542 }
 0x219   : > { %2156 = vmatmul.mubr.bf16.gmra.mrb[148].mxu0 %v1815_v10  ;;  %v3545_v21 = vpop.eup %3544  ;;  %v1438_v22 = vpop.f32.mrb[32].mxu1  ;;  %v1817_v23 = vpack.c.bf16 %v3543_v20, %v3539_v19 }
 0x21a   : > { %v1439_v24 = vadd.f32 %v1438_v22, %v4654_v36  ;;  %v1440_v25 = vpop.f32.mrb[33].mxu1  ;;  %v1818_v26 = vpack.c.bf16 %v3545_v21, %v3541_v4 }
 0x21b   : > { %v1441_v27 = vadd.f32 %v1440_v25, %v4657_v38  ;;  %v1442_v28 = vpop.f32.mrb[34].mxu1 }
 0x21c   : > { %3554 = vtanh.f32 %v1439_v24  ;;  %v1443_v29 = vadd.f32 %v1442_v28, %v4654_v36  ;;  %v1444_v30 = vpop.f32.mrb[35].mxu1  ;;  %2165 = vmatprep.mubr.bf16.mxu0 %v1818_v26 }
 0x21d   : > { %3556 = vtanh.f32 %v1441_v27  ;;  %v1445_v31 = vadd.f32 %v1444_v30, %v4657_v38 }
 0x21e   : > { %v3547_v32 = vpop.eup %3546  ;;  %3558 = vtanh.f32 %v1443_v29 }
 0x21f   : > { %v3549_v33 = vpop.eup %3548  ;;  %3560 = vtanh.f32 %v1445_v31 }
 0x220   : > { %v3551_v34 = vpop.eup %3550 }
 0x221   : > { %2166 = vmatmul.mubr.bf16.gmra.mrb[152].mxu0 %v1817_v23  ;;  %v3553_v35 = vpop.eup %3552  ;;  %v1448_v37 = vpop.f32.mrb[36].mxu1  ;;  %v1819_v39 = vpack.c.bf16 %v3551_v34, %v3547_v32 }
 0x222   : > { %v1449_v40 = vadd.f32 %v1448_v37, %v4654_v36  ;;  %v1450_v41 = vpop.f32.mrb[37].mxu1  ;;  %v1820_v42 = vpack.c.bf16 %v3553_v35, %v3549_v33 }
 0x223   : > { %v1451_v43 = vadd.f32 %v1450_v41, %v4657_v38  ;;  %v1452_v44 = vpop.f32.mrb[38].mxu1 }
 0x224   : > { %3562 = vtanh.f32 %v1449_v40  ;;  %v1453_v45 = vadd.f32 %v1452_v44, %v4654_v36  ;;  %v1454_v46 = vpop.f32.mrb[39].mxu1  ;;  %2175 = vmatprep.mubr.bf16.mxu0 %v1820_v42 }
 0x225   : > { %3564 = vtanh.f32 %v1451_v43  ;;  %v1455_v47 = vadd.f32 %v1454_v46, %v4657_v38 }
 0x226   : > { %v3555_v48 = vpop.eup %3554  ;;  %3566 = vtanh.f32 %v1453_v45 }
 0x227   : > { %v3557_v49 = vpop.eup %3556  ;;  %3568 = vtanh.f32 %v1455_v47 }
 0x228   : > { %v3559_v50 = vpop.eup %3558 }
 0x229   : > { %2176 = vmatmul.mubr.bf16.gmra.mrb[156].mxu0 %v1819_v39  ;;  %v3561_v51 = vpop.eup %3560  ;;  %v1458_v52 = vpop.f32.mrb[40].mxu1  ;;  %v1821_v55 = vpack.c.bf16 %v3559_v50, %v3555_v48 }
 0x22a   : > { %v1459_v56 = vadd.f32 %v1458_v52, %v4654_v36  ;;  %v1460_v57 = vpop.f32.mrb[41].mxu1  ;;  %v1822_v59 = vpack.c.bf16 %v3561_v51, %v3557_v49 }
 0x22b   : > { %v1461_v62 = vadd.f32 %v1460_v57, %v4657_v38  ;;  %v1462_v61 = vpop.f32.mrb[42].mxu1 }
 0x22c   : > { %3570 = vtanh.f32 %v1459_v56  ;;  %v1463_v63 = vadd.f32 %v1462_v61, %v4654_v36  ;;  %v1464_v1 = vpop.f32.mrb[43].mxu1  ;;  %2185 = vmatprep.mubr.bf16.mxu0 %v1822_v59 }
 0x22d   : > { %3572 = vtanh.f32 %v1461_v62  ;;  %v1465_v2 = vadd.f32 %v1464_v1, %v4657_v38 }
 0x22e   : > { %v3563_v3 = vpop.eup %3562  ;;  %3574 = vtanh.f32 %v1463_v63 }
 0x22f   : > { %v3565_v5 = vpop.eup %3564  ;;  %3576 = vtanh.f32 %v1465_v2 }
 0x230   : > { %v3567_v6 = vpop.eup %3566 }
 0x231   : > { %2186 = vmatmul.mubr.bf16.gmra.mrb[160].mxu0 %v1821_v55  ;;  %v3569_v7 = vpop.eup %3568  ;;  %v1468_v0 = vpop.f32.mrb[44].mxu1  ;;  %v1823_v8 = vpack.c.bf16 %v3567_v6, %v3563_v3 }
 0x232   : > { %v1469_v9 = vadd.f32 %v1468_v0, %v4654_v36  ;;  %v1470_v10 = vpop.f32.mrb[45].mxu1  ;;  %v1824_v11 = vpack.c.bf16 %v3569_v7, %v3565_v5 }
 0x233   : > { %v1471_v12 = vadd.f32 %v1470_v10, %v4657_v38  ;;  %v1472_v13 = vpop.f32.mrb[46].mxu1 }
 0x234   : > { %3578 = vtanh.f32 %v1469_v9  ;;  %v1473_v14 = vadd.f32 %v1472_v13, %v4654_v36  ;;  %v1474_v15 = vpop.f32.mrb[47].mxu1  ;;  %2195 = vmatprep.mubr.bf16.mxu0 %v1824_v11 }
 0x235   : > { %3580 = vtanh.f32 %v1471_v12  ;;  %v1475_v16 = vadd.f32 %v1474_v15, %v4657_v38 }
 0x236   : > { %v3571_v17 = vpop.eup %3570  ;;  %3582 = vtanh.f32 %v1473_v14 }
 0x237   : > { %v3573_v18 = vpop.eup %3572  ;;  %3584 = vtanh.f32 %v1475_v16 }
 0x238   : > { %v3575_v19 = vpop.eup %3574 }
 0x239   : > { %2196 = vmatmul.mubr.bf16.gmra.mrb[164].mxu0 %v1823_v8  ;;  %v3577_v4 = vpop.eup %3576  ;;  %v1478_v20 = vpop.f32.mrb[48].mxu1  ;;  %v1825_v21 = vpack.c.bf16 %v3575_v19, %v3571_v17 }
 0x23a   : > { %v1479_v22 = vadd.f32 %v1478_v20, %v4654_v36  ;;  %v1480_v23 = vpop.f32.mrb[49].mxu1  ;;  %v1826_v24 = vpack.c.bf16 %v3577_v4, %v3573_v18 }
 0x23b   : > { %v1481_v25 = vadd.f32 %v1480_v23, %v4657_v38  ;;  %v1482_v26 = vpop.f32.mrb[50].mxu1 }
 0x23c   : > { %3586 = vtanh.f32 %v1479_v22  ;;  %v1483_v27 = vadd.f32 %v1482_v26, %v4654_v36  ;;  %v1484_v28 = vpop.f32.mrb[51].mxu1  ;;  %2205 = vmatprep.mubr.bf16.mxu0 %v1826_v24 }
 0x23d   : > { %3588 = vtanh.f32 %v1481_v25  ;;  %v1485_v29 = vadd.f32 %v1484_v28, %v4657_v38 }
 0x23e   : > { %v3579_v30 = vpop.eup %3578  ;;  %3590 = vtanh.f32 %v1483_v27 }
 0x23f   : > { %v3581_v31 = vpop.eup %3580  ;;  %3592 = vtanh.f32 %v1485_v29 }
 0x240   : > { %v3583_v32 = vpop.eup %3582 }
 0x241   : > { %2206 = vmatmul.mubr.bf16.gmra.mrb[168].mxu0 %v1825_v21  ;;  %v3585_v33 = vpop.eup %3584  ;;  %v1488_v34 = vpop.f32.mrb[52].mxu1  ;;  %v1827_v35 = vpack.c.bf16 %v3583_v32, %v3579_v30 }
 0x242   : > { %v1489_v37 = vadd.f32 %v1488_v34, %v4654_v36  ;;  %v1490_v39 = vpop.f32.mrb[53].mxu1  ;;  %v1828_v40 = vpack.c.bf16 %v3585_v33, %v3581_v31 }
 0x243   : > { %v1491_v41 = vadd.f32 %v1490_v39, %v4657_v38  ;;  %v1492_v42 = vpop.f32.mrb[54].mxu1 }
 0x244   : > { %3594 = vtanh.f32 %v1489_v37  ;;  %v1493_v43 = vadd.f32 %v1492_v42, %v4654_v36  ;;  %v1494_v44 = vpop.f32.mrb[55].mxu1  ;;  %2215 = vmatprep.mubr.bf16.mxu0 %v1828_v40 }
 0x245   : > { %3596 = vtanh.f32 %v1491_v41  ;;  %v1495_v45 = vadd.f32 %v1494_v44, %v4657_v38 }
 0x246   : > { %v3587_v46 = vpop.eup %3586  ;;  %3598 = vtanh.f32 %v1493_v43 }
 0x247   : > { %v3589_v47 = vpop.eup %3588  ;;  %3600 = vtanh.f32 %v1495_v45 }
 0x248   : > { %v3591_v48 = vpop.eup %3590 }
 0x249   : > { %2216 = vmatmul.mubr.bf16.gmra.mrb[172].mxu0 %v1827_v35  ;;  %v3593_v49 = vpop.eup %3592  ;;  %v1498_v50 = vpop.f32.mrb[56].mxu1  ;;  %v1829_v51 = vpack.c.bf16 %v3591_v48, %v3587_v46 }
 0x24a   : > { %v1499_v52 = vadd.f32 %v1498_v50, %v4654_v36  ;;  %v1500_v55 = vpop.f32.mrb[57].mxu1  ;;  %v1830_v56 = vpack.c.bf16 %v3593_v49, %v3589_v47 }
 0x24b   : > { %v1501_v57 = vadd.f32 %v1500_v55, %v4657_v38  ;;  %v1502_v59 = vpop.f32.mrb[58].mxu1 }
 0x24c   : > { %3602 = vtanh.f32 %v1499_v52  ;;  %v1503_v62 = vadd.f32 %v1502_v59, %v4654_v36  ;;  %v1504_v61 = vpop.f32.mrb[59].mxu1  ;;  %2225 = vmatprep.mubr.bf16.mxu0 %v1830_v56 }
 0x24d   : > { %3604 = vtanh.f32 %v1501_v57  ;;  %v1505_v63 = vadd.f32 %v1504_v61, %v4657_v38 }
 0x24e   : > { %v3595_v1 = vpop.eup %3594  ;;  %3606 = vtanh.f32 %v1503_v62 }
 0x24f   : > { %v3597_v2 = vpop.eup %3596  ;;  %3608 = vtanh.f32 %v1505_v63 }
 0x250   : > { %v3599_v3 = vpop.eup %3598 }
 0x251   : > { %2226 = vmatmul.mubr.bf16.gmra.mrb[176].mxu0 %v1829_v51  ;;  %v3601_v5 = vpop.eup %3600  ;;  %v1508_v6 = vpop.f32.mrb[60].mxu1  ;;  %v1831_v7 = vpack.c.bf16 %v3599_v3, %v3595_v1 }
 0x252   : > { %v1509_v0 = vadd.f32 %v1508_v6, %v4654_v36  ;;  %v1510_v8 = vpop.f32.mrb[61].mxu1  ;;  %v1832_v9 = vpack.c.bf16 %v3601_v5, %v3597_v2 }
 0x253   : > { %v1511_v10 = vadd.f32 %v1510_v8, %v4657_v38  ;;  %v1512_v11 = vpop.f32.mrb[62].mxu1 }
 0x254   : > { %3610 = vtanh.f32 %v1509_v0  ;;  %v1513_v12 = vadd.f32 %v1512_v11, %v4654_v36  ;;  %v1514_v13 = vpop.f32.mrb[63].mxu1  ;;  %2235 = vmatprep.mubr.bf16.mxu0 %v1832_v9 }
 0x255   : > { %3612 = vtanh.f32 %v1511_v10  ;;  %v1515_v14 = vadd.f32 %v1514_v13, %v4657_v38 }
 0x256   : > { %v3603_v15 = vpop.eup %3602  ;;  %3614 = vtanh.f32 %v1513_v12 }
 0x257   : > { %v3605_v16 = vpop.eup %3604  ;;  %3616 = vtanh.f32 %v1515_v14 }
 0x258   : > { %v3607_v17 = vpop.eup %3606 }
 0x259   : > { %2236 = vmatmul.mubr.bf16.gmra.mrb[180].mxu0 %v1831_v7  ;;  %v3609_v18 = vpop.eup %3608  ;;  %v1518_v19 = vpop.f32.mrb[64].mxu1  ;;  %v1833_v4 = vpack.c.bf16 %v3607_v17, %v3603_v15 }
 0x25a   : > { %v1519_v20 = vadd.f32 %v1518_v19, %v4654_v36  ;;  %v1520_v21 = vpop.f32.mrb[65].mxu1  ;;  %v1834_v22 = vpack.c.bf16 %v3609_v18, %v3605_v16 }
 0x25b   : > { %v1521_v23 = vadd.f32 %v1520_v21, %v4657_v38  ;;  %v1522_v24 = vpop.f32.mrb[66].mxu1 }
 0x25c   : > { %3618 = vtanh.f32 %v1519_v20  ;;  %v1523_v25 = vadd.f32 %v1522_v24, %v4654_v36  ;;  %v1524_v26 = vpop.f32.mrb[67].mxu1  ;;  %2245 = vmatprep.mubr.bf16.mxu0 %v1834_v22 }
 0x25d   : > { %3620 = vtanh.f32 %v1521_v23  ;;  %v1525_v27 = vadd.f32 %v1524_v26, %v4657_v38 }
 0x25e   : > { %v3611_v28 = vpop.eup %3610  ;;  %3622 = vtanh.f32 %v1523_v25 }
 0x25f   : > { %v3613_v29 = vpop.eup %3612  ;;  %3624 = vtanh.f32 %v1525_v27 }
 0x260   : > { %v3615_v30 = vpop.eup %3614 }
 0x261   : > { %2246 = vmatmul.mubr.bf16.gmra.mrb[184].mxu0 %v1833_v4  ;;  %v3617_v31 = vpop.eup %3616  ;;  %v1528_v32 = vpop.f32.mrb[68].mxu1  ;;  %v1835_v33 = vpack.c.bf16 %v3615_v30, %v3611_v28 }
 0x262   : > { %v1529_v34 = vadd.f32 %v1528_v32, %v4654_v36  ;;  %v1530_v35 = vpop.f32.mrb[69].mxu1  ;;  %v1836_v37 = vpack.c.bf16 %v3617_v31, %v3613_v29 }
 0x263   : > { %v1531_v39 = vadd.f32 %v1530_v35, %v4657_v38  ;;  %v1532_v40 = vpop.f32.mrb[70].mxu1 }
 0x264   : > { %3626 = vtanh.f32 %v1529_v34  ;;  %v1533_v41 = vadd.f32 %v1532_v40, %v4654_v36  ;;  %v1534_v42 = vpop.f32.mrb[71].mxu1  ;;  %2255 = vmatprep.mubr.bf16.mxu0 %v1836_v37 }
 0x265   : > { %3628 = vtanh.f32 %v1531_v39  ;;  %v1535_v43 = vadd.f32 %v1534_v42, %v4657_v38 }
 0x266   : > { %v3619_v44 = vpop.eup %3618  ;;  %3630 = vtanh.f32 %v1533_v41 }
 0x267   : > { %v3621_v45 = vpop.eup %3620  ;;  %3632 = vtanh.f32 %v1535_v43 }
 0x268   : > { %v3623_v46 = vpop.eup %3622 }
 0x269   : > { %2256 = vmatmul.mubr.bf16.gmra.mrb[188].mxu0 %v1835_v33  ;;  %v3625_v47 = vpop.eup %3624  ;;  %v1538_v48 = vpop.f32.mrb[72].mxu1  ;;  %v1837_v49 = vpack.c.bf16 %v3623_v46, %v3619_v44 }
 0x26a   : > { %v1539_v50 = vadd.f32 %v1538_v48, %v4654_v36  ;;  %v1540_v51 = vpop.f32.mrb[73].mxu1  ;;  %v1838_v52 = vpack.c.bf16 %v3625_v47, %v3621_v45 }
 0x26b   : > { %v1541_v55 = vadd.f32 %v1540_v51, %v4657_v38  ;;  %v1542_v56 = vpop.f32.mrb[74].mxu1 }
 0x26c   : > { %3634 = vtanh.f32 %v1539_v50  ;;  %v1543_v57 = vadd.f32 %v1542_v56, %v4654_v36  ;;  %v1544_v59 = vpop.f32.mrb[75].mxu1  ;;  %2265 = vmatprep.mubr.bf16.mxu0 %v1838_v52 }
 0x26d   : > { %3636 = vtanh.f32 %v1541_v55  ;;  %v1545_v62 = vadd.f32 %v1544_v59, %v4657_v38 }
 0x26e   : > { %v3627_v61 = vpop.eup %3626  ;;  %3638 = vtanh.f32 %v1543_v57 }
 0x26f   : > { %v3629_v63 = vpop.eup %3628  ;;  %3640 = vtanh.f32 %v1545_v62 }
 0x270   : > { %v3631_v1 = vpop.eup %3630 }
 0x271   : > { %2266 = vmatmul.mubr.bf16.gmra.mrb[192].mxu0 %v1837_v49  ;;  %v3633_v2 = vpop.eup %3632  ;;  %v1548_v3 = vpop.f32.mrb[76].mxu1  ;;  %v1839_v5 = vpack.c.bf16 %v3631_v1, %v3627_v61 }
 0x272   : > { %v1549_v6 = vadd.f32 %v1548_v3, %v4654_v36  ;;  %v1550_v7 = vpop.f32.mrb[77].mxu1  ;;  %v1840_v0 = vpack.c.bf16 %v3633_v2, %v3629_v63 }
 0x273   : > { %v1551_v8 = vadd.f32 %v1550_v7, %v4657_v38  ;;  %v1552_v9 = vpop.f32.mrb[78].mxu1 }
 0x274   : > { %3642 = vtanh.f32 %v1549_v6  ;;  %v1553_v10 = vadd.f32 %v1552_v9, %v4654_v36  ;;  %v1554_v11 = vpop.f32.mrb[79].mxu1  ;;  %2275 = vmatprep.mubr.bf16.mxu0 %v1840_v0 }
 0x275   : > { %3644 = vtanh.f32 %v1551_v8  ;;  %v1555_v12 = vadd.f32 %v1554_v11, %v4657_v38 }
 0x276   : > { %v3635_v13 = vpop.eup %3634  ;;  %3646 = vtanh.f32 %v1553_v10 }
 0x277   : > { %v3637_v14 = vpop.eup %3636  ;;  %3648 = vtanh.f32 %v1555_v12 }
 0x278   : > { %v3639_v15 = vpop.eup %3638 }
 0x279   : > { %2276 = vmatmul.mubr.bf16.gmra.mrb[196].mxu0 %v1839_v5  ;;  %v3641_v16 = vpop.eup %3640  ;;  %v1558_v17 = vpop.f32.mrb[80].mxu1  ;;  %v1841_v18 = vpack.c.bf16 %v3639_v15, %v3635_v13 }
 0x27a   : > { %v1559_v19 = vadd.f32 %v1558_v17, %v4654_v36  ;;  %v1560_v4 = vpop.f32.mrb[81].mxu1  ;;  %v1842_v20 = vpack.c.bf16 %v3641_v16, %v3637_v14 }
 0x27b   : > { %v1561_v21 = vadd.f32 %v1560_v4, %v4657_v38  ;;  %v1562_v22 = vpop.f32.mrb[82].mxu1 }
 0x27c   : > { %3650 = vtanh.f32 %v1559_v19  ;;  %v1563_v23 = vadd.f32 %v1562_v22, %v4654_v36  ;;  %v1564_v24 = vpop.f32.mrb[83].mxu1  ;;  %2285 = vmatprep.mubr.bf16.mxu0 %v1842_v20 }
 0x27d   : > { %3652 = vtanh.f32 %v1561_v21  ;;  %v1565_v25 = vadd.f32 %v1564_v24, %v4657_v38 }
 0x27e   : > { %v3643_v26 = vpop.eup %3642  ;;  %3654 = vtanh.f32 %v1563_v23 }
 0x27f   : > { %v3645_v27 = vpop.eup %3644  ;;  %3656 = vtanh.f32 %v1565_v25 }
 0x280   : > { %v3647_v28 = vpop.eup %3646 }
 0x281   : > { %2286 = vmatmul.mubr.bf16.gmra.mrb[200].mxu0 %v1841_v18  ;;  %v3649_v29 = vpop.eup %3648  ;;  %v1568_v30 = vpop.f32.mrb[84].mxu1  ;;  %v1843_v31 = vpack.c.bf16 %v3647_v28, %v3643_v26 }
 0x282   : > { %v1569_v32 = vadd.f32 %v1568_v30, %v4654_v36  ;;  %v1570_v33 = vpop.f32.mrb[85].mxu1  ;;  %v1844_v34 = vpack.c.bf16 %v3649_v29, %v3645_v27 }
 0x283   : > { %v1571_v35 = vadd.f32 %v1570_v33, %v4657_v38  ;;  %v1572_v37 = vpop.f32.mrb[86].mxu1 }
 0x284   : > { %3658 = vtanh.f32 %v1569_v32  ;;  %v1573_v39 = vadd.f32 %v1572_v37, %v4654_v36  ;;  %v1574_v40 = vpop.f32.mrb[87].mxu1  ;;  %2295 = vmatprep.mubr.bf16.mxu0 %v1844_v34 }
 0x285   : > { %3660 = vtanh.f32 %v1571_v35  ;;  %v1575_v41 = vadd.f32 %v1574_v40, %v4657_v38 }
 0x286   : > { %v3651_v42 = vpop.eup %3650  ;;  %3662 = vtanh.f32 %v1573_v39 }
 0x287   : > { %v3653_v43 = vpop.eup %3652  ;;  %3664 = vtanh.f32 %v1575_v41 }
 0x288   : > { %v3655_v44 = vpop.eup %3654 }
 0x289   : > { %2296 = vmatmul.mubr.bf16.gmra.mrb[204].mxu0 %v1843_v31  ;;  %v3657_v45 = vpop.eup %3656  ;;  %v1578_v46 = vpop.f32.mrb[88].mxu1  ;;  %v1845_v47 = vpack.c.bf16 %v3655_v44, %v3651_v42 }
 0x28a   : > { %v1579_v48 = vadd.f32 %v1578_v46, %v4654_v36  ;;  %v1580_v49 = vpop.f32.mrb[89].mxu1  ;;  %v1846_v50 = vpack.c.bf16 %v3657_v45, %v3653_v43 }
 0x28b   : > { %v1581_v51 = vadd.f32 %v1580_v49, %v4657_v38  ;;  %v1582_v52 = vpop.f32.mrb[90].mxu1 }
 0x28c   : > { %3666 = vtanh.f32 %v1579_v48  ;;  %v1583_v55 = vadd.f32 %v1582_v52, %v4654_v36  ;;  %v1584_v56 = vpop.f32.mrb[91].mxu1  ;;  %2305 = vmatprep.mubr.bf16.mxu0 %v1846_v50 }
 0x28d   : > { %3668 = vtanh.f32 %v1581_v51  ;;  %v1585_v57 = vadd.f32 %v1584_v56, %v4657_v38 }
 0x28e   : > { %v3659_v59 = vpop.eup %3658  ;;  %3670 = vtanh.f32 %v1583_v55 }
 0x28f   : > { %v3661_v62 = vpop.eup %3660  ;;  %3672 = vtanh.f32 %v1585_v57 }
 0x290   : > { %v3663_v61 = vpop.eup %3662 }
 0x291   : > { %2306 = vmatmul.mubr.bf16.gmra.mrb[208].mxu0 %v1845_v47  ;;  %v3665_v63 = vpop.eup %3664  ;;  %v1588_v1 = vpop.f32.mrb[92].mxu1  ;;  %v1847_v2 = vpack.c.bf16 %v3663_v61, %v3659_v59 }
 0x292   : > { %v1589_v3 = vadd.f32 %v1588_v1, %v4654_v36  ;;  %v1590_v5 = vpop.f32.mrb[93].mxu1  ;;  %v1848_v6 = vpack.c.bf16 %v3665_v63, %v3661_v62 }
 0x293   : > { %v1591_v7 = vadd.f32 %v1590_v5, %v4657_v38  ;;  %v1592_v0 = vpop.f32.mrb[94].mxu1 }
 0x294   : > { %3674 = vtanh.f32 %v1589_v3  ;;  %v1593_v8 = vadd.f32 %v1592_v0, %v4654_v36  ;;  %v1594_v9 = vpop.f32.mrb[95].mxu1  ;;  %2315 = vmatprep.mubr.bf16.mxu0 %v1848_v6 }
 0x295   : > { %3676 = vtanh.f32 %v1591_v7  ;;  %v1595_v10 = vadd.f32 %v1594_v9, %v4657_v38 }
 0x296   : > { %v3667_v11 = vpop.eup %3666  ;;  %3678 = vtanh.f32 %v1593_v8 }
 0x297   : > { %v3669_v12 = vpop.eup %3668  ;;  %3680 = vtanh.f32 %v1595_v10 }
 0x298   : > { %v3671_v13 = vpop.eup %3670 }
 0x299   : > { %2316 = vmatmul.mubr.bf16.gmra.mrb[212].mxu0 %v1847_v2  ;;  %v3673_v14 = vpop.eup %3672  ;;  %v1598_v15 = vpop.f32.mrb[96].mxu1  ;;  %v1849_v16 = vpack.c.bf16 %v3671_v13, %v3667_v11 }
 0x29a   : > { %v1599_v17 = vadd.f32 %v1598_v15, %v4654_v36  ;;  %v1600_v18 = vpop.f32.mrb[97].mxu1  ;;  %v1850_v19 = vpack.c.bf16 %v3673_v14, %v3669_v12 }
 0x29b   : > { %v1601_v4 = vadd.f32 %v1600_v18, %v4657_v38  ;;  %v1602_v20 = vpop.f32.mrb[98].mxu1 }
 0x29c   : > { %3682 = vtanh.f32 %v1599_v17  ;;  %v1603_v21 = vadd.f32 %v1602_v20, %v4654_v36  ;;  %v1604_v22 = vpop.f32.mrb[99].mxu1  ;;  %2325 = vmatprep.mubr.bf16.mxu0 %v1850_v19 }
 0x29d   : > { %3684 = vtanh.f32 %v1601_v4  ;;  %v1605_v23 = vadd.f32 %v1604_v22, %v4657_v38  ;;  %v1901_v22 = vld [vmem:[%s5009_s6] sm:$0x3] }
 0x29e   : > { %v3675_v24 = vpop.eup %3674  ;;  %3686 = vtanh.f32 %v1603_v21 }
 0x29f   : > { %v3677_v25 = vpop.eup %3676  ;;  %3688 = vtanh.f32 %v1605_v23 }
 0x2a0   : > { %v3679_v26 = vpop.eup %3678 }
 0x2a1   : > { %2326 = vmatmul.mubr.bf16.gmra.mrb[216].mxu0 %v1849_v16  ;;  %v3681_v27 = vpop.eup %3680  ;;  %v1608_v28 = vpop.f32.mrb[100].mxu1  ;;  %v1851_v29 = vpack.c.bf16 %v3679_v26, %v3675_v24  ;;  %v4791_v26 = vrot.slane %v1901_v22, %v4403_v58 }
 0x2a2   : > { %v1609_v30 = vadd.f32 %v1608_v28, %v4654_v36  ;;  %v1610_v31 = vpop.f32.mrb[101].mxu1  ;;  %v1852_v32 = vpack.c.bf16 %v3681_v27, %v3677_v25  ;;  %v4794_v28 = vrot.slane %v1901_v22, %v4409_v60 }
 0x2a3   : > { %v1611_v33 = vadd.f32 %v1610_v31, %v4657_v38  ;;  %v1612_v34 = vpop.f32.mrb[102].mxu1 }
 0x2a4   : > { %3690 = vtanh.f32 %v1609_v30  ;;  %v1613_v35 = vadd.f32 %v1612_v34, %v4654_v36  ;;  %v1614_v37 = vpop.f32.mrb[103].mxu1  ;;  %2335 = vmatprep.mubr.bf16.mxu0 %v1852_v32 }
 0x2a5   : > { %3692 = vtanh.f32 %v1611_v33  ;;  %v1615_v39 = vadd.f32 %v1614_v37, %v4657_v38 }
 0x2a6   : > { %v3683_v40 = vpop.eup %3682  ;;  %3694 = vtanh.f32 %v1613_v35 }
 0x2a7   : > { %v3685_v41 = vpop.eup %3684  ;;  %3696 = vtanh.f32 %v1615_v39 }
 0x2a8   : > { %v3687_v42 = vpop.eup %3686 }
 0x2a9   : > { %2336 = vmatmul.mubr.bf16.gmra.mrb[220].mxu0 %v1851_v29  ;;  %v3689_v43 = vpop.eup %3688  ;;  %v1618_v44 = vpop.f32.mrb[104].mxu1  ;;  %v1853_v45 = vpack.c.bf16 %v3687_v42, %v3683_v40 }
 0x2aa   : > { %v1619_v46 = vadd.f32 %v1618_v44, %v4654_v36  ;;  %v1620_v47 = vpop.f32.mrb[105].mxu1  ;;  %v1854_v48 = vpack.c.bf16 %v3689_v43, %v3685_v41 }
 0x2ab   : > { %v1621_v49 = vadd.f32 %v1620_v47, %v4657_v38  ;;  %v1622_v50 = vpop.f32.mrb[106].mxu1 }
 0x2ac   : > { %3698 = vtanh.f32 %v1619_v46  ;;  %v1623_v51 = vadd.f32 %v1622_v50, %v4654_v36  ;;  %v1624_v52 = vpop.f32.mrb[107].mxu1  ;;  %2345 = vmatprep.mubr.bf16.mxu0 %v1854_v48 }
 0x2ad   : > { %3700 = vtanh.f32 %v1621_v49  ;;  %v1625_v55 = vadd.f32 %v1624_v52, %v4657_v38 }
 0x2ae   : > { %v3691_v56 = vpop.eup %3690  ;;  %3702 = vtanh.f32 %v1623_v51 }
 0x2af   : > { %v3693_v57 = vpop.eup %3692  ;;  %3704 = vtanh.f32 %v1625_v55 }
 0x2b0   : > { %v3695_v59 = vpop.eup %3694 }
 0x2b1   : > { %2346 = vmatmul.mubr.bf16.gmra.mrb[224].mxu0 %v1853_v45  ;;  %v3697_v62 = vpop.eup %3696  ;;  %v1628_v61 = vpop.f32.mrb[108].mxu1  ;;  %v1855_v63 = vpack.c.bf16 %v3695_v59, %v3691_v56 }
 0x2b2   : > { %v1629_v1 = vadd.f32 %v1628_v61, %v4654_v36  ;;  %v1630_v2 = vpop.f32.mrb[109].mxu1  ;;  %v1856_v3 = vpack.c.bf16 %v3697_v62, %v3693_v57 }
 0x2b3   : > { %v1631_v5 = vadd.f32 %v1630_v2, %v4657_v38  ;;  %v1632_v6 = vpop.f32.mrb[110].mxu1 }
 0x2b4   : > { %3706 = vtanh.f32 %v1629_v1  ;;  %v1633_v7 = vadd.f32 %v1632_v6, %v4654_v36  ;;  %v1634_v0 = vpop.f32.mrb[111].mxu1  ;;  %2355 = vmatprep.mubr.bf16.mxu0 %v1856_v3 }
 0x2b5   : > { %3708 = vtanh.f32 %v1631_v5  ;;  %v1635_v8 = vadd.f32 %v1634_v0, %v4657_v38 }
 0x2b6   : > { %v3699_v9 = vpop.eup %3698  ;;  %3710 = vtanh.f32 %v1633_v7 }
 0x2b7   : > { %v3701_v10 = vpop.eup %3700  ;;  %3712 = vtanh.f32 %v1635_v8 }
 0x2b8   : > { %v3703_v11 = vpop.eup %3702 }
 0x2b9   : > { %2356 = vmatmul.mubr.bf16.gmra.mrb[228].mxu0 %v1855_v63  ;;  %v3705_v12 = vpop.eup %3704  ;;  %v1638_v13 = vpop.f32.mrb[112].mxu1  ;;  %v1857_v14 = vpack.c.bf16 %v3703_v11, %v3699_v9 }
 0x2ba   : > { %v1639_v15 = vadd.f32 %v1638_v13, %v4654_v36  ;;  %v1640_v16 = vpop.f32.mrb[113].mxu1  ;;  %v1858_v17 = vpack.c.bf16 %v3705_v12, %v3701_v10 }
 0x2bb   : > { %v1641_v18 = vadd.f32 %v1640_v16, %v4657_v38  ;;  %v1642_v19 = vpop.f32.mrb[114].mxu1 }
 0x2bc   : > { %3714 = vtanh.f32 %v1639_v15  ;;  %v1643_v4 = vadd.f32 %v1642_v19, %v4654_v36  ;;  %v1644_v20 = vpop.f32.mrb[115].mxu1  ;;  %2365 = vmatprep.mubr.bf16.mxu0 %v1858_v17 }
 0x2bd   : > { %3716 = vtanh.f32 %v1641_v18  ;;  %v1645_v21 = vadd.f32 %v1644_v20, %v4657_v38 }
 0x2be   : > { %v3707_v23 = vpop.eup %3706  ;;  %3718 = vtanh.f32 %v1643_v4 }
 0x2bf   : > { %v3709_v24 = vpop.eup %3708  ;;  %3720 = vtanh.f32 %v1645_v21 }
 0x2c0   : > { %v3711_v25 = vpop.eup %3710 }
 0x2c1   : > { %2366 = vmatmul.mubr.bf16.gmra.mrb[232].mxu0 %v1857_v14  ;;  %v3713_v27 = vpop.eup %3712  ;;  %v1859_v29 = vpack.c.bf16 %v3711_v25, %v3707_v23 }
 0x2c2   : > { %v1860_v30 = vpack.c.bf16 %v3713_v27, %v3709_v24 }
 0x2c4   : > { %v2107_v31 = vpop.f32.mrb[128].mxu0  ;;  %2375 = vmatprep.mubr.bf16.mxu0 %v1860_v30 }
 0x2c5   : > { %v2108_v32 = vadd.f32 %v2107_v31, %v4791_v26  ;;  %v1648_v33 = vpop.f32.mrb[116].mxu1  ;;  %v2109_v34 = vpop.f32.mrb[129].mxu0 }
 0x2c6   : > { %v1649_v35 = vadd.f32 %v1648_v33, %v4654_v36  ;;  %v2110_v37 = vadd.f32 %v2109_v34, %v4794_v28  ;;  %v1650_v39 = vpop.f32.mrb[117].mxu1  ;;  %v2111_v40 = vpop.f32.mrb[130].mxu0  ;;  %v4820_v34 = vld [vmem:[%s5010_s7] sm:$0x3] }
 0x2c7   : > { %v3715_v41 = vpop.eup %3714  ;;  %3722 = vtanh.f32 %v2108_v32  ;;  %v1651_v42 = vadd.f32 %v1650_v39, %v4657_v38  ;;  %v2112_v43 = vadd.f32 %v2111_v40, %v4791_v26  ;;  %v1652_v44 = vpop.f32.mrb[118].mxu1 }
 0x2c8   : > { %v2113_v45 = vpop.f32.mrb[131].mxu0  ;;  %v3717_v46 = vpop.eup %3716  ;;  %3724 = vtanh.f32 %v1649_v35  ;;  %v1653_v47 = vadd.f32 %v1652_v44, %v4654_v36 }
 0x2c9   : > { %v1654_v48 = vpop.f32.mrb[119].mxu1  ;;  %v3719_v49 = vpop.eup %3718  ;;  %3726 = vtanh.f32 %v2110_v37  ;;  %v2114_v50 = vadd.f32 %v2113_v45, %v4794_v28  ;;  %2376 = vmatmul.mubr.bf16.gmra.mrb[236].mxu0 %v1859_v29 }
 0x2ca   : > { %v3721_v51 = vpop.eup %3720  ;;  %3728 = vtanh.f32 %v1651_v42  ;;  %v1655_v52 = vadd.f32 %v1654_v48, %v4657_v38  ;;  %v1861_v55 = vpack.c.bf16 %v3719_v49, %v3715_v41 }
 0x2cb   : > { %3730 = vtanh.f32 %v2112_v43  ;;  %v1862_v56 = vpack.c.bf16 %v3721_v51, %v3717_v46  ;;  %v4827_v46 = vrot.slane %v4820_v34, %v4409_v60 }
 0x2cc   : > { %3732 = vtanh.f32 %v1653_v47  ;;  %v2117_v57 = vpop.f32.mrb[132].mxu0 }
 0x2cd   : > { %3734 = vtanh.f32 %v2114_v50  ;;  %v2118_v59 = vadd.f32 %v2117_v57, %v4791_v26  ;;  %v1658_v62 = vpop.f32.mrb[120].mxu1  ;;  %v2119_v61 = vpop.f32.mrb[133].mxu0  ;;  %2385 = vmatprep.mubr.bf16.mxu0 %v1862_v56  ;;  %2640 = vmatprep.mubr.f32.mxu1 %v4827_v46 }
 0x2ce   : > { %3736 = vtanh.f32 %v1655_v52  ;;  %v1659_v63 = vadd.f32 %v1658_v62, %v4654_v36  ;;  %v2120_v1 = vadd.f32 %v2119_v61, %v4794_v28  ;;  %v1660_v2 = vpop.f32.mrb[121].mxu1  ;;  %v2121_v3 = vpop.f32.mrb[134].mxu0 }
 0x2cf   : > { %3738 = vtanh.f32 %v2118_v59  ;;  %v1661_v5 = vadd.f32 %v1660_v2, %v4657_v38  ;;  %v2122_v6 = vadd.f32 %v2121_v3, %v4791_v26  ;;  %v1662_v7 = vpop.f32.mrb[122].mxu1  ;;  %v2123_v0 = vpop.f32.mrb[135].mxu0 }
 0x2d0   : > { %3740 = vtanh.f32 %v1659_v63  ;;  %v1663_v8 = vadd.f32 %v1662_v7, %v4654_v36  ;;  %v1664_v9 = vpop.f32.mrb[123].mxu1  ;;  %v2124_v11 = vadd.f32 %v2123_v0, %v4794_v28 }
 0x2d1   : > { %v3723_v10 = vpop.eup %3722  ;;  %3742 = vtanh.f32 %v2120_v1  ;;  %2386 = vmatmul.mubr.bf16.gmra.mrb[240].mxu0 %v1861_v55  ;;  %v1665_v13 = vadd.f32 %v1664_v9, %v4657_v38 }
 0x2d2   : > { %v3725_v12 = vpop.eup %3724  ;;  %3744 = vtanh.f32 %v1661_v5 }
 0x2d3   : > { %v3727_v14 = vpop.eup %3726  ;;  %3746 = vtanh.f32 %v2122_v6 }
 0x2d4   : > { %v3729_v15 = vpop.eup %3728  ;;  %3748 = vtanh.f32 %v1663_v8  ;;  %v2127_v16 = vpop.f32.mrb[136].mxu0 }
 0x2d5   : > { %v3731_v17 = vpop.eup %3730  ;;  %3750 = vtanh.f32 %v2124_v11  ;;  %v2128_v18 = vadd.f32 %v2127_v16, %v4791_v26  ;;  %v1668_v19 = vpop.f32.mrb[124].mxu1 }
 0x2d6   : > { %v2129_v4 = vpop.f32.mrb[137].mxu0  ;;  %v3733_v20 = vpop.eup %3732  ;;  %3752 = vtanh.f32 %v1665_v13  ;;  %v1669_v21 = vadd.f32 %v1668_v19, %v4654_v36  ;;  %v2968_v25 = vpack.c.bf16 %v3731_v17, %v3723_v10 }
 0x2d7   : > { %v2130_v22 = vadd.f32 %v2129_v4, %v4794_v28  ;;  %v1670_v23 = vpop.f32.mrb[125].mxu1  ;;  %v2131_v24 = vpop.f32.mrb[138].mxu0  ;;  %3754 = vtanh.f32 %v2128_v18  ;;  %v1863_v33 = vpack.c.bf16 %v3733_v20, %v3725_v12 }
 0x2d8   : > { %v3735_v27 = vpop.eup %3734  ;;  %v1671_v29 = vadd.f32 %v1670_v23, %v4657_v38  ;;  %v2132_v30 = vadd.f32 %v2131_v24, %v4791_v26  ;;  %v1672_v31 = vpop.f32.mrb[126].mxu1  ;;  %3756 = vtanh.f32 %v1669_v21 }
 0x2d9   : > { %v2133_v32 = vpop.f32.mrb[139].mxu0  ;;  %v3737_v35 = vpop.eup %3736  ;;  %v1673_v37 = vadd.f32 %v1672_v31, %v4654_v36  ;;  %v2966_v39 = vpack.c.bf16 %v3735_v27, %v3727_v14  ;;  %3758 = vtanh.f32 %v2130_v22 }
 0x2da   : > { %v1674_v40 = vpop.f32.mrb[127].mxu1  ;;  %v3739_v41 = vpop.eup %3738  ;;  %v2134_v42 = vadd.f32 %v2133_v32, %v4794_v28  ;;  %v1864_v43 = vpack.c.bf16 %v3737_v35, %v3729_v15  ;;  %3760 = vtanh.f32 %v1671_v29 }
 0x2db   : > { %v3741_v44 = vpop.eup %3740  ;;  %2967 = vmatprep.subr.bf16.mxu1 %v2966_v39  ;;  %v1675_v45 = vadd.f32 %v1674_v40, %v4657_v38  ;;  %3762 = vtanh.f32 %v2132_v30 }
 0x2dc   : > { %v3743_v47 = vpop.eup %3742  ;;  %2395 = vmatprep.mubr.bf16.mxu0 %v1864_v43  ;;  %2969 = vmatpush1.bf16.xpose.msra.mxu1 %v2968_v25  ;;  %3764 = vtanh.f32 %v1673_v37  ;;  %v2137_v48 = vpop.f32.mrb[140].mxu0 }
 0x2dd   : > { %v3745_v36 = vpop.eup %3744  ;;  %2396 = vmatmul.mubr.bf16.gmra.mrb[244].mxu0 %v1863_v33  ;;  %3766 = vtanh.f32 %v2134_v42  ;;  %v2138_v50 = vadd.f32 %v2137_v48, %v4791_v26  ;;  %v2139_v51 = vpop.f32.mrb[141].mxu0 }
 0x2de   : > { %v3747_v49 = vpop.eup %3746  ;;  %3768 = vtanh.f32 %v1675_v45  ;;  %v2140_v60 = vadd.f32 %v2139_v51, %v4794_v28  ;;  %v2141_v52 = vpop.f32.mrb[142].mxu0 }
 0x2df   : > { %v3749_v38 = vpop.eup %3748  ;;  %v2972_v55 = vpack.c.bf16 %v3747_v49, %v3739_v41  ;;  %3770 = vtanh.f32 %v2138_v50  ;;  %v2142_v57 = vadd.f32 %v2141_v52, %v4791_v26  ;;  %v2143_v59 = vpop.f32.mrb[143].mxu0 }
 0x2e0   : > { %v3751_v56 = vpop.eup %3750  ;;  %v1865_v62 = vpack.c.bf16 %v3749_v38, %v3741_v44  ;;  %3772 = vtanh.f32 %v2140_v60  ;;  %v2144_v63 = vadd.f32 %v2143_v59, %v4794_v28 }
 0x2e1   : > { %v3753_v61 = vpop.eup %3752  ;;  %v2970_v1 = vpack.c.bf16 %v3751_v56, %v3743_v47  ;;  %3774 = vtanh.f32 %v2142_v57 }
 0x2e2   : > { %v3755_v2 = vpop.eup %3754  ;;  %v1866_v3 = vpack.c.bf16 %v3753_v61, %v3745_v36  ;;  %3776 = vtanh.f32 %v2144_v63 }
 0x2e3   : > { %v3757_v5 = vpop.eup %3756  ;;  %2971 = vmatprep.subr.bf16.mxu1 %v2970_v1 }
 0x2e4   : > { %v3759_v6 = vpop.eup %3758  ;;  %2405 = vmatprep.mubr.bf16.mxu0 %v1866_v3  ;;  %2973 = vmatpush1.bf16.xpose.msra.mxu1 %v2972_v55  ;;  %v2147_v0 = vpop.f32.mrb[144].mxu0 }
 0x2e5   : > { %v3761_v7 = vpop.eup %3760  ;;  %2406 = vmatmul.mubr.bf16.gmra.mrb[248].mxu0 %v1865_v62  ;;  %v2148_v9 = vadd.f32 %v2147_v0, %v4791_v26  ;;  %v2149_v10 = vpop.f32.mrb[145].mxu0 }
 0x2e6   : > { %v3763_v8 = vpop.eup %3762  ;;  %v2150_v12 = vadd.f32 %v2149_v10, %v4794_v28  ;;  %v2151_v13 = vpop.f32.mrb[146].mxu0 }
 0x2e7   : > { %v3765_v11 = vpop.eup %3764  ;;  %v2976_v14 = vpack.c.bf16 %v3763_v8, %v3755_v2  ;;  %3778 = vtanh.f32 %v2148_v9  ;;  %v2152_v16 = vadd.f32 %v2151_v13, %v4791_v26  ;;  %v2153_v17 = vpop.f32.mrb[147].mxu0 }
 0x2e8   : > { %v3767_v15 = vpop.eup %3766  ;;  %v1867_v18 = vpack.c.bf16 %v3765_v11, %v3757_v5  ;;  %3780 = vtanh.f32 %v2150_v12  ;;  %v2154_v4 = vadd.f32 %v2153_v17, %v4794_v28 }
 0x2e9   : > { %v3769_v19 = vpop.eup %3768  ;;  %v2974_v20 = vpack.c.bf16 %v3767_v15, %v3759_v6  ;;  %3782 = vtanh.f32 %v2152_v16 }
 0x2ea   : > { %v3771_v21 = vpop.eup %3770  ;;  %v1868_v22 = vpack.c.bf16 %v3769_v19, %v3761_v7  ;;  %3784 = vtanh.f32 %v2154_v4 }
 0x2eb   : > { %v3773_v23 = vpop.eup %3772  ;;  %2975 = vmatprep.subr.bf16.mxu1 %v2974_v20 }
 0x2ec   : > { %v3775_v24 = vpop.eup %3774  ;;  %2415 = vmatprep.mubr.bf16.mxu0 %v1868_v22  ;;  %2977 = vmatpush1.bf16.xpose.msra.mxu1 %v2976_v14  ;;  %v2157_v27 = vpop.f32.mrb[148].mxu0 }
 0x2ed   : > { %v3777_v25 = vpop.eup %3776  ;;  %2416 = vmatmul.mubr.bf16.gmra.mrb[252].mxu0 %v1867_v18  ;;  %v2980_v29 = vpack.c.bf16 %v3775_v24, %v3771_v21  ;;  %v2158_v30 = vadd.f32 %v2157_v27, %v4791_v26  ;;  %v2159_v31 = vpop.f32.mrb[149].mxu0 }
 0x2ee   : > { %v2978_v32 = vpack.c.bf16 %v3777_v25, %v3773_v23  ;;  %v2160_v33 = vadd.f32 %v2159_v31, %v4794_v28  ;;  %v2161_v35 = vpop.f32.mrb[150].mxu0 }
 0x2ef   : > { %3786 = vtanh.f32 %v2158_v30  ;;  %v2162_v37 = vadd.f32 %v2161_v35, %v4791_v26  ;;  %v2163_v39 = vpop.f32.mrb[151].mxu0 }
 0x2f0   : > { %2979 = vmatprep.subr.bf16.mxu1 %v2978_v32  ;;  %3788 = vtanh.f32 %v2160_v33  ;;  %v2164_v40 = vadd.f32 %v2163_v39, %v4794_v28 }
 0x2f1   : > { %v3779_v41 = vpop.eup %3778  ;;  %3790 = vtanh.f32 %v2162_v37 }
 0x2f2   : > { %v3781_v42 = vpop.eup %3780  ;;  %3792 = vtanh.f32 %v2164_v40 }
 0x2f3   : > { %v3783_v43 = vpop.eup %3782 }
 0x2f4   : > { %2981 = vmatpush1.bf16.xpose.msra.mxu1 %v2980_v29  ;;  %v3785_v44 = vpop.eup %3784  ;;  %v2167_v45 = vpop.f32.mrb[152].mxu0  ;;  %v2984_v47 = vpack.c.bf16 %v3783_v43, %v3779_v41 }
 0x2f5   : > { %v2168_v36 = vadd.f32 %v2167_v45, %v4791_v26  ;;  %v2169_v48 = vpop.f32.mrb[153].mxu0  ;;  %v2982_v49 = vpack.c.bf16 %v3785_v44, %v3781_v42 }
 0x2f6   : > { %v2170_v50 = vadd.f32 %v2169_v48, %v4794_v28  ;;  %v2171_v51 = vpop.f32.mrb[154].mxu0 }
 0x2f7   : > { %3794 = vtanh.f32 %v2168_v36  ;;  %v2172_v38 = vadd.f32 %v2171_v51, %v4791_v26  ;;  %v2173_v60 = vpop.f32.mrb[155].mxu0  ;;  %2983 = vmatprep.subr.bf16.mxu1 %v2982_v49 }
 0x2f8   : > { %3796 = vtanh.f32 %v2170_v50  ;;  %v2174_v52 = vadd.f32 %v2173_v60, %v4794_v28 }
 0x2f9   : > { %v3787_v55 = vpop.eup %3786  ;;  %3798 = vtanh.f32 %v2172_v38 }
 0x2fa   : > { %v3789_v56 = vpop.eup %3788  ;;  %3800 = vtanh.f32 %v2174_v52 }
 0x2fb   : > { %v3791_v57 = vpop.eup %3790 }
 0x2fc   : > { %2985 = vmatpush1.bf16.xpose.msra.mxu1 %v2984_v47  ;;  %v3793_v59 = vpop.eup %3792  ;;  %v2177_v62 = vpop.f32.mrb[156].mxu0  ;;  %v2988_v61 = vpack.c.bf16 %v3791_v57, %v3787_v55 }
 0x2fd   : > { %v2178_v63 = vadd.f32 %v2177_v62, %v4791_v26  ;;  %v2179_v1 = vpop.f32.mrb[157].mxu0  ;;  %v2986_v2 = vpack.c.bf16 %v3793_v59, %v3789_v56 }
 0x2fe   : > { %v2180_v3 = vadd.f32 %v2179_v1, %v4794_v28  ;;  %v2181_v5 = vpop.f32.mrb[158].mxu0 }
 0x2ff   : > { %3802 = vtanh.f32 %v2178_v63  ;;  %v2182_v6 = vadd.f32 %v2181_v5, %v4791_v26  ;;  %v2183_v7 = vpop.f32.mrb[159].mxu0  ;;  %2987 = vmatprep.subr.bf16.mxu1 %v2986_v2 }
 0x300   : > { %3804 = vtanh.f32 %v2180_v3  ;;  %v2184_v0 = vadd.f32 %v2183_v7, %v4794_v28 }
 0x301   : > { %v3795_v8 = vpop.eup %3794  ;;  %3806 = vtanh.f32 %v2182_v6 }
 0x302   : > { %v3797_v9 = vpop.eup %3796  ;;  %3808 = vtanh.f32 %v2184_v0 }
 0x303   : > { %v3799_v10 = vpop.eup %3798 }
 0x304   : > { %2989 = vmatpush1.bf16.xpose.msra.mxu1 %v2988_v61  ;;  %v3801_v11 = vpop.eup %3800  ;;  %v2187_v12 = vpop.f32.mrb[160].mxu0  ;;  %v2992_v13 = vpack.c.bf16 %v3799_v10, %v3795_v8 }
 0x305   : > { %v2188_v14 = vadd.f32 %v2187_v12, %v4791_v26  ;;  %v2189_v15 = vpop.f32.mrb[161].mxu0  ;;  %v2990_v16 = vpack.c.bf16 %v3801_v11, %v3797_v9 }
 0x306   : > { %v2190_v17 = vadd.f32 %v2189_v15, %v4794_v28  ;;  %v2191_v18 = vpop.f32.mrb[162].mxu0 }
 0x307   : > { %3810 = vtanh.f32 %v2188_v14  ;;  %v2192_v19 = vadd.f32 %v2191_v18, %v4791_v26  ;;  %v2193_v4 = vpop.f32.mrb[163].mxu0  ;;  %2991 = vmatprep.subr.bf16.mxu1 %v2990_v16 }
 0x308   : > { %3812 = vtanh.f32 %v2190_v17  ;;  %v2194_v20 = vadd.f32 %v2193_v4, %v4794_v28 }
 0x309   : > { %v3803_v21 = vpop.eup %3802  ;;  %3814 = vtanh.f32 %v2192_v19 }
 0x30a   : > { %v3805_v22 = vpop.eup %3804  ;;  %3816 = vtanh.f32 %v2194_v20 }
 0x30b   : > { %v3807_v23 = vpop.eup %3806 }
 0x30c   : > { %2993 = vmatpush1.bf16.xpose.msra.mxu1 %v2992_v13  ;;  %v3809_v24 = vpop.eup %3808  ;;  %v2197_v25 = vpop.f32.mrb[164].mxu0  ;;  %v2996_v27 = vpack.c.bf16 %v3807_v23, %v3803_v21 }
 0x30d   : > { %v2198_v29 = vadd.f32 %v2197_v25, %v4791_v26  ;;  %v2199_v30 = vpop.f32.mrb[165].mxu0  ;;  %v2994_v31 = vpack.c.bf16 %v3809_v24, %v3805_v22 }
 0x30e   : > { %v2200_v32 = vadd.f32 %v2199_v30, %v4794_v28  ;;  %v2201_v33 = vpop.f32.mrb[166].mxu0 }
 0x30f   : > { %3818 = vtanh.f32 %v2198_v29  ;;  %v2202_v35 = vadd.f32 %v2201_v33, %v4791_v26  ;;  %v2203_v37 = vpop.f32.mrb[167].mxu0  ;;  %2995 = vmatprep.subr.bf16.mxu1 %v2994_v31 }
 0x310   : > { %3820 = vtanh.f32 %v2200_v32  ;;  %v2204_v39 = vadd.f32 %v2203_v37, %v4794_v28 }
 0x311   : > { %v3811_v40 = vpop.eup %3810  ;;  %3822 = vtanh.f32 %v2202_v35 }
 0x312   : > { %v3813_v41 = vpop.eup %3812  ;;  %3824 = vtanh.f32 %v2204_v39 }
 0x313   : > { %v3815_v42 = vpop.eup %3814 }
 0x314   : > { %2997 = vmatpush1.bf16.xpose.msra.mxu1 %v2996_v27  ;;  %v3817_v43 = vpop.eup %3816  ;;  %v2207_v44 = vpop.f32.mrb[168].mxu0  ;;  %v3000_v45 = vpack.c.bf16 %v3815_v42, %v3811_v40  ;;  %v2555_v27 = vld [vmem:[#allocation2] sm:$0x1] }
 0x315   : > { %v2208_v47 = vadd.f32 %v2207_v44, %v4791_v26  ;;  %v2209_v36 = vpop.f32.mrb[169].mxu0  ;;  %v2998_v48 = vpack.c.bf16 %v3817_v43, %v3813_v41  ;;  %2558 = vperm.xlu0 %3135, %v2555_v27  }
 0x316   : > { %v2210_v49 = vadd.f32 %v2209_v36, %v4794_v28  ;;  %v2211_v50 = vpop.f32.mrb[170].mxu0 }
 0x317   : > { %3826 = vtanh.f32 %v2208_v47  ;;  %v2212_v51 = vadd.f32 %v2211_v50, %v4791_v26  ;;  %v2213_v38 = vpop.f32.mrb[171].mxu0  ;;  %2999 = vmatprep.subr.bf16.mxu1 %v2998_v48 }
 0x318   : > { %3828 = vtanh.f32 %v2210_v49  ;;  %v2214_v60 = vadd.f32 %v2213_v38, %v4794_v28 }
 0x319   : > { %v3819_v52 = vpop.eup %3818  ;;  %3830 = vtanh.f32 %v2212_v51 }
 0x31a   : > { %v3821_v55 = vpop.eup %3820  ;;  %3832 = vtanh.f32 %v2214_v60 }
 0x31b   : > { %v3823_v56 = vpop.eup %3822 }
 0x31c   : > { %3001 = vmatpush1.bf16.xpose.msra.mxu1 %v3000_v45  ;;  %v3825_v57 = vpop.eup %3824  ;;  %v2217_v59 = vpop.f32.mrb[172].mxu0  ;;  %v3004_v62 = vpack.c.bf16 %v3823_v56, %v3819_v52 }
 0x31d   : > { %v2218_v61 = vadd.f32 %v2217_v59, %v4791_v26  ;;  %v2219_v63 = vpop.f32.mrb[173].mxu0  ;;  %v3002_v1 = vpack.c.bf16 %v3825_v57, %v3821_v55 }
 0x31e   : > { %v2220_v2 = vadd.f32 %v2219_v63, %v4794_v28  ;;  %v2221_v3 = vpop.f32.mrb[174].mxu0 }
 0x31f   : > { %3834 = vtanh.f32 %v2218_v61  ;;  %v2222_v5 = vadd.f32 %v2221_v3, %v4791_v26  ;;  %v2223_v6 = vpop.f32.mrb[175].mxu0  ;;  %3003 = vmatprep.subr.bf16.mxu1 %v3002_v1 }
 0x320   : > { %3836 = vtanh.f32 %v2220_v2  ;;  %v2224_v7 = vadd.f32 %v2223_v6, %v4794_v28 }
 0x321   : > { %v3827_v0 = vpop.eup %3826  ;;  %3838 = vtanh.f32 %v2222_v5 }
 0x322   : > { %v3829_v8 = vpop.eup %3828  ;;  %3840 = vtanh.f32 %v2224_v7 }
 0x323   : > { %v3831_v9 = vpop.eup %3830 }
 0x324   : > { %3005 = vmatpush1.bf16.xpose.msra.mxu1 %v3004_v62  ;;  %v3833_v10 = vpop.eup %3832  ;;  %v2227_v11 = vpop.f32.mrb[176].mxu0  ;;  %v3008_v12 = vpack.c.bf16 %v3831_v9, %v3827_v0 }
 0x325   : > { %v2228_v13 = vadd.f32 %v2227_v11, %v4791_v26  ;;  %v2229_v14 = vpop.f32.mrb[177].mxu0  ;;  %v3006_v15 = vpack.c.bf16 %v3833_v10, %v3829_v8 }
 0x326   : > { %v2230_v16 = vadd.f32 %v2229_v14, %v4794_v28  ;;  %v2231_v17 = vpop.f32.mrb[178].mxu0 }
 0x327   : > { %3842 = vtanh.f32 %v2228_v13  ;;  %v2232_v18 = vadd.f32 %v2231_v17, %v4791_v26  ;;  %v2233_v19 = vpop.f32.mrb[179].mxu0  ;;  %3007 = vmatprep.subr.bf16.mxu1 %v3006_v15 }
 0x328   : > { %3844 = vtanh.f32 %v2230_v16  ;;  %v2234_v4 = vadd.f32 %v2233_v19, %v4794_v28 }
 0x329   : > { %v3835_v20 = vpop.eup %3834  ;;  %3846 = vtanh.f32 %v2232_v18 }
 0x32a   : > { %v3837_v21 = vpop.eup %3836  ;;  %3848 = vtanh.f32 %v2234_v4 }
 0x32b   : > { %v3839_v22 = vpop.eup %3838 }
 0x32c   : > { %3009 = vmatpush1.bf16.xpose.msra.mxu1 %v3008_v12  ;;  %v3841_v23 = vpop.eup %3840  ;;  %v2237_v24 = vpop.f32.mrb[180].mxu0  ;;  %v3012_v25 = vpack.c.bf16 %v3839_v22, %v3835_v20 }
 0x32d   : > { %v2238_v29 = vadd.f32 %v2237_v24, %v4791_v26  ;;  %v2239_v30 = vpop.f32.mrb[181].mxu0  ;;  %v3010_v31 = vpack.c.bf16 %v3841_v23, %v3837_v21 }
 0x32e   : > { %v2240_v32 = vadd.f32 %v2239_v30, %v4794_v28  ;;  %v2241_v33 = vpop.f32.mrb[182].mxu0 }
 0x32f   : > { %3850 = vtanh.f32 %v2238_v29  ;;  %v2242_v35 = vadd.f32 %v2241_v33, %v4791_v26  ;;  %v2243_v37 = vpop.f32.mrb[183].mxu0  ;;  %3011 = vmatprep.subr.bf16.mxu1 %v3010_v31 }
 0x330   : > { %3852 = vtanh.f32 %v2240_v32  ;;  %v2244_v39 = vadd.f32 %v2243_v37, %v4794_v28 }
 0x331   : > { %v3843_v40 = vpop.eup %3842  ;;  %3854 = vtanh.f32 %v2242_v35 }
 0x332   : > { %v3845_v41 = vpop.eup %3844  ;;  %3856 = vtanh.f32 %v2244_v39 }
 0x333   : > { %v3847_v42 = vpop.eup %3846 }
 0x334   : > { %3013 = vmatpush1.bf16.xpose.msra.mxu1 %v3012_v25  ;;  %v3849_v43 = vpop.eup %3848  ;;  %v2247_v44 = vpop.f32.mrb[184].mxu0  ;;  %v3016_v45 = vpack.c.bf16 %v3847_v42, %v3843_v40 }
 0x335   : > { %v2248_v47 = vadd.f32 %v2247_v44, %v4791_v26  ;;  %v2249_v36 = vpop.f32.mrb[185].mxu0  ;;  %v3014_v48 = vpack.c.bf16 %v3849_v43, %v3845_v41 }
 0x336   : > { %v2250_v49 = vadd.f32 %v2249_v36, %v4794_v28  ;;  %v2251_v50 = vpop.f32.mrb[186].mxu0 }
 0x337   : > { %3858 = vtanh.f32 %v2248_v47  ;;  %v2252_v51 = vadd.f32 %v2251_v50, %v4791_v26  ;;  %v2253_v38 = vpop.f32.mrb[187].mxu0  ;;  %3015 = vmatprep.subr.bf16.mxu1 %v3014_v48  ;;  %v4894_v50 = vrot.slane %v4820_v34, %v4403_v58 }
 0x338   : > { %3860 = vtanh.f32 %v2250_v49  ;;  %v2254_v60 = vadd.f32 %v2253_v38, %v4794_v28 }
 0x339   : > { %v3851_v52 = vpop.eup %3850  ;;  %3862 = vtanh.f32 %v2252_v51 }
 0x33a   : > { %v3853_v55 = vpop.eup %3852  ;;  %3864 = vtanh.f32 %v2254_v60 }
 0x33b   : > { %v3855_v56 = vpop.eup %3854 }
 0x33c   : > { %3017 = vmatpush1.bf16.xpose.msra.mxu1 %v3016_v45  ;;  %v3857_v57 = vpop.eup %3856  ;;  %v2257_v59 = vpop.f32.mrb[188].mxu0  ;;  %v3020_v62 = vpack.c.bf16 %v3855_v56, %v3851_v52 }
 0x33d   : > { %v2258_v61 = vadd.f32 %v2257_v59, %v4791_v26  ;;  %v2259_v63 = vpop.f32.mrb[189].mxu0  ;;  %v3018_v1 = vpack.c.bf16 %v3857_v57, %v3853_v55 }
 0x33e   : > { %v2260_v2 = vadd.f32 %v2259_v63, %v4794_v28  ;;  %v2261_v3 = vpop.f32.mrb[190].mxu0 }
 0x33f   : > { %3866 = vtanh.f32 %v2258_v61  ;;  %v2262_v5 = vadd.f32 %v2261_v3, %v4791_v26  ;;  %v2263_v6 = vpop.f32.mrb[191].mxu0  ;;  %3019 = vmatprep.subr.bf16.mxu1 %v3018_v1 }
 0x340   : > { %3868 = vtanh.f32 %v2260_v2  ;;  %v2264_v7 = vadd.f32 %v2263_v6, %v4794_v28 }
 0x341   : > { %v3859_v0 = vpop.eup %3858  ;;  %3870 = vtanh.f32 %v2262_v5 }
 0x342   : > { %v3861_v8 = vpop.eup %3860  ;;  %3872 = vtanh.f32 %v2264_v7 }
 0x343   : > { %v3863_v9 = vpop.eup %3862 }
 0x344   : > { %3021 = vmatpush1.bf16.xpose.msra.mxu1 %v3020_v62  ;;  %v3865_v10 = vpop.eup %3864  ;;  %v2267_v11 = vpop.f32.mrb[192].mxu0  ;;  %v3024_v12 = vpack.c.bf16 %v3863_v9, %v3859_v0 }
 0x345   : > { %v2268_v13 = vadd.f32 %v2267_v11, %v4791_v26  ;;  %v2269_v14 = vpop.f32.mrb[193].mxu0  ;;  %v3022_v15 = vpack.c.bf16 %v3865_v10, %v3861_v8 }
 0x346   : > { %v2270_v16 = vadd.f32 %v2269_v14, %v4794_v28  ;;  %v2271_v17 = vpop.f32.mrb[194].mxu0 }
 0x347   : > { %3874 = vtanh.f32 %v2268_v13  ;;  %v2272_v18 = vadd.f32 %v2271_v17, %v4791_v26  ;;  %v2273_v19 = vpop.f32.mrb[195].mxu0  ;;  %3023 = vmatprep.subr.bf16.mxu1 %v3022_v15 }
 0x348   : > { %3876 = vtanh.f32 %v2270_v16  ;;  %v2274_v4 = vadd.f32 %v2273_v19, %v4794_v28 }
 0x349   : > { %v3867_v20 = vpop.eup %3866  ;;  %3878 = vtanh.f32 %v2272_v18 }
 0x34a   : > { %v3869_v21 = vpop.eup %3868  ;;  %3880 = vtanh.f32 %v2274_v4 }
 0x34b   : > { %v3871_v22 = vpop.eup %3870 }
 0x34c   : > { %3025 = vmatpush1.bf16.xpose.msra.mxu1 %v3024_v12  ;;  %v3873_v23 = vpop.eup %3872  ;;  %v2277_v24 = vpop.f32.mrb[196].mxu0  ;;  %v3028_v25 = vpack.c.bf16 %v3871_v22, %v3867_v20 }
 0x34d   : > { %v2278_v27 = vadd.f32 %v2277_v24, %v4791_v26  ;;  %v2279_v29 = vpop.f32.mrb[197].mxu0  ;;  %v3026_v30 = vpack.c.bf16 %v3873_v23, %v3869_v21 }
 0x34e   : > { %v2280_v31 = vadd.f32 %v2279_v29, %v4794_v28  ;;  %v2281_v32 = vpop.f32.mrb[198].mxu0 }
 0x34f   : > { %3882 = vtanh.f32 %v2278_v27  ;;  %v2282_v33 = vadd.f32 %v2281_v32, %v4791_v26  ;;  %v2283_v35 = vpop.f32.mrb[199].mxu0  ;;  %3027 = vmatprep.subr.bf16.mxu1 %v3026_v30 }
 0x350   : > { %3884 = vtanh.f32 %v2280_v31  ;;  %v2284_v37 = vadd.f32 %v2283_v35, %v4794_v28 }
 0x351   : > { %v3875_v39 = vpop.eup %3874  ;;  %3886 = vtanh.f32 %v2282_v33 }
 0x352   : > { %v3877_v40 = vpop.eup %3876  ;;  %3888 = vtanh.f32 %v2284_v37 }
 0x353   : > { %v3879_v41 = vpop.eup %3878 }
 0x354   : > { %3029 = vmatpush1.bf16.xpose.msra.mxu1 %v3028_v25  ;;  %v3881_v42 = vpop.eup %3880  ;;  %v2287_v43 = vpop.f32.mrb[200].mxu0  ;;  %v3032_v44 = vpack.c.bf16 %v3879_v41, %v3875_v39 }
 0x355   : > { %v2288_v45 = vadd.f32 %v2287_v43, %v4791_v26  ;;  %v2289_v47 = vpop.f32.mrb[201].mxu0  ;;  %v3030_v36 = vpack.c.bf16 %v3881_v42, %v3877_v40 }
 0x356   : > { %v2290_v48 = vadd.f32 %v2289_v47, %v4794_v28  ;;  %v2291_v49 = vpop.f32.mrb[202].mxu0 }
 0x357   : > { %3890 = vtanh.f32 %v2288_v45  ;;  %v2292_v51 = vadd.f32 %v2291_v49, %v4791_v26  ;;  %v2293_v38 = vpop.f32.mrb[203].mxu0  ;;  %3031 = vmatprep.subr.bf16.mxu1 %v3030_v36 }
 0x358   : > { %3892 = vtanh.f32 %v2290_v48  ;;  %v2294_v60 = vadd.f32 %v2293_v38, %v4794_v28 }
 0x359   : > { %v3883_v52 = vpop.eup %3882  ;;  %3894 = vtanh.f32 %v2292_v51 }
 0x35a   : > { %v3885_v55 = vpop.eup %3884  ;;  %3896 = vtanh.f32 %v2294_v60 }
 0x35b   : > { %2641 = vmatmul.mubr.f32.vlgmr.msra.gmra.mrb[128].mxu1 %v4894_v50  ;;  %v3887_v56 = vpop.eup %3886 }
 0x35c   : > { %3033 = vmatpush1.bf16.xpose.msra.mxu1 %v3032_v44  ;;  %2711 = vmatprep.mubr.f32.mxu1 %v4827_v46  ;;  %v3889_v34 = vpop.eup %3888  ;;  %v2297_v57 = vpop.f32.mrb[204].mxu0  ;;  %v3036_v59 = vpack.c.bf16 %v3887_v56, %v3883_v52 }
 0x35d   : > { %v2298_v62 = vadd.f32 %v2297_v57, %v4791_v26  ;;  %v2299_v61 = vpop.f32.mrb[205].mxu0  ;;  %v3034_v63 = vpack.c.bf16 %v3889_v34, %v3885_v55 }
 0x35e   : > { %v2300_v1 = vadd.f32 %v2299_v61, %v4794_v28  ;;  %v2301_v2 = vpop.f32.mrb[206].mxu0 }
 0x35f   : > { %3898 = vtanh.f32 %v2298_v62  ;;  %v2302_v3 = vadd.f32 %v2301_v2, %v4791_v26  ;;  %v2303_v5 = vpop.f32.mrb[207].mxu0  ;;  %3035 = vmatprep.subr.bf16.mxu1 %v3034_v63 }
 0x360   : > { %3900 = vtanh.f32 %v2300_v1  ;;  %v2304_v6 = vadd.f32 %v2303_v5, %v4794_v28 }
 0x361   : > { %v3891_v7 = vpop.eup %3890  ;;  %3902 = vtanh.f32 %v2302_v3 }
 0x362   : > { %v3893_v46 = vpop.eup %3892  ;;  %3904 = vtanh.f32 %v2304_v6 }
 0x363   : > { %v3895_v0 = vpop.eup %3894 }
 0x364   : > { %3037 = vmatpush1.bf16.xpose.msra.mxu1 %v3036_v59  ;;  %v3897_v8 = vpop.eup %3896  ;;  %v2307_v9 = vpop.f32.mrb[208].mxu0  ;;  %v3040_v10 = vpack.c.bf16 %v3895_v0, %v3891_v7 }
 0x365   : > { %v2308_v11 = vadd.f32 %v2307_v9, %v4791_v26  ;;  %v2309_v12 = vpop.f32.mrb[209].mxu0  ;;  %v3038_v13 = vpack.c.bf16 %v3897_v8, %v3893_v46 }
 0x366   : > { %v2310_v14 = vadd.f32 %v2309_v12, %v4794_v28  ;;  %v2311_v15 = vpop.f32.mrb[210].mxu0 }
 0x367   : > { %3906 = vtanh.f32 %v2308_v11  ;;  %v2312_v16 = vadd.f32 %v2311_v15, %v4791_v26  ;;  %v2313_v17 = vpop.f32.mrb[211].mxu0  ;;  %3039 = vmatprep.subr.bf16.mxu1 %v3038_v13 }
 0x368   : > { %3908 = vtanh.f32 %v2310_v14  ;;  %v2314_v18 = vadd.f32 %v2313_v17, %v4794_v28 }
 0x369   : > { %v3899_v19 = vpop.eup %3898  ;;  %3910 = vtanh.f32 %v2312_v16 }
 0x36a   : > { %v3901_v4 = vpop.eup %3900  ;;  %3912 = vtanh.f32 %v2314_v18 }
 0x36b   : > { %v3903_v20 = vpop.eup %3902 }
 0x36c   : > { %3041 = vmatpush1.bf16.xpose.msra.mxu1 %v3040_v10  ;;  %v3905_v21 = vpop.eup %3904  ;;  %v2317_v22 = vpop.f32.mrb[212].mxu0  ;;  %v3044_v23 = vpack.c.bf16 %v3903_v20, %v3899_v19 }
 0x36d   : > { %v2318_v24 = vadd.f32 %v2317_v22, %v4791_v26  ;;  %v2319_v25 = vpop.f32.mrb[213].mxu0  ;;  %v3042_v27 = vpack.c.bf16 %v3905_v21, %v3901_v4 }
 0x36e   : > { %v2320_v29 = vadd.f32 %v2319_v25, %v4794_v28  ;;  %v2321_v30 = vpop.f32.mrb[214].mxu0 }
 0x36f   : > { %3914 = vtanh.f32 %v2318_v24  ;;  %v2322_v31 = vadd.f32 %v2321_v30, %v4791_v26  ;;  %v2323_v32 = vpop.f32.mrb[215].mxu0  ;;  %3043 = vmatprep.subr.bf16.mxu1 %v3042_v27 }
 0x370   : > { %3916 = vtanh.f32 %v2320_v29  ;;  %v2324_v33 = vadd.f32 %v2323_v32, %v4794_v28 }
 0x371   : > { %v3907_v35 = vpop.eup %3906  ;;  %3918 = vtanh.f32 %v2322_v31 }
 0x372   : > { %v3909_v37 = vpop.eup %3908  ;;  %3920 = vtanh.f32 %v2324_v33 }
 0x373   : > { %v3911_v39 = vpop.eup %3910 }
 0x374   : > { %3045 = vmatpush1.bf16.xpose.msra.mxu1 %v3044_v23  ;;  %v3913_v40 = vpop.eup %3912  ;;  %v2327_v41 = vpop.f32.mrb[216].mxu0  ;;  %v3048_v42 = vpack.c.bf16 %v3911_v39, %v3907_v35 }
 0x375   : > { %v2328_v43 = vadd.f32 %v2327_v41, %v4791_v26  ;;  %v2329_v44 = vpop.f32.mrb[217].mxu0  ;;  %v3046_v45 = vpack.c.bf16 %v3913_v40, %v3909_v37 }
 0x376   : > { %v2330_v47 = vadd.f32 %v2329_v44, %v4794_v28  ;;  %v2331_v36 = vpop.f32.mrb[218].mxu0 }
 0x377   : > { %3922 = vtanh.f32 %v2328_v43  ;;  %v2332_v48 = vadd.f32 %v2331_v36, %v4791_v26  ;;  %v2333_v49 = vpop.f32.mrb[219].mxu0  ;;  %3047 = vmatprep.subr.bf16.mxu1 %v3046_v45 }
 0x378   : > { %3924 = vtanh.f32 %v2330_v47  ;;  %v2334_v51 = vadd.f32 %v2333_v49, %v4794_v28 }
 0x379   : > { %v3915_v38 = vpop.eup %3914  ;;  %3926 = vtanh.f32 %v2332_v48 }
 0x37a   : > { %v3917_v60 = vpop.eup %3916  ;;  %3928 = vtanh.f32 %v2334_v51 }
 0x37b   : > { %v3919_v52 = vpop.eup %3918 }
 0x37c   : > { %3049 = vmatpush1.bf16.xpose.msra.mxu1 %v3048_v42  ;;  %v3921_v55 = vpop.eup %3920  ;;  %v2337_v56 = vpop.f32.mrb[220].mxu0  ;;  %v3052_v34 = vpack.c.bf16 %v3919_v52, %v3915_v38 }
 0x37d   : > { %v2338_v57 = vadd.f32 %v2337_v56, %v4791_v26  ;;  %v2339_v59 = vpop.f32.mrb[221].mxu0  ;;  %v3050_v62 = vpack.c.bf16 %v3921_v55, %v3917_v60 }
 0x37e   : > { %v2340_v61 = vadd.f32 %v2339_v59, %v4794_v28  ;;  %v2341_v63 = vpop.f32.mrb[222].mxu0 }
 0x37f   : > { %3930 = vtanh.f32 %v2338_v57  ;;  %v2342_v1 = vadd.f32 %v2341_v63, %v4791_v26  ;;  %v2343_v2 = vpop.f32.mrb[223].mxu0  ;;  %3051 = vmatprep.subr.bf16.mxu1 %v3050_v62 }
 0x380   : > { %3932 = vtanh.f32 %v2340_v61  ;;  %v2344_v3 = vadd.f32 %v2343_v2, %v4794_v28 }
 0x381   : > { %v3923_v5 = vpop.eup %3922  ;;  %3934 = vtanh.f32 %v2342_v1 }
 0x382   : > { %v3925_v6 = vpop.eup %3924  ;;  %3936 = vtanh.f32 %v2344_v3 }
 0x383   : > { %v3927_v7 = vpop.eup %3926 }
 0x384   : > { %3053 = vmatpush1.bf16.xpose.msra.mxu1 %v3052_v34  ;;  %v3929_v46 = vpop.eup %3928  ;;  %v2347_v0 = vpop.f32.mrb[224].mxu0  ;;  %v3056_v8 = vpack.c.bf16 %v3927_v7, %v3923_v5 }
 0x385   : > { %v2348_v9 = vadd.f32 %v2347_v0, %v4791_v26  ;;  %v2349_v10 = vpop.f32.mrb[225].mxu0  ;;  %v3054_v11 = vpack.c.bf16 %v3929_v46, %v3925_v6 }
 0x386   : > { %v2350_v12 = vadd.f32 %v2349_v10, %v4794_v28  ;;  %v2351_v13 = vpop.f32.mrb[226].mxu0 }
 0x387   : > { %3938 = vtanh.f32 %v2348_v9  ;;  %v2352_v14 = vadd.f32 %v2351_v13, %v4791_v26  ;;  %v2353_v15 = vpop.f32.mrb[227].mxu0  ;;  %3055 = vmatprep.subr.bf16.mxu1 %v3054_v11 }
 0x388   : > { %3940 = vtanh.f32 %v2350_v12  ;;  %v2354_v16 = vadd.f32 %v2353_v15, %v4794_v28 }
 0x389   : > { %v3931_v17 = vpop.eup %3930  ;;  %3942 = vtanh.f32 %v2352_v14 }
 0x38a   : > { %v3933_v18 = vpop.eup %3932  ;;  %3944 = vtanh.f32 %v2354_v16 }
 0x38b   : > { %v3935_v19 = vpop.eup %3934 }
 0x38c   : > { %3057 = vmatpush1.bf16.xpose.msra.mxu1 %v3056_v8  ;;  %v3937_v4 = vpop.eup %3936  ;;  %v2357_v20 = vpop.f32.mrb[228].mxu0  ;;  %v3060_v21 = vpack.c.bf16 %v3935_v19, %v3931_v17 }
 0x38d   : > { %v2358_v22 = vadd.f32 %v2357_v20, %v4791_v26  ;;  %v2359_v23 = vpop.f32.mrb[229].mxu0  ;;  %v3058_v24 = vpack.c.bf16 %v3937_v4, %v3933_v18 }
 0x38e   : > { %v2360_v25 = vadd.f32 %v2359_v23, %v4794_v28  ;;  %v2361_v27 = vpop.f32.mrb[230].mxu0 }
 0x38f   : > { %3946 = vtanh.f32 %v2358_v22  ;;  %v2362_v29 = vadd.f32 %v2361_v27, %v4791_v26  ;;  %v2363_v30 = vpop.f32.mrb[231].mxu0  ;;  %3059 = vmatprep.subr.bf16.mxu1 %v3058_v24 }
 0x390   : > { %3948 = vtanh.f32 %v2360_v25  ;;  %v2364_v31 = vadd.f32 %v2363_v30, %v4794_v28 }
 0x391   : > { %v3939_v32 = vpop.eup %3938  ;;  %3950 = vtanh.f32 %v2362_v29 }
 0x392   : > { %v3941_v33 = vpop.eup %3940  ;;  %3952 = vtanh.f32 %v2364_v31 }
 0x393   : > { %v3943_v35 = vpop.eup %3942 }
 0x394   : > { %3061 = vmatpush1.bf16.xpose.msra.mxu1 %v3060_v21  ;;  %v3945_v37 = vpop.eup %3944  ;;  %v2367_v39 = vpop.f32.mrb[232].mxu0  ;;  %v3064_v40 = vpack.c.bf16 %v3943_v35, %v3939_v32 }
 0x395   : > { %v2368_v41 = vadd.f32 %v2367_v39, %v4791_v26  ;;  %v2369_v42 = vpop.f32.mrb[233].mxu0  ;;  %v3062_v43 = vpack.c.bf16 %v3945_v37, %v3941_v33 }
 0x396   : > { %v2370_v44 = vadd.f32 %v2369_v42, %v4794_v28  ;;  %v2371_v45 = vpop.f32.mrb[234].mxu0 }
 0x397   : > { %3954 = vtanh.f32 %v2368_v41  ;;  %v2372_v47 = vadd.f32 %v2371_v45, %v4791_v26  ;;  %v2373_v36 = vpop.f32.mrb[235].mxu0  ;;  %3063 = vmatprep.subr.bf16.mxu1 %v3062_v43 }
 0x398   : > { %3956 = vtanh.f32 %v2370_v44  ;;  %v2374_v48 = vadd.f32 %v2373_v36, %v4794_v28 }
 0x399   : > { %v3947_v49 = vpop.eup %3946  ;;  %3958 = vtanh.f32 %v2372_v47 }
 0x39a   : > { %v3949_v51 = vpop.eup %3948  ;;  %3960 = vtanh.f32 %v2374_v48 }
 0x39b   : > { %v3951_v38 = vpop.eup %3950 }
 0x39c   : > { %3065 = vmatpush1.bf16.xpose.msra.mxu1 %v3064_v40  ;;  %v3953_v60 = vpop.eup %3952  ;;  %v2377_v52 = vpop.f32.mrb[236].mxu0  ;;  %v3068_v55 = vpack.c.bf16 %v3951_v38, %v3947_v49 }
 0x39d   : > { %v2378_v56 = vadd.f32 %v2377_v52, %v4791_v26  ;;  %v2379_v34 = vpop.f32.mrb[237].mxu0  ;;  %v3066_v57 = vpack.c.bf16 %v3953_v60, %v3949_v51 }
 0x39e   : > { %v2380_v59 = vadd.f32 %v2379_v34, %v4794_v28  ;;  %v2381_v62 = vpop.f32.mrb[238].mxu0 }
 0x39f   : > { %3962 = vtanh.f32 %v2378_v56  ;;  %v2382_v61 = vadd.f32 %v2381_v62, %v4791_v26  ;;  %v2383_v63 = vpop.f32.mrb[239].mxu0  ;;  %3067 = vmatprep.subr.bf16.mxu1 %v3066_v57 }
 0x3a0   : > { %3964 = vtanh.f32 %v2380_v59  ;;  %v2384_v1 = vadd.f32 %v2383_v63, %v4794_v28 }
 0x3a1   : > { %v3955_v2 = vpop.eup %3954  ;;  %3966 = vtanh.f32 %v2382_v61 }
 0x3a2   : > { %v3957_v3 = vpop.eup %3956  ;;  %3968 = vtanh.f32 %v2384_v1 }
 0x3a3   : > { %v3959_v5 = vpop.eup %3958 }
 0x3a4   : > { %3069 = vmatpush1.bf16.xpose.msra.mxu1 %v3068_v55  ;;  %v3961_v6 = vpop.eup %3960  ;;  %v2387_v7 = vpop.f32.mrb[240].mxu0  ;;  %v3072_v46 = vpack.c.bf16 %v3959_v5, %v3955_v2 }
 0x3a5   : > { %v2388_v0 = vadd.f32 %v2387_v7, %v4791_v26  ;;  %v2389_v8 = vpop.f32.mrb[241].mxu0  ;;  %v3070_v9 = vpack.c.bf16 %v3961_v6, %v3957_v3 }
 0x3a6   : > { %v2390_v10 = vadd.f32 %v2389_v8, %v4794_v28  ;;  %v2391_v11 = vpop.f32.mrb[242].mxu0 }
 0x3a7   : > { %3970 = vtanh.f32 %v2388_v0  ;;  %v2392_v12 = vadd.f32 %v2391_v11, %v4791_v26  ;;  %v2393_v13 = vpop.f32.mrb[243].mxu0  ;;  %3071 = vmatprep.subr.bf16.mxu1 %v3070_v9 }
 0x3a8   : > { %3972 = vtanh.f32 %v2390_v10  ;;  %v2394_v14 = vadd.f32 %v2393_v13, %v4794_v28 }
 0x3a9   : > { %v3963_v15 = vpop.eup %3962  ;;  %3974 = vtanh.f32 %v2392_v12 }
 0x3aa   : > { %v3965_v16 = vpop.eup %3964  ;;  %3976 = vtanh.f32 %v2394_v14 }
 0x3ab   : > { %v3967_v17 = vpop.eup %3966 }
 0x3ac   : > { %3073 = vmatpush1.bf16.xpose.msra.mxu1 %v3072_v46  ;;  %v3969_v18 = vpop.eup %3968  ;;  %v3076_v19 = vpack.c.bf16 %v3967_v17, %v3963_v15 }
 0x3ad   : > { %v3074_v4 = vpack.c.bf16 %v3969_v18, %v3965_v16 }
 0x3af   : > { %3075 = vmatprep.subr.bf16.mxu1 %v3074_v4 }
 0x3b0   : > { %v2397_v20 = vpop.f32.mrb[244].mxu0 }
 0x3b1   : > { %v2398_v21 = vadd.f32 %v2397_v20, %v4791_v26  ;;  %v2399_v22 = vpop.f32.mrb[245].mxu0  ;;  %v3971_v23 = vpop.eup %3970 }
 0x3b2   : > { %v2400_v24 = vadd.f32 %v2399_v22, %v4794_v28  ;;  %v2401_v25 = vpop.f32.mrb[246].mxu0  ;;  %v3973_v27 = vpop.eup %3972 }
 0x3b3   : > { %3978 = vtanh.f32 %v2398_v21  ;;  %v2402_v29 = vadd.f32 %v2401_v25, %v4791_v26  ;;  %v2403_v30 = vpop.f32.mrb[247].mxu0  ;;  %v3975_v31 = vpop.eup %3974 }
 0x3b4   : > { %3980 = vtanh.f32 %v2400_v24  ;;  %v2404_v32 = vadd.f32 %v2403_v30, %v4794_v28  ;;  %3077 = vmatpush1.bf16.xpose.msra.mxu1 %v3076_v19  ;;  %v3977_v33 = vpop.eup %3976  ;;  %v3080_v35 = vpack.c.bf16 %v3975_v31, %v3971_v23 }
 0x3b5   : > { %3982 = vtanh.f32 %v2402_v29  ;;  %v3078_v37 = vpack.c.bf16 %v3977_v33, %v3973_v27  ;;  %v4083_v33 = vmov 1966171168  }
 0x3b6   : > { %3984 = vtanh.f32 %v2404_v32 }
 0x3b7   : > { %3079 = vmatprep.subr.bf16.mxu1 %v3078_v37 }
 0x3b8   : > { %v2407_v39 = vpop.f32.mrb[248].mxu0 }
 0x3b9   : > { %v2408_v40 = vadd.f32 %v2407_v39, %v4791_v26  ;;  %v2409_v41 = vpop.f32.mrb[249].mxu0 }
 0x3ba   : > { %v2410_v42 = vadd.f32 %v2409_v41, %v4794_v28  ;;  %v2411_v43 = vpop.f32.mrb[250].mxu0 }
 0x3bb   : > { %3986 = vtanh.f32 %v2408_v40  ;;  %v2412_v44 = vadd.f32 %v2411_v43, %v4791_v26  ;;  %v2413_v45 = vpop.f32.mrb[251].mxu0 }
 0x3bc   : > { %3988 = vtanh.f32 %v2410_v42  ;;  %v2414_v47 = vadd.f32 %v2413_v45, %v4794_v28  ;;  %3081 = vmatpush1.bf16.xpose.msra.mxu1 %v3080_v35  ;;  %v2749_v35 = vunpack.c.l.s4 %v4083_v33 }
 0x3bd   : > { %v3979_v36 = vpop.eup %3978  ;;  %3990 = vtanh.f32 %v2412_v44 }
 0x3be   : > { %v3981_v48 = vpop.eup %3980  ;;  %3992 = vtanh.f32 %v2414_v47  ;;  %v2750_v37 = vunpack.c.0.s8 %v2749_v35 }
 0x3bf   : > { %v3983_v49 = vpop.eup %3982 }
 0x3c0   : > { %v3985_v51 = vpop.eup %3984  ;;  %v2417_v38 = vpop.f32.mrb[252].mxu0  ;;  %v3084_v60 = vpack.c.bf16 %v3983_v49, %v3979_v36  ;;  %v2753_v40 = vsub.s32 %v2750_v37, %v4397_v54 }
 0x3c1   : > { %v2418_v52 = vadd.f32 %v2417_v38, %v4791_v26  ;;  %v2419_v55 = vpop.f32.mrb[253].mxu0  ;;  %v3082_v56 = vpack.c.bf16 %v3985_v51, %v3981_v48 }
 0x3c2   : > { %v2420_v34 = vadd.f32 %v2419_v55, %v4794_v28  ;;  %v2421_v57 = vpop.f32.mrb[254].mxu0 }
 0x3c3   : > { %3994 = vtanh.f32 %v2418_v52  ;;  %v2422_v59 = vadd.f32 %v2421_v57, %v4791_v26  ;;  %v2423_v62 = vpop.f32.mrb[255].mxu0  ;;  %3083 = vmatprep.subr.bf16.mxu1 %v3082_v56 }
 0x3c4   : > { %3996 = vtanh.f32 %v2420_v34  ;;  %v2424_v61 = vadd.f32 %v2423_v62, %v4794_v28  ;;  %3085 = vmatpush1.bf16.xpose.msra.mxu1 %v3084_v60  ;;  %v2559_v28 = vpop.permute.xlu0 %2558 }
 0x3c5   : > { %v3987_v63 = vpop.eup %3986  ;;  %3998 = vtanh.f32 %v2422_v59  ;;  %v2564_v10 = vrot.slane %v2559_v28, %v4403_v58 }
 0x3c6   : > { %v3989_v1 = vpop.eup %3988  ;;  %4000 = vtanh.f32 %v2424_v61 }
 0x3c7   : > { %v3991_v2 = vpop.eup %3990 }
 0x3c8   : > { %v3993_v3 = vpop.eup %3992  ;;  %v3088_v5 = vpack.c.bf16 %v3991_v2, %v3987_v63 }
 0x3c9   : > { %v3086_v6 = vpack.c.bf16 %v3993_v3, %v3989_v1 }
 0x3cb   : > { %3087 = vmatprep.subr.bf16.mxu1 %v3086_v6 }
 0x3cc   : > { %3089 = vmatpush1.bf16.xpose.msra.mxu1 %v3088_v5 }
 0x3cd   : > { %v3995_v7 = vpop.eup %3994 }
 0x3ce   : > { %v3997_v46 = vpop.eup %3996 }
 0x3cf   : > { %v3999_v0 = vpop.eup %3998 }
 0x3d0   : > { %v4001_v26 = vpop.eup %4000  ;;  %v3092_v8 = vpack.c.bf16 %v3999_v0, %v3995_v7 }
 0x3d1   : > { %v3090_v9 = vpack.c.bf16 %v4001_v26, %v3997_v46 }
 0x3d3   : > { %3091 = vmatprep.subr.bf16.mxu1 %v3090_v9 }
 0x3d4   : > { %3093 = vmatpush1.bf16.xpose.msra.mxu1 %v3092_v8 }
 0x3db   : > { %2712 = vmatmul.mubr.f32.vlgmr.msra.gmra.mrb[130].mxu1 %v4894_v50 }
 0x42e   : > { %v2642_v11 = vpop.f32.mrb[128].mxu1 }
 0x42f   : > { %v2643_v12 = vadd.f32 %v2642_v11, %v2564_v10  ;;  %v2644_v13 = vpop.f32.mrb[129].mxu1 }
 0x430   : > { %v2645_v14 = vadd.f32 %v2644_v13, %v2564_v10 }
 0x431   : > { %v2956_v15 = vmul.f32 -1.442695, %v2643_v12 }
 0x432   : > { %v2957_v16 = vmul.f32 -1.442695, %v2645_v14 }
 0x433   : > { %4002 = vpow2.f32 %v2956_v15 }
 0x434   : > { %4004 = vpow2.f32 %v2957_v16 }
 0x43d   : > { %v4003_v17 = vpop.eup %4002 }
 0x43e   : > { %v4005_v18 = vpop.eup %4004  ;;  %v2730_v19 = vadd.f32 1.0, %v4003_v17 }
 0x43f   : > { %v2731_v4 = vadd.f32 1.0, %v4005_v18 }
 0x440   : > { %4006 = vrcp.f32 %v2730_v19 }
 0x441   : > { %4008 = vrcp.f32 %v2731_v4 }
 0x44a   : > { %v4007_v20 = vpop.eup %4006 }
 0x44b   : > { %v4009_v21 = vpop.eup %4008 }
 0x44c   : > { %v2746_v50 = vcombine.low %v4007_v20, %v4009_v21 }
 0x44e   : > { %v2754_v43 = vrot.slane %v2746_v50, %v2753_v40 }
 0x4ae   : > { %v2713_v22 = vpop.f32.mrb[130].mxu1 }
 0x4af   : > { %v2714_v58 = vadd.f32 %v2713_v22, %v2564_v10  ;;  %v2715_v23 = vpop.f32.mrb[131].mxu1 }
 0x4b0   : > { %v2716_v24 = vadd.f32 %v2715_v23, %v2564_v10 }
 0x4b1   : > { %v2958_v25 = vmul.f32 -1.442695, %v2714_v58 }
 0x4b2   : > { %v2959_v27 = vmul.f32 -1.442695, %v2716_v24 }
 0x4b3   : > { %4010 = vpow2.f32 %v2958_v25 }
 0x4b4   : > { %4012 = vpow2.f32 %v2959_v27 }
 0x4bd   : > { %v4011_v29 = vpop.eup %4010 }
 0x4be   : > { %v4013_v30 = vpop.eup %4012  ;;  %v2732_v31 = vadd.f32 1.0, %v4011_v29 }
 0x4bf   : > { %v2733_v32 = vadd.f32 1.0, %v4013_v30 }
 0x4c0   : > { %4014 = vrcp.f32 %v2732_v31 }
 0x4c1   : > { %4016 = vrcp.f32 %v2733_v32 }
 0x4ca   : > { %v4015_v39 = vpop.eup %4014 }
 0x4cb   : > { %v4017_v41 = vpop.eup %4016 }
 0x4cc   : > { %v2747_v42 = vcombine.low %v4015_v39, %v4017_v41 }
 0x4ce   : > { %v2761_v44 = vrot.slane %v2747_v42, %v2753_v40 }
 0x4d0   : > { %v2762_v45 = vcombine.low %v2754_v43, %v2761_v44 }
 0x4d2   : > { %v2769_v47 = vrot.slane %v2762_v45, %v2753_v40 }
 0x4d4   : > { %2775 = vst.msk [vmem:[%s340_s10] sm:$0xf] %vm2773_vm2, %v2769_v47 }
 0x4d5   : > { %4031 = shalt.err (!%p4028_p3)
}
 0x4d6   : > { %s4032_s24 = scalar_lea.hbm %s4961_s18, 64  ;;  %s4036_s30 = scalar_lea.hbm %s5012_s9, 128 }
 0x4d7   : > { %p4033_p4 = scmp.ne.s32.totalorder %s4961_s18, %s4032_s24  ;;  %p4037_p9 = scmp.lt.u32.totalorder %s4961_s18, %s5012_s9 }
 0x4d8   : > { %p4038_p10 = scmp.lt.u32.totalorder %s4036_s30, %s4032_s24  ;;  %p4040_p12 = scmp.lt.u32.totalorder %s4032_s24, %s4961_s18 }
 0x4d9   : > { %p4034_p7 = pnand %p4033_p4, %p4173_p5 }
 0x4da   : > { %p4039_p11 = por %p4038_p10, %p4037_p9 }
 0x4db   : > { %p4035_p8 = pneg %p4034_p7 }
 0x4dc   : > { %p4041_p13 = por %p4040_p12, %p4039_p11 }
 0x4de   : > { %p4042_p0 = pnand %p4041_p13, %p4035_p8 }
 0x4e0   : > { %4045 = shalt.err (!%p4042_p0)
}
 0x4e1   : > { %3094 = dma.vmem_to_hbm [thread:$0]  (%p4173_p5), %s4963_s8, 64, %s4961_s18, %s2777_s29  }
 0x4e2 PF: > { %p3100_p1 = scmp.ge.s32.totalorder %s4080_s14, 2  ;;  %s2803_s17 = sand.u32 1, %s4068_s11  }
 0x4e3   : > { %s2804_s22 = scalar_lea.sflag [#allocation4], %s2803_s17 }
 0x4e4   : > { %p3097_p2 = pnand %p3100_p1, %p4177_p6 }
 0x4e6   : > { %4063 = dma.done.wait (!%p3097_p2), %s2804_s22, 64  }
 0x4e7   : > { %4065 = vsyncadd (!%p3097_p2), %s2804_s22, 4294967232  ;;  %p21_p3 = scmp.ge.s32.totalorder %s4161_s16, 4   ;;  %s5015_s11 = smov %s4072_s12 }
 0x4e8   : > { %s5016_s12 = smov %s4076_s13  ;;  %s5017_s13 = smov %s4171_s19 }
 0x4e9   : > { %s5018_s14 = smov %s4161_s16  ;;  %23 = sbr.rel (!%p21_p3) target bundleno = 6 (0x6), region = 91 }
 0x4f0   :  { %2809 = vsyncpa [#allocation4], 1 }
 0x4f1   :  { %2811 = vsyncpa [#allocation4 + $0x1], 1 }

</bundles_post_ra>
